<compile_context>
chip_gen: v6e
topology: v6e:2x2x1
jax: 0.10.0
libtpu: 0.0.40
codegen_flags: <defaults>
</compile_context>

<pallas_src>
import math

import numpy as np

import jax
import jax.numpy as jnp
from jax.experimental import pallas as pl
from jax.experimental.pallas import tpu as pltpu


# ----------------------------- Pallas kernel -------------------------------

def _make_decoder_kernel(s1, s2, s3):
    """Builds the fused decoder kernel with the per-layer int8 dequant scales
    baked in as Python constants (they are known at prepare time)."""
    f32, bf16 = jnp.float32, jnp.bfloat16

    def mm(a, b):
        return jnp.dot(a, b, preferred_element_type=f32)

    def three_tap(act, p_ref, m_ref, b_ref, scale):
        # act: (R_in, 512) f32 packed activation (rows = (batch, H), lanes = (W, C)).
        # Returns bias + sum_t P[t] @ (act @ (scale * Mq[t])) with f32 accumulation.
        #   Mq[t]: int8 banded channel/width-mixing matrix (conv taps folded in),
        #          dequantized in-kernel (values <=127 are exact in bf16).
        #   P[t] : bf16 0/1 row operator (H shift + even/odd output-row interleave).
        act_h = act.astype(bf16)
        acc = b_ref[...]                                  # (1, F_out), broadcasts
        for t in range(3):
            mq = m_ref[t].astype(f32).astype(bf16)        # int8 -> bf16 (exact)
            y = mm(act_h, mq) * scale                     # (R_in, F_out) f32
            acc = acc + mm(p_ref[t], y.astype(bf16))      # (R_out, F_out) f32
        return acc

    def kernel(cond_ref, fcw_ref, fcb_ref,
               p1_ref, m1_ref, b1_ref,
               p2_ref, m2_ref, b2_ref,
               p3_ref, m3_ref, b3_ref,
               out_ref):
        # fc (+ f32 bias) + ReLU -> packed x1: rows (b, i), lanes (j, c) == (B*8, 512)
        a1 = jnp.maximum(
            mm(cond_ref[...].astype(bf16), fcw_ref[...]) + fcb_ref[...], 0.0)
        # tconv1 (stride 2, polyphase) + ReLU  -> (B*16, 512)
        a2 = jnp.maximum(three_tap(a1, p1_ref, m1_ref, b1_ref, s1), 0.0)
        # tconv2 (stride 2, polyphase) + ReLU  -> (B*32, 512)
        a3 = jnp.maximum(three_tap(a2, p2_ref, m2_ref, b2_ref, s2), 0.0)
        # tconv3 (stride 1, pad 1), no ReLU -> (B*32, 128); lanes [0:32] are real W.
        out_ref[...] = three_tap(a3, p3_ref, m3_ref, b3_ref, s3)

    return kernel


# ----------------------- host-side weight preparation -----------------------
# (hoisted out of the forward pass; done once per parameter set)

def _round_up(x, m):
    return ((x + m - 1) // m) * m


def _fc_packed(fc_w):
    """Pack torch Linear (4096, K) weight into (pad128(8*K), 512).

    Row block i maps the condition vector to packed activation row i (the H
    index); columns are ordered (j, c) so the FC output is already in the
    width-packed NHWC layout.  Rows are zero-padded to a multiple of 128 so
    the MXU contraction dim is fully aligned."""
    kdim = fc_w.shape[1]
    w = fc_w.reshape(64, 8, 8, kdim)                         # (c, i, j, k)
    wp = np.transpose(w, (1, 3, 2, 0)).reshape(8 * kdim, 8 * 64)
    kpad = _round_up(8 * kdim, 128)
    out = np.zeros((kpad, 8 * 64), np.float32)
    out[:8 * kdim] = wp
    return out


def _fc_bias_rows(fc_b, batch):
    """FC bias in packed-row layout, tiled over batch: (B*8, 512) f32."""
    b = np.asarray(fc_b, np.float32).reshape(64, 8, 8)       # (c, i, j)
    bp = np.transpose(b, (1, 2, 0)).reshape(8, 8 * 64)       # (i, (j, c))
    return np.tile(bp, (batch, 1))


def _tconv_s2_packed(w, b, win):
    """ConvTranspose2d(k=3, s=2, p=1, op=1) -> polyphase banded matrices.

    w: (Cin, Cout, 3, 3) torch layout.  Returns (Me, Mo0, Mo1), each
    (win*Cin, 2*win*Cout), plus the packed bias (1, 2*win*Cout).
      even output rows  y[2m]   = x[m]   @ Me
      odd  output rows  y[2m+1] = x[m] @ Mo0 + x[m+1] @ Mo1
    with the W-axis polyphase / boundary handling folded into the banding."""
    cin, cout = w.shape[0], w.shape[1]
    shp = (win * cin, 2 * win * cout)
    me, mo0, mo1 = (np.zeros(shp, np.float32) for _ in range(3))

    def add(mat, n_src, q, kh, kw):
        if 0 <= n_src < win and 0 <= q < 2 * win:
            mat[n_src * cin:(n_src + 1) * cin,
                q * cout:(q + 1) * cout] += w[:, :, kh, kw]

    for n in range(win):
        # even output rows (kernel row kh = 1)
        add(me, n,     2 * n,     1, 1)
        add(me, n,     2 * n + 1, 1, 2)
        add(me, n + 1, 2 * n + 1, 1, 0)
        # odd output rows, contribution from input row m (kh = 2)
        add(mo0, n,     2 * n,     2, 1)
        add(mo0, n,     2 * n + 1, 2, 2)
        add(mo0, n + 1, 2 * n + 1, 2, 0)
        # odd output rows, contribution from input row m + 1 (kh = 0)
        add(mo1, n,     2 * n,     0, 1)
        add(mo1, n,     2 * n + 1, 0, 2)
        add(mo1, n + 1, 2 * n + 1, 0, 0)

    bias = np.tile(np.asarray(b, np.float32), 2 * win)[None, :]
    return me, mo0, mo1, bias


def _conv_s1_packed(w, b, win, fpad):
    """ConvTranspose2d(k=3, s=1, p=1) == 3x3 'same' conv with flipped kernel.

    Returns three (win*Cin, fpad) matrices for input-row offsets dh = -1, 0, +1
    and the packed bias (1, fpad).  Output features (win*Cout) are zero-padded
    to `fpad` lanes so the kernel's stores are lane-dense (no masked vst)."""
    cin, cout = w.shape[0], w.shape[1]
    fout = win * cout
    assert fpad >= fout
    mats = [np.zeros((win * cin, fpad), np.float32) for _ in range(3)]
    for j in range(win):
        for dh in (-1, 0, 1):
            for dw in (-1, 0, 1):
                n_src = j + dw
                if 0 <= n_src < win:
                    mats[dh + 1][n_src * cin:(n_src + 1) * cin,
                                 j * cout:(j + 1) * cout] += w[:, :, 1 - dh, 1 - dw]
    bias = np.zeros((1, fpad), np.float32)
    bias[0, :fout] = np.tile(np.asarray(b, np.float32), win)
    return mats[0], mats[1], mats[2], bias


def _s2_row_ops(batch, hin):
    """Row operators for a stride-2 layer: even rows, odd rows (m), odd rows (m+1)."""
    rin, rout = batch * hin, batch * 2 * hin
    pe, po0, po1 = (np.zeros((rout, rin), np.float32) for _ in range(3))
    for bb in range(batch):
        for m in range(hin):
            pe[bb * 2 * hin + 2 * m, bb * hin + m] = 1.0
            po0[bb * 2 * hin + 2 * m + 1, bb * hin + m] = 1.0
            if m + 1 < hin:
                po1[bb * 2 * hin + 2 * m + 1, bb * hin + m + 1] = 1.0
    return pe, po0, po1


def _s1_row_ops(batch, h):
    """Row operators for the stride-1 layer: select rows i-1, i, i+1 (zero at edges)."""
    r = batch * h
    up = np.zeros((r, r), np.float32)
    ct = np.eye(r, dtype=np.float32)
    dn = np.zeros((r, r), np.float32)
    for bb in range(batch):
        for i in range(h):
            if i - 1 >= 0:
                up[bb * h + i, bb * h + i - 1] = 1.0
            if i + 1 < h:
                dn[bb * h + i, bb * h + i + 1] = 1.0
    return up, ct, dn


def _quantize_stack(mats):
    """Stack 3 banded matrices and quantize to int8 with one f32 scale."""
    m = np.stack(mats).astype(np.float32)
    amax = float(np.max(np.abs(m)))
    scale = (amax / 127.0) if amax > 0.0 else 1.0
    q = np.clip(np.rint(m / scale), -127, 127).astype(np.int8)
    return q, scale


def prepare_decoder_params(params, batch):
    fc_w = np.asarray(params["fc_w"], np.float32)       # (4096, K)  torch (out, in)
    fc_b = np.asarray(params["fc_b"], np.float32)
    w1 = np.asarray(params["tconv1_w"], np.float32)     # (64, 32, 3, 3)
    b1 = np.asarray(params["tconv1_b"], np.float32)
    w2 = np.asarray(params["tconv2_w"], np.float32)     # (32, 16, 3, 3)
    b2 = np.asarray(params["tconv2_b"], np.float32)
    w3 = np.asarray(params["tconv3_w"], np.float32)     # (16, 1, 3, 3)
    b3 = np.asarray(params["tconv3_b"], np.float32)

    fcw = _fc_packed(fc_w)
    fcb = _fc_bias_rows(fc_b, batch)
    m1e, m1o0, m1o1, b1p = _tconv_s2_packed(w1, b1, win=8)
    m2e, m2o0, m2o1, b2p = _tconv_s2_packed(w2, b2, win=16)
    n3m, n3c, n3p, b3p = _conv_s1_packed(w3, b3, win=32, fpad=128)

    m1q, s1 = _quantize_stack([m1e, m1o0, m1o1])
    m2q, s2 = _quantize_stack([m2e, m2o0, m2o1])
    m3q, s3 = _quantize_stack([n3m, n3c, n3p])

    bf16, f32 = jnp.bfloat16, jnp.float32
    arrays = dict(
        fcw=jnp.asarray(fcw, bf16),
        fcb=jnp.asarray(fcb, f32),
        p1=jnp.asarray(np.stack(_s2_row_ops(batch, 8)), bf16),   # 0/1: exact in bf16
        m1=jnp.asarray(m1q), b1=jnp.asarray(b1p, f32),
        p2=jnp.asarray(np.stack(_s2_row_ops(batch, 16)), bf16),
        m2=jnp.asarray(m2q), b2=jnp.asarray(b2p, f32),
        p3=jnp.asarray(np.stack(_s1_row_ops(batch, 32)), bf16),
        m3=jnp.asarray(m3q), b3=jnp.asarray(b3p, f32),
    )
    return arrays, (s1, s2, s3)


def _build_cond_rows(cond, kpad):
    """cond (B, K) -> (B*8, kpad): row (b, i) holds cond[b] in column block i,
    zero-padded on the right so the contraction dim is a multiple of 128."""
    bsz, k = cond.shape
    eye8 = jnp.eye(8, dtype=cond.dtype)
    blocks = (eye8[None, :, :, None] * cond[:, None, None, :]).reshape(bsz * 8, 8 * k)
    return jnp.pad(blocks, ((0, 0), (0, kpad - 8 * k)))


# ------------------------------ public forward ------------------------------

def make_decoder_forward(params, batch):
    prep, scales = prepare_decoder_params(params, batch)

    kpad = int(prep["fcw"].shape[0])                     # padded contraction dim (256)
    fpad = int(prep["m3"].shape[2])                      # padded output lanes (128)

    layer_dims = ((8 * batch, 16 * batch, 512),
                  (16 * batch, 32 * batch, 512),
                  (32 * batch, 32 * batch, fpad))
    flops = 2 * (8 * batch) * kpad * 512
    for r_in, r_out, f_out in layer_dims:
        flops += 2 * 3 * (r_in * 512 * f_out + r_out * r_in * f_out)
    bytes_accessed = (8 * batch) * kpad * 4 + (32 * batch) * fpad * 4
    for v in prep.values():
        bytes_accessed += int(np.prod(v.shape)) * v.dtype.itemsize

    vmem = pl.BlockSpec(memory_space=pltpu.MemorySpace.VMEM)
    call = pl.pallas_call(
        _make_decoder_kernel(*scales),
        out_shape=jax.ShapeDtypeStruct((32 * batch, fpad), jnp.float32),
        in_specs=[vmem] * 12,
        out_specs=vmem,
        cost_estimate=pl.CostEstimate(flops=int(flops), transcendentals=0,
                                      bytes_accessed=int(bytes_accessed)),
    )

    @jax.jit
    def forward(z, width_one_hot, height_one_hot, difficulty):
        cond = jnp.concatenate(
            [z, width_one_hot, height_one_hot, difficulty], axis=1).astype(jnp.float32)
        cond_rows = _build_cond_rows(cond, kpad)
        out = call(cond_rows, prep["fcw"], prep["fcb"],
                   prep["p1"], prep["m1"], prep["b1"],
                   prep["p2"], prep["m2"], prep["b2"],
                   prep["p3"], prep["m3"], prep["b3"])
        # packed rows are (b, i) with j in lanes [0:32] -> exactly NCHW (B,1,32,32)
        return out[:, :32].reshape(batch, 1, 32, 32)

    return forward


# ----------------------- plain-JAX reference (f32) --------------------------

def _ref_conv_transpose(x, w, b, stride, padding, output_padding):
    k = w.shape[-1]
    kern = jnp.transpose(w[:, :, ::-1, ::-1], (1, 0, 2, 3))     # OIHW, flipped
    lo = k - 1 - padding
    hi = k - 1 - padding + output_padding
    y = jax.lax.conv_general_dilated(
        x, kern, window_strides=(1, 1), padding=[(lo, hi), (lo, hi)],
        lhs_dilation=(stride, stride), rhs_dilation=(1, 1),
        dimension_numbers=("NCHW", "OIHW", "NCHW"))
    return y + b.reshape(1, -1, 1, 1)


def reference_forward(params, z, width_one_hot, height_one_hot, difficulty):
    cond = jnp.concatenate([z, width_one_hot, height_one_hot, difficulty], axis=1)
    h = jax.nn.relu(cond @ params["fc_w"].T + params["fc_b"])
    x = h.reshape(h.shape[0], 64, 8, 8)
    x = jax.nn.relu(_ref_conv_transpose(x, params["tconv1_w"], params["tconv1_b"], 2, 1, 1))
    x = jax.nn.relu(_ref_conv_transpose(x, params["tconv2_w"], params["tconv2_b"], 2, 1, 1))
    return _ref_conv_transpose(x, params["tconv3_w"], params["tconv3_b"], 1, 1, 0)


# --------------------------- parameter creation ------------------------------

def init_params(key, latent_dim=5, output_channels=1, max_width=9, max_height=11):
    keys = jax.random.split(key, 8)
    din = latent_dim + max_width + max_height + 1
    dout = 64 * 8 * 8

    def u(k, shape, fan_in):
        bound = 1.0 / math.sqrt(fan_in)
        return jax.random.uniform(k, shape, jnp.float32, -bound, bound)

    return {
        "fc_w": u(keys[0], (dout, din), din),             # torch Linear (out, in)
        "fc_b": u(keys[1], (dout,), din),
        "tconv1_w": u(keys[2], (64, 32, 3, 3), 32 * 9),   # torch (Cin, Cout, kH, kW)
        "tconv1_b": u(keys[3], (32,), 32 * 9),
        "tconv2_w": u(keys[4], (32, 16, 3, 3), 16 * 9),
        "tconv2_b": u(keys[5], (16,), 16 * 9),
        "tconv3_w": u(keys[6], (16, output_channels, 3, 3), output_channels * 9),
        "tconv3_b": u(keys[7], (output_channels,), output_channels * 9),
    }


# ----------------------------------- main ------------------------------------

if __name__ == "__main__":
    key = jax.random.PRNGKey(0)
    pkey, zkey, wkey, hkey, dkey = jax.random.split(key, 5)

    B, latent_dim, max_width, max_height = 2, 5, 9, 11
    params = init_params(pkey, latent_dim, 1, max_width, max_height)

    z = jax.random.normal(zkey, (B, latent_dim), jnp.float32)
    width_one_hot = jax.nn.one_hot(
        jax.random.randint(wkey, (B,), 0, max_width), max_width, dtype=jnp.float32)
    height_one_hot = jax.nn.one_hot(
        jax.random.randint(hkey, (B,), 0, max_height), max_height, dtype=jnp.float32)
    difficulty = jax.random.uniform(dkey, (B, 1), dtype=jnp.float32)

    forward = make_decoder_forward(params, B)
    out = jax.block_until_ready(forward(z, width_one_hot, height_one_hot, difficulty))

    assert out.shape == (B, 1, 32, 32), out.shape
    assert out.dtype == jnp.float32

    # Numerical check against the f32 reference (loose tol: bf16 acts + int8 weights).
    ref = reference_forward(params, z, width_one_hot, height_one_hot, difficulty)
    max_err = float(jnp.max(jnp.abs(out - ref)))
    tol = 0.1 + 0.05 * float(jnp.max(jnp.abs(ref)))
    assert max_err < tol, (max_err, tol)

    print("KERNEL_OK")
</pallas_src>

<mosaic_0001>
module attributes {stable_mosaic.version = 11 : i64} {
  func.func @kernel(%arg0: memref<16x256xf32, #tpu.memory_space<vmem>>, %arg1: memref<256x512xbf16, #tpu.memory_space<vmem>>, %arg2: memref<16x512xf32, #tpu.memory_space<vmem>>, %arg3: memref<3x32x16xbf16, #tpu.memory_space<vmem>>, %arg4: memref<3x512x512xi8, #tpu.memory_space<vmem>>, %arg5: memref<1x512xf32, #tpu.memory_space<vmem>>, %arg6: memref<3x64x32xbf16, #tpu.memory_space<vmem>>, %arg7: memref<3x512x512xi8, #tpu.memory_space<vmem>>, %arg8: memref<1x512xf32, #tpu.memory_space<vmem>>, %arg9: memref<3x64x64xbf16, #tpu.memory_space<vmem>>, %arg10: memref<3x512x128xi8, #tpu.memory_space<vmem>>, %arg11: memref<1x128xf32, #tpu.memory_space<vmem>>, %arg12: memref<64x128xf32, #tpu.memory_space<vmem>>) attributes {dimension_semantics = [], scalar_prefetch = 0 : i64, scratch_operands = 0 : i64, tpu.core_type = #tpu.core_type<tc>} {
    %c0 = arith.constant 0 : index
    %c0_0 = arith.constant 0 : index
    %0 = vector.load %arg0[%c0, %c0_0] : memref<16x256xf32, #tpu.memory_space<vmem>>, vector<16x256xf32>
    %1 = arith.truncf %0 : vector<16x256xf32> to vector<16x256xbf16>
    %c0_1 = arith.constant 0 : index
    %c0_2 = arith.constant 0 : index
    %2 = vector.load %arg1[%c0_1, %c0_2] : memref<256x512xbf16, #tpu.memory_space<vmem>>, vector<256x512xbf16>
    %cst = arith.constant dense<0.000000e+00> : vector<16x512xf32>
    %3 = tpu.matmul %1, %2, %cst {dimension_numbers = #tpu.dot_dimension_numbers<[1], [0], [0], [1], [0, 0, 1, 1], [], []>} : vector<16x256xbf16>, vector<256x512xbf16>, vector<16x512xf32> -> vector<16x512xf32>
    %c0_3 = arith.constant 0 : index
    %c0_4 = arith.constant 0 : index
    %4 = vector.load %arg2[%c0_3, %c0_4] : memref<16x512xf32, #tpu.memory_space<vmem>>, vector<16x512xf32>
    %5 = arith.addf %3, %4 : vector<16x512xf32>
    %cst_5 = arith.constant 0.000000e+00 : f32
    %6 = vector.broadcast %cst_5 : f32 to vector<16x512xf32>
    %7 = arith.maximumf %5, %6 : vector<16x512xf32>
    %8 = arith.truncf %7 : vector<16x512xf32> to vector<16x512xbf16>
    %c0_6 = arith.constant 0 : index
    %c0_7 = arith.constant 0 : index
    %9 = vector.load %arg5[%c0_6, %c0_7] : memref<1x512xf32, #tpu.memory_space<vmem>>, vector<1x512xf32>
    %c0_8 = arith.constant 0 : index
    %c0_9 = arith.constant 0 : index
    %c0_10 = arith.constant 0 : index
    %10 = vector.load %arg4[%c0_8, %c0_9, %c0_10] : memref<3x512x512xi8, #tpu.memory_space<vmem>>, vector<1x512x512xi8>
    %11 = vector.shape_cast %10 : vector<1x512x512xi8> to vector<512x512xi8>
    %12 = arith.sitofp %11 : vector<512x512xi8> to vector<512x512xf32>
    %13 = arith.truncf %12 : vector<512x512xf32> to vector<512x512xbf16>
    %cst_11 = arith.constant dense<0.000000e+00> : vector<16x512xf32>
    %14 = tpu.matmul %8, %13, %cst_11 {dimension_numbers = #tpu.dot_dimension_numbers<[1], [0], [0], [1], [0, 0, 1, 1], [], []>} : vector<16x512xbf16>, vector<512x512xbf16>, vector<16x512xf32> -> vector<16x512xf32>
    %cst_12 = arith.constant 4.63974749E-4 : f32
    %15 = vector.broadcast %cst_12 : f32 to vector<16x512xf32>
    %16 = arith.mulf %14, %15 : vector<16x512xf32>
    %c0_13 = arith.constant 0 : index
    %c0_14 = arith.constant 0 : index
    %c0_15 = arith.constant 0 : index
    %17 = vector.load %arg3[%c0_13, %c0_14, %c0_15] : memref<3x32x16xbf16, #tpu.memory_space<vmem>>, vector<1x32x16xbf16>
    %18 = vector.shape_cast %17 : vector<1x32x16xbf16> to vector<32x16xbf16>
    %19 = arith.truncf %16 : vector<16x512xf32> to vector<16x512xbf16>
    %cst_16 = arith.constant dense<0.000000e+00> : vector<32x512xf32>
    %20 = tpu.matmul %18, %19, %cst_16 {dimension_numbers = #tpu.dot_dimension_numbers<[1], [0], [0], [1], [0, 0, 1, 1], [], []>} : vector<32x16xbf16>, vector<16x512xbf16>, vector<32x512xf32> -> vector<32x512xf32>
    %21 = vector.broadcast %9 : vector<1x512xf32> to vector<32x512xf32>
    %22 = arith.addf %21, %20 : vector<32x512xf32>
    %c1 = arith.constant 1 : index
    %c0_17 = arith.constant 0 : index
    %c0_18 = arith.constant 0 : index
    %23 = vector.load %arg4[%c1, %c0_17, %c0_18] : memref<3x512x512xi8, #tpu.memory_space<vmem>>, vector<1x512x512xi8>
    %24 = vector.shape_cast %23 : vector<1x512x512xi8> to vector<512x512xi8>
    %25 = arith.sitofp %24 : vector<512x512xi8> to vector<512x512xf32>
    %26 = arith.truncf %25 : vector<512x512xf32> to vector<512x512xbf16>
    %cst_19 = arith.constant dense<0.000000e+00> : vector<16x512xf32>
    %27 = tpu.matmul %8, %26, %cst_19 {dimension_numbers = #tpu.dot_dimension_numbers<[1], [0], [0], [1], [0, 0, 1, 1], [], []>} : vector<16x512xbf16>, vector<512x512xbf16>, vector<16x512xf32> -> vector<16x512xf32>
    %cst_20 = arith.constant 4.63974749E-4 : f32
    %28 = vector.broadcast %cst_20 : f32 to vector<16x512xf32>
    %29 = arith.mulf %27, %28 : vector<16x512xf32>
    %c1_21 = arith.constant 1 : index
    %c0_22 = arith.constant 0 : index
    %c0_23 = arith.constant 0 : index
    %30 = vector.load %arg3[%c1_21, %c0_22, %c0_23] : memref<3x32x16xbf16, #tpu.memory_space<vmem>>, vector<1x32x16xbf16>
    %31 = vector.shape_cast %30 : vector<1x32x16xbf16> to vector<32x16xbf16>
    %32 = arith.truncf %29 : vector<16x512xf32> to vector<16x512xbf16>
    %cst_24 = arith.constant dense<0.000000e+00> : vector<32x512xf32>
    %33 = tpu.matmul %31, %32, %cst_24 {dimension_numbers = #tpu.dot_dimension_numbers<[1], [0], [0], [1], [0, 0, 1, 1], [], []>} : vector<32x16xbf16>, vector<16x512xbf16>, vector<32x512xf32> -> vector<32x512xf32>
    %34 = arith.addf %22, %33 : vector<32x512xf32>
    %c2 = arith.constant 2 : index
    %c0_25 = arith.constant 0 : index
    %c0_26 = arith.constant 0 : index
    %35 = vector.load %arg4[%c2, %c0_25, %c0_26] : memref<3x512x512xi8, #tpu.memory_space<vmem>>, vector<1x512x512xi8>
    %36 = vector.shape_cast %35 : vector<1x512x512xi8> to vector<512x512xi8>
    %37 = arith.sitofp %36 : vector<512x512xi8> to vector<512x512xf32>
    %38 = arith.truncf %37 : vector<512x512xf32> to vector<512x512xbf16>
    %cst_27 = arith.constant dense<0.000000e+00> : vector<16x512xf32>
    %39 = tpu.matmul %8, %38, %cst_27 {dimension_numbers = #tpu.dot_dimension_numbers<[1], [0], [0], [1], [0, 0, 1, 1], [], []>} : vector<16x512xbf16>, vector<512x512xbf16>, vector<16x512xf32> -> vector<16x512xf32>
    %cst_28 = arith.constant 4.63974749E-4 : f32
    %40 = vector.broadcast %cst_28 : f32 to vector<16x512xf32>
    %41 = arith.mulf %39, %40 : vector<16x512xf32>
    %c2_29 = arith.constant 2 : index
    %c0_30 = arith.constant 0 : index
    %c0_31 = arith.constant 0 : index
    %42 = vector.load %arg3[%c2_29, %c0_30, %c0_31] : memref<3x32x16xbf16, #tpu.memory_space<vmem>>, vector<1x32x16xbf16>
    %43 = vector.shape_cast %42 : vector<1x32x16xbf16> to vector<32x16xbf16>
    %44 = arith.truncf %41 : vector<16x512xf32> to vector<16x512xbf16>
    %cst_32 = arith.constant dense<0.000000e+00> : vector<32x512xf32>
    %45 = tpu.matmul %43, %44, %cst_32 {dimension_numbers = #tpu.dot_dimension_numbers<[1], [0], [0], [1], [0, 0, 1, 1], [], []>} : vector<32x16xbf16>, vector<16x512xbf16>, vector<32x512xf32> -> vector<32x512xf32>
    %46 = arith.addf %34, %45 : vector<32x512xf32>
    %cst_33 = arith.constant 0.000000e+00 : f32
    %47 = vector.broadcast %cst_33 : f32 to vector<32x512xf32>
    %48 = arith.maximumf %46, %47 : vector<32x512xf32>
    %49 = arith.truncf %48 : vector<32x512xf32> to vector<32x512xbf16>
    %c0_34 = arith.constant 0 : index
    %c0_35 = arith.constant 0 : index
    %50 = vector.load %arg8[%c0_34, %c0_35] : memref<1x512xf32, #tpu.memory_space<vmem>>, vector<1x512xf32>
    %c0_36 = arith.constant 0 : index
    %c0_37 = arith.constant 0 : index
    %c0_38 = arith.constant 0 : index
    %51 = vector.load %arg7[%c0_36, %c0_37, %c0_38] : memref<3x512x512xi8, #tpu.memory_space<vmem>>, vector<1x512x512xi8>
    %52 = vector.shape_cast %51 : vector<1x512x512xi8> to vector<512x512xi8>
    %53 = arith.sitofp %52 : vector<512x512xi8> to vector<512x512xf32>
    %54 = arith.truncf %53 : vector<512x512xf32> to vector<512x512xbf16>
    %cst_39 = arith.constant dense<0.000000e+00> : vector<32x512xf32>
    %55 = tpu.matmul %49, %54, %cst_39 {dimension_numbers = #tpu.dot_dimension_numbers<[1], [0], [0], [1], [0, 0, 1, 1], [], []>} : vector<32x512xbf16>, vector<512x512xbf16>, vector<32x512xf32> -> vector<32x512xf32>
    %cst_40 = arith.constant 6.561370e-04 : f32
    %56 = vector.broadcast %cst_40 : f32 to vector<32x512xf32>
    %57 = arith.mulf %55, %56 : vector<32x512xf32>
    %c0_41 = arith.constant 0 : index
    %c0_42 = arith.constant 0 : index
    %c0_43 = arith.constant 0 : index
    %58 = vector.load %arg6[%c0_41, %c0_42, %c0_43] : memref<3x64x32xbf16, #tpu.memory_space<vmem>>, vector<1x64x32xbf16>
    %59 = vector.shape_cast %58 : vector<1x64x32xbf16> to vector<64x32xbf16>
    %60 = arith.truncf %57 : vector<32x512xf32> to vector<32x512xbf16>
    %cst_44 = arith.constant dense<0.000000e+00> : vector<64x512xf32>
    %61 = tpu.matmul %59, %60, %cst_44 {dimension_numbers = #tpu.dot_dimension_numbers<[1], [0], [0], [1], [0, 0, 1, 1], [], []>} : vector<64x32xbf16>, vector<32x512xbf16>, vector<64x512xf32> -> vector<64x512xf32>
    %62 = vector.broadcast %50 : vector<1x512xf32> to vector<64x512xf32>
    %63 = arith.addf %62, %61 : vector<64x512xf32>
    %c1_45 = arith.constant 1 : index
    %c0_46 = arith.constant 0 : index
    %c0_47 = arith.constant 0 : index
    %64 = vector.load %arg7[%c1_45, %c0_46, %c0_47] : memref<3x512x512xi8, #tpu.memory_space<vmem>>, vector<1x512x512xi8>
    %65 = vector.shape_cast %64 : vector<1x512x512xi8> to vector<512x512xi8>
    %66 = arith.sitofp %65 : vector<512x512xi8> to vector<512x512xf32>
    %67 = arith.truncf %66 : vector<512x512xf32> to vector<512x512xbf16>
    %cst_48 = arith.constant dense<0.000000e+00> : vector<32x512xf32>
    %68 = tpu.matmul %49, %67, %cst_48 {dimension_numbers = #tpu.dot_dimension_numbers<[1], [0], [0], [1], [0, 0, 1, 1], [], []>} : vector<32x512xbf16>, vector<512x512xbf16>, vector<32x512xf32> -> vector<32x512xf32>
    %cst_49 = arith.constant 6.561370e-04 : f32
    %69 = vector.broadcast %cst_49 : f32 to vector<32x512xf32>
    %70 = arith.mulf %68, %69 : vector<32x512xf32>
    %c1_50 = arith.constant 1 : index
    %c0_51 = arith.constant 0 : index
    %c0_52 = arith.constant 0 : index
    %71 = vector.load %arg6[%c1_50, %c0_51, %c0_52] : memref<3x64x32xbf16, #tpu.memory_space<vmem>>, vector<1x64x32xbf16>
    %72 = vector.shape_cast %71 : vector<1x64x32xbf16> to vector<64x32xbf16>
    %73 = arith.truncf %70 : vector<32x512xf32> to vector<32x512xbf16>
    %cst_53 = arith.constant dense<0.000000e+00> : vector<64x512xf32>
    %74 = tpu.matmul %72, %73, %cst_53 {dimension_numbers = #tpu.dot_dimension_numbers<[1], [0], [0], [1], [0, 0, 1, 1], [], []>} : vector<64x32xbf16>, vector<32x512xbf16>, vector<64x512xf32> -> vector<64x512xf32>
    %75 = arith.addf %63, %74 : vector<64x512xf32>
    %c2_54 = arith.constant 2 : index
    %c0_55 = arith.constant 0 : index
    %c0_56 = arith.constant 0 : index
    %76 = vector.load %arg7[%c2_54, %c0_55, %c0_56] : memref<3x512x512xi8, #tpu.memory_space<vmem>>, vector<1x512x512xi8>
    %77 = vector.shape_cast %76 : vector<1x512x512xi8> to vector<512x512xi8>
    %78 = arith.sitofp %77 : vector<512x512xi8> to vector<512x512xf32>
    %79 = arith.truncf %78 : vector<512x512xf32> to vector<512x512xbf16>
    %cst_57 = arith.constant dense<0.000000e+00> : vector<32x512xf32>
    %80 = tpu.matmul %49, %79, %cst_57 {dimension_numbers = #tpu.dot_dimension_numbers<[1], [0], [0], [1], [0, 0, 1, 1], [], []>} : vector<32x512xbf16>, vector<512x512xbf16>, vector<32x512xf32> -> vector<32x512xf32>
    %cst_58 = arith.constant 6.561370e-04 : f32
    %81 = vector.broadcast %cst_58 : f32 to vector<32x512xf32>
    %82 = arith.mulf %80, %81 : vector<32x512xf32>
    %c2_59 = arith.constant 2 : index
    %c0_60 = arith.constant 0 : index
    %c0_61 = arith.constant 0 : index
    %83 = vector.load %arg6[%c2_59, %c0_60, %c0_61] : memref<3x64x32xbf16, #tpu.memory_space<vmem>>, vector<1x64x32xbf16>
    %84 = vector.shape_cast %83 : vector<1x64x32xbf16> to vector<64x32xbf16>
    %85 = arith.truncf %82 : vector<32x512xf32> to vector<32x512xbf16>
    %cst_62 = arith.constant dense<0.000000e+00> : vector<64x512xf32>
    %86 = tpu.matmul %84, %85, %cst_62 {dimension_numbers = #tpu.dot_dimension_numbers<[1], [0], [0], [1], [0, 0, 1, 1], [], []>} : vector<64x32xbf16>, vector<32x512xbf16>, vector<64x512xf32> -> vector<64x512xf32>
    %87 = arith.addf %75, %86 : vector<64x512xf32>
    %cst_63 = arith.constant 0.000000e+00 : f32
    %88 = vector.broadcast %cst_63 : f32 to vector<64x512xf32>
    %89 = arith.maximumf %87, %88 : vector<64x512xf32>
    %90 = arith.truncf %89 : vector<64x512xf32> to vector<64x512xbf16>
    %c0_64 = arith.constant 0 : index
    %c0_65 = arith.constant 0 : index
    %91 = vector.load %arg11[%c0_64, %c0_65] : memref<1x128xf32, #tpu.memory_space<vmem>>, vector<1x128xf32>
    %c0_66 = arith.constant 0 : index
    %c0_67 = arith.constant 0 : index
    %c0_68 = arith.constant 0 : index
    %92 = vector.load %arg10[%c0_66, %c0_67, %c0_68] : memref<3x512x128xi8, #tpu.memory_space<vmem>>, vector<1x512x128xi8>
    %93 = vector.shape_cast %92 : vector<1x512x128xi8> to vector<512x128xi8>
    %94 = arith.sitofp %93 : vector<512x128xi8> to vector<512x128xf32>
    %95 = arith.truncf %94 : vector<512x128xf32> to vector<512x128xbf16>
    %cst_69 = arith.constant dense<0.000000e+00> : vector<64x128xf32>
    %96 = tpu.matmul %90, %95, %cst_69 {dimension_numbers = #tpu.dot_dimension_numbers<[1], [0], [0], [1], [0, 0, 1, 1], [], []>} : vector<64x512xbf16>, vector<512x128xbf16>, vector<64x128xf32> -> vector<64x128xf32>
    %cst_70 = arith.constant 0.00260396209 : f32
    %97 = vector.broadcast %cst_70 : f32 to vector<64x128xf32>
    %98 = arith.mulf %96, %97 : vector<64x128xf32>
    %c0_71 = arith.constant 0 : index
    %c0_72 = arith.constant 0 : index
    %c0_73 = arith.constant 0 : index
    %99 = vector.load %arg9[%c0_71, %c0_72, %c0_73] : memref<3x64x64xbf16, #tpu.memory_space<vmem>>, vector<1x64x64xbf16>
    %100 = vector.shape_cast %99 : vector<1x64x64xbf16> to vector<64x64xbf16>
    %101 = arith.truncf %98 : vector<64x128xf32> to vector<64x128xbf16>
    %cst_74 = arith.constant dense<0.000000e+00> : vector<64x128xf32>
    %102 = tpu.matmul %100, %101, %cst_74 {dimension_numbers = #tpu.dot_dimension_numbers<[1], [0], [0], [1], [0, 0, 1, 1], [], []>} : vector<64x64xbf16>, vector<64x128xbf16>, vector<64x128xf32> -> vector<64x128xf32>
    %103 = vector.broadcast %91 : vector<1x128xf32> to vector<64x128xf32>
    %104 = arith.addf %103, %102 : vector<64x128xf32>
    %c1_75 = arith.constant 1 : index
    %c0_76 = arith.constant 0 : index
    %c0_77 = arith.constant 0 : index
    %105 = vector.load %arg10[%c1_75, %c0_76, %c0_77] : memref<3x512x128xi8, #tpu.memory_space<vmem>>, vector<1x512x128xi8>
    %106 = vector.shape_cast %105 : vector<1x512x128xi8> to vector<512x128xi8>
    %107 = arith.sitofp %106 : vector<512x128xi8> to vector<512x128xf32>
    %108 = arith.truncf %107 : vector<512x128xf32> to vector<512x128xbf16>
    %cst_78 = arith.constant dense<0.000000e+00> : vector<64x128xf32>
    %109 = tpu.matmul %90, %108, %cst_78 {dimension_numbers = #tpu.dot_dimension_numbers<[1], [0], [0], [1], [0, 0, 1, 1], [], []>} : vector<64x512xbf16>, vector<512x128xbf16>, vector<64x128xf32> -> vector<64x128xf32>
    %cst_79 = arith.constant 0.00260396209 : f32
    %110 = vector.broadcast %cst_79 : f32 to vector<64x128xf32>
    %111 = arith.mulf %109, %110 : vector<64x128xf32>
    %c1_80 = arith.constant 1 : index
    %c0_81 = arith.constant 0 : index
    %c0_82 = arith.constant 0 : index
    %112 = vector.load %arg9[%c1_80, %c0_81, %c0_82] : memref<3x64x64xbf16, #tpu.memory_space<vmem>>, vector<1x64x64xbf16>
    %113 = vector.shape_cast %112 : vector<1x64x64xbf16> to vector<64x64xbf16>
    %114 = arith.truncf %111 : vector<64x128xf32> to vector<64x128xbf16>
    %cst_83 = arith.constant dense<0.000000e+00> : vector<64x128xf32>
    %115 = tpu.matmul %113, %114, %cst_83 {dimension_numbers = #tpu.dot_dimension_numbers<[1], [0], [0], [1], [0, 0, 1, 1], [], []>} : vector<64x64xbf16>, vector<64x128xbf16>, vector<64x128xf32> -> vector<64x128xf32>
    %116 = arith.addf %104, %115 : vector<64x128xf32>
    %c2_84 = arith.constant 2 : index
    %c0_85 = arith.constant 0 : index
    %c0_86 = arith.constant 0 : index
    %117 = vector.load %arg10[%c2_84, %c0_85, %c0_86] : memref<3x512x128xi8, #tpu.memory_space<vmem>>, vector<1x512x128xi8>
    %118 = vector.shape_cast %117 : vector<1x512x128xi8> to vector<512x128xi8>
    %119 = arith.sitofp %118 : vector<512x128xi8> to vector<512x128xf32>
    %120 = arith.truncf %119 : vector<512x128xf32> to vector<512x128xbf16>
    %cst_87 = arith.constant dense<0.000000e+00> : vector<64x128xf32>
    %121 = tpu.matmul %90, %120, %cst_87 {dimension_numbers = #tpu.dot_dimension_numbers<[1], [0], [0], [1], [0, 0, 1, 1], [], []>} : vector<64x512xbf16>, vector<512x128xbf16>, vector<64x128xf32> -> vector<64x128xf32>
    %cst_88 = arith.constant 0.00260396209 : f32
    %122 = vector.broadcast %cst_88 : f32 to vector<64x128xf32>
    %123 = arith.mulf %121, %122 : vector<64x128xf32>
    %c2_89 = arith.constant 2 : index
    %c0_90 = arith.constant 0 : index
    %c0_91 = arith.constant 0 : index
    %124 = vector.load %arg9[%c2_89, %c0_90, %c0_91] : memref<3x64x64xbf16, #tpu.memory_space<vmem>>, vector<1x64x64xbf16>
    %125 = vector.shape_cast %124 : vector<1x64x64xbf16> to vector<64x64xbf16>
    %126 = arith.truncf %123 : vector<64x128xf32> to vector<64x128xbf16>
    %cst_92 = arith.constant dense<0.000000e+00> : vector<64x128xf32>
    %127 = tpu.matmul %125, %126, %cst_92 {dimension_numbers = #tpu.dot_dimension_numbers<[1], [0], [0], [1], [0, 0, 1, 1], [], []>} : vector<64x64xbf16>, vector<64x128xbf16>, vector<64x128xf32> -> vector<64x128xf32>
    %128 = arith.addf %116, %127 : vector<64x128xf32>
    %c0_93 = arith.constant 0 : index
    %c0_94 = arith.constant 0 : index
    %129 = vector.load %arg12[%c0_93, %c0_94] : memref<64x128xf32, #tpu.memory_space<vmem>>, vector<64x128xf32>
    tpu.vector_store %arg12[%c0_93, %c0_94], %128 {strides = array<i32>} : memref<64x128xf32, #tpu.memory_space<vmem>>, vector<64x128xf32>,
    return
  }
}

</mosaic_0001>

<bundles_post_ra>
// kernel: forward.1
= control target key start
LH: loop header
LB: loop body
LE: loop exit
PB: predicated region body
PF: predicated region fallthrough
CT: control target
= control target key end

     0   :  { %17 = vsyncpa [#allocation3], 0  ;;  %s7054_s0 = inlined_call_operand.vmem [shape: f32[16,256], index: 0, kind: input, shape index: {}]   ;;  %s7055_s1 = inlined_call_operand.hbm [shape: bf16[256,512], index: 1, kind: input, shape index: {}]   ;;  %s7056_s2 = inlined_call_operand.hbm [shape: f32[16,512], index: 2, kind: input, shape index: {}]   ;;  %s7057_s3 = inlined_call_operand.hbm [shape: bf16[3,32,16], index: 3, kind: input, shape index: {}]   ;;  %s7058_s4 = inlined_call_operand.hbm [shape: s8[3,512,512], index: 4, kind: input, shape index: {}]   ;;  %s7059_s5 = inlined_call_operand.vmem [shape: f32[1,512], index: 5, kind: input, shape index: {}]   ;;  %s7060_s6 = inlined_call_operand.hbm [shape: bf16[3,64,32], index: 6, kind: input, shape index: {}]   ;;  %s7061_s7 = inlined_call_operand.hbm [shape: s8[3,512,512], index: 7, kind: input, shape index: {}]   ;;  %s7062_s8 = inlined_call_operand.vmem [shape: f32[1,512], index: 8, kind: input, shape index: {}]   ;;  %s7063_s9 = inlined_call_operand.hbm [shape: bf16[3,64,64], index: 9, kind: input, shape index: {}]   ;;  %s7064_s10 = inlined_call_operand.vmem [shape: s8[3,512,128], index: 10, kind: input, shape index: {}]   ;;  %s7065_s11 = inlined_call_operand.vmem [shape: f32[1,128], index: 11, kind: input, shape index: {}]   ;;  %s7066_s12 = inlined_call_operand.hbm [shape: f32[64,128], index: 12, kind: output, shape index: {}]  }
   0x1   :  { %18 = vsyncpa [#allocation6], 0 }
   0x2   :  { %19 = vsyncpa [#allocation9], 0 }
   0x3   :  { %20 = vsyncpa [#allocation12], 0 }
   0x4   :  { %21 = vsyncpa [#allocation4], 0  ;;  %s6010_s21 = smov [#allocation5]  }
   0x5   :  { %s41_s22 = sshll.u32 %s6010_s21, 4  ;;  %s42_s22 = int_to_ptr.vmem [resolvable:$true] %s41_s22 }
   0x6   :  { %s5848_s23 = scalar_lea.vmem %s42_s22, 1024  ;;  %p5853_p1 = scmp.lt.s32.totalorder %s42_s22, %s42_s22 }
   0x7   :  { %p5849_p0 = scmp.ne.s32.totalorder %s42_s22, %s5848_s23  ;;  %p5854_p2 = scmp.lt.s32.totalorder %s5848_s23, %s5848_s23 }
   0x9   :  { %p5855_p3 = por %p5854_p2, %p5853_p1 }
   0xb   :  { %p5856_p4 = pnand %p5855_p3, %p5849_p0 }
   0xd   :  { %5859 = shalt.err (!%p5856_p4)
}
   0xe   :  { %s6011_s24 = smov 512   ;;  %s6012_s25 = smov 32  }
   0xf   :  { %47 = dma.hbm_to_vmem [thread:$0]  %s7056_s2, 1024, %s42_s22, [#allocation6], %s6011_s24, %s6011_s24, %s6012_s25  }
  0x10   :  { %s6013_s28 = smov [#allocation8]   ;;  %s6014_s30 = smov [#allocation11]  }
  0x11   :  { %s65_s29 = sshll.u32 %s6013_s28, 4  ;;  %s91_s13 = sshll.u32 %s6014_s30, 4  ;;  %s66_s29 = int_to_ptr.vmem [resolvable:$true] %s65_s29  ;;  %s92_s13 = int_to_ptr.vmem [resolvable:$true] %s91_s13 }
  0x12   :  { %s5868_s14 = scalar_lea.vmem %s66_s29, 24576  ;;  %p5873_p6 = scmp.lt.s32.totalorder %s66_s29, %s66_s29 }
  0x13   :  { %p5869_p5 = scmp.ne.s32.totalorder %s66_s29, %s5868_s14  ;;  %p5874_p7 = scmp.lt.s32.totalorder %s5868_s14, %s5868_s14 }
  0x15   :  { %p5875_p8 = por %p5874_p7, %p5873_p6 }
  0x17   :  { %p5876_p9 = pnand %p5875_p8, %p5869_p5 }
  0x19   :  { %5879 = shalt.err (!%p5876_p9)
}
  0x1a   :  { %71 = dma.hbm_to_vmem [thread:$0]  %s7058_s4, 24576, %s66_s29, [#allocation9], %s6011_s24, %s6011_s24, %s6012_s25  }
  0x1b   :  { %s5888_s17 = scalar_lea.vmem %s92_s13, 24576  ;;  %p5893_p11 = scmp.lt.s32.totalorder %s92_s13, %s92_s13 }
  0x1c   :  { %p5889_p10 = scmp.ne.s32.totalorder %s92_s13, %s5888_s17  ;;  %p5894_p12 = scmp.lt.s32.totalorder %s5888_s17, %s5888_s17 }
  0x1e   :  { %p5895_p13 = por %p5894_p12, %p5893_p11 }
  0x20   :  { %p5896_p0 = pnand %p5895_p13, %p5889_p10 }
  0x22   :  { %5899 = shalt.err (!%p5896_p0)
}
  0x23   :  { %97 = dma.hbm_to_vmem [thread:$0]  %s7061_s7, 24576, %s92_s13, [#allocation12], %s6011_s24, %s6011_s24, %s6012_s25  }
  0x24   :  { %s6015_s19 = smov [#allocation2]  }
  0x25   :  { %s29_s20 = sshll.u32 %s6015_s19, 4  ;;  %s30_s20 = int_to_ptr.vmem [resolvable:$true] %s29_s20 }
  0x26   :  { %s5908_s21 = scalar_lea.vmem %s30_s20, 8192  ;;  %p5913_p2 = scmp.lt.s32.totalorder %s30_s20, %s30_s20 }
  0x27   :  { %p5909_p1 = scmp.ne.s32.totalorder %s30_s20, %s5908_s21  ;;  %p5914_p3 = scmp.lt.s32.totalorder %s5908_s21, %s5908_s21 }
  0x29   :  { %p5915_p4 = por %p5914_p3, %p5913_p2 }
  0x2b   :  { %p5916_p5 = pnand %p5915_p4, %p5909_p1 }
  0x2d   :  { %5919 = shalt.err (!%p5916_p5)
}
  0x2e   :  { %s6016_s4 = smov 256   ;;  %s6017_s22 = smov 16  }
  0x2f   :  { %35 = dma.hbm_to_vmem [thread:$0]  %s7055_s1, 8192, %s30_s20, [#allocation3], %s6016_s4, %s6016_s4, %s6017_s22  }
  0x30   :  { %s6018_s27 = smov [#allocation7]  }
  0x31   :  { %s53_s28 = sshll.u32 %s6018_s27, 4  ;;  %s54_s28 = int_to_ptr.vmem [resolvable:$true] %s53_s28 }
  0x32   :  { %s5928_s7 = scalar_lea.vmem %s54_s28, 768  ;;  %p5933_p7 = scmp.lt.s32.totalorder %s54_s28, %s54_s28 }
  0x33   :  { %p5929_p6 = scmp.ne.s32.totalorder %s54_s28, %s5928_s7  ;;  %p5934_p8 = scmp.lt.s32.totalorder %s5928_s7, %s5928_s7 }
  0x35   :  { %p5935_p9 = por %p5934_p8, %p5933_p7 }
  0x37   :  { %p5936_p10 = pnand %p5935_p9, %p5929_p6 }
  0x39   :  { %5939 = shalt.err (!%p5936_p10)
}
  0x3a   :  { %s6019_s24 = smov 64   ;;  %s6020_s25 = smov 4  }
  0x3b   :  { %59 = dma.hbm_to_vmem [thread:$0]  %s7057_s3, 768, %s54_s28, [#allocation6], %s6019_s24, %s6019_s24, %s6020_s25  }
  0x3c   :  { %s6021_s13 = smov [#allocation10]   ;;  %s6022_s1 = smov [#allocation13]  }
  0x3d   :  { %s79_s14 = sshll.u32 %s6021_s13, 4  ;;  %s105_s15 = sshll.u32 %s6022_s1, 4  ;;  %s80_s14 = int_to_ptr.vmem [resolvable:$true] %s79_s14  ;;  %s106_s15 = int_to_ptr.vmem [resolvable:$true] %s105_s15 }
  0x3e   :  { %s5948_s16 = scalar_lea.vmem %s80_s14, 1536  ;;  %p5953_p12 = scmp.lt.s32.totalorder %s80_s14, %s80_s14 }
  0x3f   :  { %p5949_p11 = scmp.ne.s32.totalorder %s80_s14, %s5948_s16  ;;  %p5954_p13 = scmp.lt.s32.totalorder %s5948_s16, %s5948_s16 }
  0x41   :  { %p5955_p0 = por %p5954_p13, %p5953_p12 }
  0x43   :  { %p5956_p1 = pnand %p5955_p0, %p5949_p11 }
  0x45   :  { %5959 = shalt.err (!%p5956_p1)
}
  0x46   :  { %85 = dma.hbm_to_vmem [thread:$0]  %s7060_s6, 1536, %s80_s14, [#allocation9], %s6019_s24, %s6019_s24, %s6020_s25  }
  0x47   :  { %s5968_s18 = scalar_lea.vmem %s106_s15, 1536  ;;  %p5973_p3 = scmp.lt.s32.totalorder %s106_s15, %s106_s15 }
  0x48   :  { %p5969_p2 = scmp.ne.s32.totalorder %s106_s15, %s5968_s18  ;;  %p5974_p4 = scmp.lt.s32.totalorder %s5968_s18, %s5968_s18 }
  0x4a   :  { %p5975_p5 = por %p5974_p4, %p5973_p3 }
  0x4c   :  { %p5976_p6 = pnand %p5975_p5, %p5969_p2 }
  0x4e   :  { %5979 = shalt.err (!%p5976_p6)
}
  0x4f   :  { %111 = dma.hbm_to_vmem [thread:$0]  %s7063_s9, 1536, %s106_s15, [#allocation12], %s6019_s24, %s6019_s24, %s6020_s25  }
  0x50   :  { %6000 = dma.done.wait [#allocation3], 8192  }
  0x51   :  { %6001 = vsyncadd [#allocation3], 4294959104 }
  0x52   :  { %6002 = dma.done.wait [#allocation6], 1792  }
  0x53   :  { %6003 = vsyncadd [#allocation6], 4294965504 }
  0x54   :  { %6004 = dma.done.wait [#allocation9], 26112  }
  0x55   :  { %6005 = vsyncadd [#allocation9], 4294941184 }
  0x56   :  { %6006 = dma.done.wait [#allocation12], 26112  }
  0x57   :  { %6007 = vsyncadd [#allocation12], 4294941184  ;;  %v5713_v0 = vld [vmem:[#allocation2 + $0xe4] ss:$16 sps:$4 sm:$0xff]   ;;  %v5715_v1 = vld [vmem:[#allocation2 + $0xec] ss:$16 sps:$4 sm:$0xff]  }
  0x58   :  { %536 = vmatprep.subr.bf16.mxu0 %v5713_v0  ;;  %v5717_v2 = vld [vmem:[#allocation2 + $0xe0] ss:$16 sps:$4 sm:$0xff]   ;;  %v5718_v3 = vld [vmem:[#allocation2 + $0xe8] ss:$16 sps:$4 sm:$0xff]   ;;  %579 = vmatprep.subr.bf16.mxu1 %v5715_v1  ;;  %v5719_v4 = vld [vmem:[#allocation2 + $0xc4] ss:$16 sps:$4 sm:$0xff]  }
  0x59   :  { %537 = vmatpush1.bf16.msra.mxu0 %v5717_v2  ;;  %580 = vmatpush1.bf16.msra.mxu1 %v5718_v3  ;;  %v5721_v5 = vld [vmem:[#allocation2 + $0xcc] ss:$16 sps:$4 sm:$0xff]   ;;  %v5723_v6 = vld [vmem:[#allocation2 + $0xc0] ss:$16 sps:$4 sm:$0xff]   ;;  %v5724_v7 = vld [vmem:[#allocation2 + $0xc8] ss:$16 sps:$4 sm:$0xff]  }
  0x5a   :  { %538 = vmatprep.subr.bf16.mxu0 %v5719_v4  ;;  %581 = vmatprep.subr.bf16.mxu1 %v5721_v5  ;;  %v5725_v8 = vld [vmem:[#allocation2 + $0xa4] ss:$16 sps:$4 sm:$0xff]   ;;  %v5727_v9 = vld [vmem:[#allocation2 + $0xac] ss:$16 sps:$4 sm:$0xff]   ;;  %v5729_v10 = vld [vmem:[#allocation2 + $0xa0] ss:$16 sps:$4 sm:$0xff]  }
  0x5b   :  { %v5730_v11 = vld [vmem:[#allocation2 + $0xa8] ss:$16 sps:$4 sm:$0xff]   ;;  %v5731_v12 = vld [vmem:[#allocation2 + $0x84] ss:$16 sps:$4 sm:$0xff]   ;;  %v5733_v13 = vld [vmem:[#allocation2 + $0x8c] ss:$16 sps:$4 sm:$0xff]  }
  0x5c   :  { %v5735_v14 = vld [vmem:[#allocation2 + $0x80] ss:$16 sps:$4 sm:$0xff]   ;;  %v5736_v15 = vld [vmem:[#allocation2 + $0x88] ss:$16 sps:$4 sm:$0xff]   ;;  %v5737_v16 = vld [vmem:[#allocation2 + $0x64] ss:$16 sps:$4 sm:$0xff]  }
  0x5d   :  { %539 = vmatpush1.bf16.msra.mxu0 %v5723_v6  ;;  %582 = vmatpush1.bf16.msra.mxu1 %v5724_v7  ;;  %v5739_v17 = vld [vmem:[#allocation2 + $0x6c] ss:$16 sps:$4 sm:$0xff]   ;;  %v5741_v18 = vld [vmem:[#allocation2 + $0x60] ss:$16 sps:$4 sm:$0xff]   ;;  %v5742_v19 = vld [vmem:[#allocation2 + $0x68] ss:$16 sps:$4 sm:$0xff]  }
  0x5e   :  { %540 = vmatprep.subr.bf16.mxu0 %v5725_v8  ;;  %583 = vmatprep.subr.bf16.mxu1 %v5727_v9  ;;  %v5743_v20 = vld [vmem:[#allocation2 + $0x44] ss:$16 sps:$4 sm:$0xff]   ;;  %v5745_v21 = vld [vmem:[#allocation2 + $0x4c] ss:$16 sps:$4 sm:$0xff]   ;;  %v5747_v22 = vld [vmem:[#allocation2 + $0x40] ss:$16 sps:$4 sm:$0xff]  }
  0x5f   :  { %v5748_v23 = vld [vmem:[#allocation2 + $0x48] ss:$16 sps:$4 sm:$0xff]   ;;  %v5749_v24 = vld [vmem:[#allocation2 + $0x24] ss:$16 sps:$4 sm:$0xff]   ;;  %v5751_v25 = vld [vmem:[#allocation2 + $0x2c] ss:$16 sps:$4 sm:$0xff]  }
  0x60   :  { %v5753_v26 = vld [vmem:[#allocation2 + $0x20] ss:$16 sps:$4 sm:$0xff]   ;;  %v5754_v27 = vld [vmem:[#allocation2 + $0x28] ss:$16 sps:$4 sm:$0xff]   ;;  %v5755_v28 = vld [vmem:[#allocation2 + $0x4] ss:$16 sps:$4 sm:$0xff]  }
  0x61   :  { %541 = vmatpush1.bf16.msra.mxu0 %v5729_v10  ;;  %584 = vmatpush1.bf16.msra.mxu1 %v5730_v11  ;;  %v5757_v29 = vld [vmem:[#allocation2 + $0xc] ss:$16 sps:$4 sm:$0xff]   ;;  %v5759_v30 = vld [vmem:[#allocation2] ss:$16 sps:$4 sm:$0xff]   ;;  %v5760_v31 = vld [vmem:[#allocation2 + $0x8] ss:$16 sps:$4 sm:$0xff]  }
  0x62   :  { %542 = vmatprep.subr.bf16.mxu0 %v5731_v12  ;;  %585 = vmatprep.subr.bf16.mxu1 %v5733_v13  ;;  %v5761_v32 = vld [vmem:[#allocation2 + $0x1e4] ss:$16 sps:$4 sm:$0xff]   ;;  %v5763_v33 = vld [vmem:[#allocation2 + $0x1ec] ss:$16 sps:$4 sm:$0xff]   ;;  %v5765_v34 = vld [vmem:[#allocation2 + $0x1e0] ss:$16 sps:$4 sm:$0xff]  }
  0x63   :  { %v5766_v35 = vld [vmem:[#allocation2 + $0x1e8] ss:$16 sps:$4 sm:$0xff]   ;;  %v5767_v36 = vld [vmem:[#allocation2 + $0x1c4] ss:$16 sps:$4 sm:$0xff]   ;;  %v5769_v37 = vld [vmem:[#allocation2 + $0x1cc] ss:$16 sps:$4 sm:$0xff]  }
  0x64   :  { %v5771_v38 = vld [vmem:[#allocation2 + $0x1c0] ss:$16 sps:$4 sm:$0xff]   ;;  %v5772_v39 = vld [vmem:[#allocation2 + $0x1c8] ss:$16 sps:$4 sm:$0xff]   ;;  %v5773_v40 = vld [vmem:[#allocation2 + $0x1a4] ss:$16 sps:$4 sm:$0xff]  }
  0x65   :  { %543 = vmatpush1.bf16.msra.mxu0 %v5735_v14  ;;  %586 = vmatpush1.bf16.msra.mxu1 %v5736_v15  ;;  %v5775_v41 = vld [vmem:[#allocation2 + $0x1ac] ss:$16 sps:$4 sm:$0xff]   ;;  %v5777_v42 = vld [vmem:[#allocation2 + $0x1a0] ss:$16 sps:$4 sm:$0xff]   ;;  %v5778_v43 = vld [vmem:[#allocation2 + $0x1a8] ss:$16 sps:$4 sm:$0xff]  }
  0x66   :  { %544 = vmatprep.subr.bf16.mxu0 %v5737_v16  ;;  %587 = vmatprep.subr.bf16.mxu1 %v5739_v17  ;;  %v5779_v44 = vld [vmem:[#allocation2 + $0x184] ss:$16 sps:$4 sm:$0xff]   ;;  %v5781_v45 = vld [vmem:[#allocation2 + $0x18c] ss:$16 sps:$4 sm:$0xff]   ;;  %v5783_v48 = vld [vmem:[#allocation2 + $0x180] ss:$16 sps:$4 sm:$0xff]  }
  0x67   :  { %v139_v46 = vld [vmem:[%s7054_s0 + $0x8] sm:$0xff]  ;;  %v141_v47 = vld [vmem:[%s7054_s0 + $0x18] sm:$0xff]  ;;  %v5785_v51 = vld [vmem:[#allocation2 + $0x164] ss:$16 sps:$4 sm:$0xff]   ;;  %vm1025_vm0 = vcmask 130048   ;;  %vm2696_vm1 = vcmask 261120  }
  0x68   :  { %v5784_v49 = vld [vmem:[#allocation2 + $0x188] ss:$16 sps:$4 sm:$0xff]   ;;  %v143_v50 = vpack.c.bf16 %v141_v47, %v139_v46  ;;  %v5787_v52 = vld [vmem:[#allocation2 + $0x16c] ss:$16 sps:$4 sm:$0xff]   ;;  %v5789_v53 = vld [vmem:[#allocation2 + $0x160] ss:$16 sps:$4 sm:$0xff]  }
  0x69   :  { %545 = vmatpush1.bf16.msra.mxu0 %v5741_v18  ;;  %588 = vmatpush1.bf16.msra.mxu1 %v5742_v19  ;;  %v5790_v54 = vld [vmem:[#allocation2 + $0x168] ss:$16 sps:$4 sm:$0xff]   ;;  %v5791_v55 = vld [vmem:[#allocation2 + $0x144] ss:$16 sps:$4 sm:$0xff]   ;;  %v5793_v56 = vld [vmem:[#allocation2 + $0x14c] ss:$16 sps:$4 sm:$0xff]  }
  0x6a   :  { %546 = vmatprep.subr.bf16.mxu0 %v5743_v20  ;;  %589 = vmatprep.subr.bf16.mxu1 %v5745_v21  ;;  %v5795_v57 = vld [vmem:[#allocation2 + $0x140] ss:$16 sps:$4 sm:$0xff]   ;;  %v5796_v58 = vld [vmem:[#allocation2 + $0x148] ss:$16 sps:$4 sm:$0xff]   ;;  %v5797_v59 = vld [vmem:[#allocation2 + $0x124] ss:$16 sps:$4 sm:$0xff]  }
  0x6b   :  { %568 = vmatprep.mubr.bf16.mxu0 %v143_v50  ;;  %611 = vmatprep.mubr.bf16.mxu1 %v143_v50  ;;  %v5799_v60 = vld [vmem:[#allocation2 + $0x12c] ss:$16 sps:$4 sm:$0xff]   ;;  %v5801_v61 = vld [vmem:[#allocation2 + $0x120] ss:$16 sps:$4 sm:$0xff]   ;;  %v5802_v62 = vld [vmem:[#allocation2 + $0x128] ss:$16 sps:$4 sm:$0xff]  }
  0x6c   :  { %v5803_v63 = vld [vmem:[#allocation2 + $0x104] ss:$16 sps:$4 sm:$0xff]   ;;  %v5805_v0 = vld [vmem:[#allocation2 + $0x10c] ss:$16 sps:$4 sm:$0xff]   ;;  %v5807_v3 = vld [vmem:[#allocation2 + $0x100] ss:$16 sps:$4 sm:$0xff]  }
  0x6d   :  { %547 = vmatpush1.bf16.msra.mxu0 %v5747_v22  ;;  %590 = vmatpush1.bf16.msra.mxu1 %v5748_v23  ;;  %v648_v1 = vld [vmem:[#allocation8 + $0x68] sm:$0xff]  ;;  %v138_v5 = vld [vmem:[%s7054_s0] sm:$0xff]  ;;  %v140_v6 = vld [vmem:[%s7054_s0 + $0x10] sm:$0xff]  ;;  %vm4471_vm2 = vcmask 523264  }
  0x6e   :  { %548 = vmatprep.subr.bf16.mxu0 %v5749_v24  ;;  %591 = vmatprep.subr.bf16.mxu1 %v5751_v25  ;;  %v680_v2 = vld [vmem:[#allocation8 + $0x168] sm:$0xff]  ;;  %v647_v7 = vld [vmem:[#allocation8 + $0x60] sm:$0xff]  ;;  %v728_v9 = vunpack.c.h.s8.bf16 %v648_v1  ;;  %v142_v11 = vpack.c.bf16 %v140_v6, %v138_v5  ;;  %v724_v16 = vunpack.c.l.s8.bf16 %v648_v1 }
  0x6f   :  { %v5808_v4 = vld [vmem:[#allocation2 + $0x108] ss:$16 sps:$4 sm:$0xff]   ;;  %v679_v8 = vld [vmem:[#allocation8 + $0x160] sm:$0xff]  ;;  %v792_v10 = vunpack.c.h.s8.bf16 %v680_v2  ;;  %v727_v12 = vunpack.c.h.s8.bf16 %v647_v7  ;;  %v788_v17 = vunpack.c.l.s8.bf16 %v680_v2  ;;  %v723_v20 = vunpack.c.l.s8.bf16 %v647_v7 }
  0x70   :  { %v791_v13 = vunpack.c.h.s8.bf16 %v679_v8  ;;  %v644_v14 = vld [vmem:[#allocation8 + $0x48] sm:$0xff]  ;;  %v643_v18 = vld [vmem:[#allocation8 + $0x40] sm:$0xff]  ;;  %v787_v21 = vunpack.c.l.s8.bf16 %v679_v8 }
  0x71   :  { %549 = vmatpush1.bf16.msra.mxu0 %v5753_v26  ;;  %592 = vmatpush1.bf16.msra.mxu1 %v5754_v27  ;;  %v676_v15 = vld [vmem:[#allocation8 + $0x148] sm:$0xff]  ;;  %v675_v19 = vld [vmem:[#allocation8 + $0x140] sm:$0xff]  ;;  %v720_v22 = vunpack.c.h.s8.bf16 %v644_v14  ;;  %v719_v24 = vunpack.c.h.s8.bf16 %v643_v18  ;;  %v716_v26 = vunpack.c.l.s8.bf16 %v644_v14 }
  0x72   :  { %550 = vmatprep.subr.bf16.mxu0 %v5755_v28  ;;  %593 = vmatprep.subr.bf16.mxu1 %v5757_v29  ;;  %v784_v23 = vunpack.c.h.s8.bf16 %v676_v15  ;;  %v783_v25 = vunpack.c.h.s8.bf16 %v675_v19  ;;  %v780_v27 = vunpack.c.l.s8.bf16 %v676_v15  ;;  %v640_v28 = vld [vmem:[#allocation8 + $0x28] sm:$0xff]  ;;  %v635_v46 = vld [vmem:[#allocation8] sm:$0xff] }
  0x73   :  { %v672_v29 = vld [vmem:[#allocation8 + $0x128] sm:$0xff]  ;;  %v667_v47 = vld [vmem:[#allocation8 + $0x100] sm:$0xff] }
  0x74   :  { %v692_v1 = vld [vmem:[#allocation8 + $0x1c8] sm:$0xff]  ;;  %v659_v6 = vld [vmem:[#allocation8 + $0xc0] sm:$0xff] }
  0x75   :  { %551 = vmatpush1.bf16.msra.mxu0 %v5759_v30  ;;  %594 = vmatpush1.bf16.msra.mxu1 %v5760_v31  ;;  %v715_v30 = vunpack.c.l.s8.bf16 %v643_v18  ;;  %v779_v31 = vunpack.c.l.s8.bf16 %v675_v19  ;;  %v816_v5 = vunpack.c.h.s8.bf16 %v692_v1  ;;  %v691_v7 = vld [vmem:[#allocation8 + $0x1c0] sm:$0xff]  ;;  %v751_v8 = vunpack.c.h.s8.bf16 %v659_v6 }
  0x76   :  { %552 = vmatprep.subr.bf16.mxu0 %v5761_v32  ;;  %595 = vmatprep.subr.bf16.mxu1 %v5763_v33  ;;  %v712_v32 = vunpack.c.h.s8.bf16 %v640_v28  ;;  %v776_v33 = vunpack.c.h.s8.bf16 %v672_v29  ;;  %v747_v14 = vunpack.c.l.s8.bf16 %v659_v6  ;;  %v811_v15 = vunpack.c.l.s8.bf16 %v691_v7  ;;  %v655_v18 = vld [vmem:[#allocation8 + $0xa0] sm:$0xff] }
  0x77   :  { %v687_v19 = vld [vmem:[#allocation8 + $0x1a0] sm:$0xff] }
  0x79   :  { %553 = vmatpush2.bf16.msra.mxu0 %v5765_v34  ;;  %596 = vmatpush2.bf16.msra.mxu1 %v5766_v35  ;;  %v639_v34 = vld [vmem:[#allocation8 + $0x20] sm:$0xff] }
  0x7a   :  { %554 = vmatprep.subr.bf16.mxu0 %v5767_v36  ;;  %597 = vmatprep.subr.bf16.mxu1 %v5769_v37  ;;  %v671_v35 = vld [vmem:[#allocation8 + $0x120] sm:$0xff]  ;;  %v711_v36 = vunpack.c.h.s8.bf16 %v639_v34 }
  0x7b   :  { %v775_v37 = vunpack.c.h.s8.bf16 %v671_v35 }
  0x7d   :  { %555 = vmatpush2.bf16.msra.mxu0 %v5771_v38  ;;  %598 = vmatpush2.bf16.msra.mxu1 %v5772_v39  ;;  %v708_v38 = vunpack.c.l.s8.bf16 %v640_v28  ;;  %v772_v39 = vunpack.c.l.s8.bf16 %v672_v29  ;;  %v684_v28 = vld [vmem:[#allocation8 + $0x188] sm:$0xff]  ;;  %v651_v29 = vld [vmem:[#allocation8 + $0x80] sm:$0xff] }
  0x7e   :  { %556 = vmatprep.subr.bf16.mxu0 %v5773_v40  ;;  %599 = vmatprep.subr.bf16.mxu1 %v5775_v41  ;;  %v636_v40 = vld [vmem:[#allocation8 + $0x8] sm:$0xff] }
  0x7f   :  { %v668_v41 = vld [vmem:[#allocation8 + $0x108] sm:$0xff]  ;;  %v700_v50 = vunpack.c.l.s8.bf16 %v636_v40 }
  0x81   :  { %557 = vmatpush2.bf16.msra.mxu0 %v5777_v42  ;;  %600 = vmatpush2.bf16.msra.mxu1 %v5778_v43  ;;  %v707_v42 = vunpack.c.l.s8.bf16 %v639_v34  ;;  %v771_v43 = vunpack.c.l.s8.bf16 %v671_v35  ;;  %v796_v35 = vunpack.c.l.s8.bf16 %v684_v28 }
  0x82   :  { %558 = vmatprep.subr.bf16.mxu0 %v5779_v44  ;;  %601 = vmatprep.subr.bf16.mxu1 %v5781_v45  ;;  %v704_v44 = vunpack.c.h.s8.bf16 %v636_v40  ;;  %v768_v45 = vunpack.c.h.s8.bf16 %v668_v41 }
  0x85   :  { %559 = vmatpush2.bf16.msra.mxu0 %v5783_v48  ;;  %602 = vmatpush2.bf16.msra.mxu1 %v5784_v49  ;;  %v703_v48 = vunpack.c.h.s8.bf16 %v635_v46  ;;  %v767_v49 = vunpack.c.h.s8.bf16 %v667_v47 }
  0x86   :  { %560 = vmatprep.subr.bf16.mxu0 %v5785_v51  ;;  %603 = vmatprep.subr.bf16.mxu1 %v5787_v52  ;;  %v764_v51 = vunpack.c.l.s8.bf16 %v668_v41  ;;  %v664_v52 = vld [vmem:[#allocation8 + $0xe8] sm:$0xff] }
  0x89   :  { %561 = vmatpush2.bf16.msra.mxu0 %v5789_v53  ;;  %604 = vmatpush2.bf16.msra.mxu1 %v5790_v54  ;;  %v696_v53 = vld [vmem:[#allocation8 + $0x1e8] sm:$0xff]  ;;  %v699_v54 = vunpack.c.l.s8.bf16 %v635_v46 }
  0x8a   :  { %562 = vmatprep.subr.bf16.mxu0 %v5791_v55  ;;  %605 = vmatprep.subr.bf16.mxu1 %v5793_v56  ;;  %v763_v55 = vunpack.c.l.s8.bf16 %v667_v47  ;;  %v760_v56 = vunpack.c.h.s8.bf16 %v664_v52  ;;  %v211_v46 = vld [vmem:[#allocation5 + $0x18] sm:$0xff] }
  0x8d   :  { %563 = vmatpush2.bf16.msra.mxu0 %v5795_v57  ;;  %606 = vmatpush2.bf16.msra.mxu1 %v5796_v58  ;;  %v824_v57 = vunpack.c.h.s8.bf16 %v696_v53  ;;  %v663_v58 = vld [vmem:[#allocation8 + $0xe0] sm:$0xff] }
  0x8e   :  { %564 = vmatprep.subr.bf16.mxu0 %v5797_v59  ;;  %607 = vmatprep.subr.bf16.mxu1 %v5799_v60  ;;  %v695_v59 = vld [vmem:[#allocation8 + $0x1e0] sm:$0xff]  ;;  %v759_v60 = vunpack.c.h.s8.bf16 %v663_v58  ;;  %v755_v2 = vunpack.c.l.s8.bf16 %v663_v58 }
  0x91   :  { %565 = vmatpush2.bf16.msra.mxu0 %v5801_v61  ;;  %608 = vmatpush2.bf16.msra.mxu1 %v5802_v62  ;;  %v823_v61 = vunpack.c.h.s8.bf16 %v695_v59  ;;  %v756_v62 = vunpack.c.l.s8.bf16 %v664_v52 }
  0x92   :  { %566 = vmatprep.subr.bf16.mxu0 %v5803_v63  ;;  %609 = vmatprep.subr.bf16.mxu1 %v5805_v0  ;;  %v820_v63 = vunpack.c.l.s8.bf16 %v696_v53  ;;  %v660_v0 = vld [vmem:[#allocation8 + $0xc8] sm:$0xff] }
  0x95   :  { %567 = vmatpush2.bf16.msra.mxu0 %v5807_v3  ;;  %610 = vmatpush2.bf16.msra.mxu1 %v5808_v4  ;;  %v819_v3 = vunpack.c.l.s8.bf16 %v695_v59  ;;  %v752_v4 = vunpack.c.h.s8.bf16 %v660_v0 }
  0x96   :  { %827 = vmatprep.subr.bf16.mxu0 %v728_v9  ;;  %870 = vmatprep.subr.bf16.mxu1 %v792_v10  ;;  %v815_v9 = vunpack.c.h.s8.bf16 %v691_v7  ;;  %v748_v10 = vunpack.c.l.s8.bf16 %v660_v0 }
  0x98   :  { %569 = vmatmul.mubr.bf16.vlgmr.msra.gmra.mxu0 %v142_v11  ;;  %612 = vmatmul.mubr.bf16.vlgmr.msra.gmra.mxu1 %v142_v11  ;;  %v812_v11 = vunpack.c.l.s8.bf16 %v692_v1 }
  0x99   :  { %828 = vmatpush1.bf16.msra.mxu0 %v727_v12  ;;  %871 = vmatpush1.bf16.msra.mxu1 %v791_v13  ;;  %v656_v12 = vld [vmem:[#allocation8 + $0xa8] sm:$0xff] }
  0x9a   :  { %829 = vmatprep.subr.bf16.mxu0 %v724_v16  ;;  %872 = vmatprep.subr.bf16.mxu1 %v788_v17  ;;  %v688_v13 = vld [vmem:[#allocation8 + $0x1a8] sm:$0xff]  ;;  %v744_v16 = vunpack.c.h.s8.bf16 %v656_v12 }
  0x9b   :  { %v808_v17 = vunpack.c.h.s8.bf16 %v688_v13 }
  0x9d   :  { %830 = vmatpush1.bf16.msra.mxu0 %v723_v20  ;;  %873 = vmatpush1.bf16.msra.mxu1 %v787_v21  ;;  %v743_v20 = vunpack.c.h.s8.bf16 %v655_v18  ;;  %v807_v21 = vunpack.c.h.s8.bf16 %v687_v19 }
  0x9e   :  { %831 = vmatprep.subr.bf16.mxu0 %v720_v22  ;;  %874 = vmatprep.subr.bf16.mxu1 %v784_v23  ;;  %v740_v22 = vunpack.c.l.s8.bf16 %v656_v12  ;;  %v804_v23 = vunpack.c.l.s8.bf16 %v688_v13 }
  0xa1   :  { %832 = vmatpush1.bf16.msra.mxu0 %v719_v24  ;;  %875 = vmatpush1.bf16.msra.mxu1 %v783_v25  ;;  %v739_v24 = vunpack.c.l.s8.bf16 %v655_v18  ;;  %v803_v25 = vunpack.c.l.s8.bf16 %v687_v19 }
  0xa2   :  { %833 = vmatprep.subr.bf16.mxu0 %v716_v26  ;;  %876 = vmatprep.subr.bf16.mxu1 %v780_v27  ;;  %v652_v26 = vld [vmem:[#allocation8 + $0x88] sm:$0xff] }
  0xa3   :  { %v736_v27 = vunpack.c.h.s8.bf16 %v652_v26  ;;  %v732_v34 = vunpack.c.l.s8.bf16 %v652_v26  ;;  %v645_v26 = vld [vmem:[#allocation8 + $0x50] sm:$0xff] }
  0xa5   :  { %834 = vmatpush1.bf16.msra.mxu0 %v715_v30  ;;  %877 = vmatpush1.bf16.msra.mxu1 %v779_v31  ;;  %v683_v30 = vld [vmem:[#allocation8 + $0x180] sm:$0xff]  ;;  %v800_v31 = vunpack.c.h.s8.bf16 %v684_v28  ;;  %v721_v28 = vunpack.c.h.s8.bf16 %v645_v26 }
  0xa6   :  { %835 = vmatprep.subr.bf16.mxu0 %v712_v32  ;;  %878 = vmatprep.subr.bf16.mxu1 %v776_v33  ;;  %v735_v32 = vunpack.c.h.s8.bf16 %v651_v29  ;;  %v799_v33 = vunpack.c.h.s8.bf16 %v683_v30 }
  0xa9   :  { %836 = vmatpush1.bf16.msra.mxu0 %v711_v36  ;;  %879 = vmatpush1.bf16.msra.mxu1 %v775_v37  ;;  %v731_v36 = vunpack.c.l.s8.bf16 %v651_v29  ;;  %v795_v37 = vunpack.c.l.s8.bf16 %v683_v30 }
  0xaa   :  { %837 = vmatprep.subr.bf16.mxu0 %v708_v38  ;;  %880 = vmatprep.subr.bf16.mxu1 %v772_v39  ;;  %v6125_v38 = vld [vmem:[#allocation8 + $0x78] sm:$0xff] }
  0xab   :  { %v6127_v39 = vld [vmem:[#allocation8 + $0x178] sm:$0xff]  ;;  %v730_v40 = vunpack.c.h.s8.bf16 %v6125_v38  ;;  %v726_v18 = vunpack.c.l.s8.bf16 %v6125_v38  ;;  %v641_v38 = vld [vmem:[#allocation8 + $0x30] sm:$0xff] }
  0xac   :  { %v794_v41 = vunpack.c.h.s8.bf16 %v6127_v39  ;;  %v790_v19 = vunpack.c.l.s8.bf16 %v6127_v39  ;;  %v673_v39 = vld [vmem:[#allocation8 + $0x130] sm:$0xff] }
  0xad   :  { %838 = vmatpush1.bf16.msra.mxu0 %v707_v42  ;;  %881 = vmatpush1.bf16.msra.mxu1 %v771_v43 }
  0xae   :  { %839 = vmatprep.subr.bf16.mxu0 %v704_v44  ;;  %882 = vmatprep.subr.bf16.mxu1 %v768_v45  ;;  %v209_v44 = vld [vmem:[#allocation5 + $0x8] sm:$0xff] }
  0xb1   :  { %840 = vmatpush1.bf16.msra.mxu0 %v703_v48  ;;  %883 = vmatpush1.bf16.msra.mxu1 %v767_v49  ;;  %v212_v48 = vld [vmem:[#allocation5 + $0x20] sm:$0xff]  ;;  %v214_v49 = vld [vmem:[#allocation5 + $0x30] sm:$0xff] }
  0xb2   :  { %841 = vmatprep.subr.bf16.mxu0 %v700_v50  ;;  %884 = vmatprep.subr.bf16.mxu1 %v764_v51  ;;  %v208_v50 = vld [vmem:[#allocation5] sm:$0xff]  ;;  %v210_v51 = vld [vmem:[#allocation5 + $0x10] sm:$0xff] }
  0xb5   :  { %842 = vmatpush1.bf16.msra.mxu0 %v699_v54  ;;  %885 = vmatpush1.bf16.msra.mxu1 %v763_v55  ;;  %v213_v54 = vld [vmem:[#allocation5 + $0x28] sm:$0xff]  ;;  %v215_v55 = vld [vmem:[#allocation5 + $0x38] sm:$0xff] }
  0xb6   :  { %843 = vmatprep.subr.bf16.mxu0 %v760_v56  ;;  %886 = vmatprep.subr.bf16.mxu1 %v824_v57 }
  0xb9   :  { %844 = vmatpush2.bf16.msra.mxu0 %v759_v60  ;;  %887 = vmatpush2.bf16.msra.mxu1 %v823_v61 }
  0xba   :  { %845 = vmatprep.subr.bf16.mxu0 %v756_v62  ;;  %888 = vmatprep.subr.bf16.mxu1 %v820_v63 }
  0xbd   :  { %846 = vmatpush2.bf16.msra.mxu0 %v755_v2  ;;  %889 = vmatpush2.bf16.msra.mxu1 %v819_v3 }
  0xbe   :  { %847 = vmatprep.subr.bf16.mxu0 %v752_v4  ;;  %890 = vmatprep.subr.bf16.mxu1 %v816_v5  ;;  %v649_v4 = vld [vmem:[#allocation8 + $0x70] sm:$0xff] }
  0xbf   :  { %v681_v5 = vld [vmem:[#allocation8 + $0x170] sm:$0xff] }
  0xc1   :  { %848 = vmatpush2.bf16.msra.mxu0 %v751_v8  ;;  %891 = vmatpush2.bf16.msra.mxu1 %v815_v9 }
  0xc2   :  { %849 = vmatprep.subr.bf16.mxu0 %v748_v10  ;;  %892 = vmatprep.subr.bf16.mxu1 %v812_v11 }
  0xc5   :  { %850 = vmatpush2.bf16.msra.mxu0 %v747_v14  ;;  %893 = vmatpush2.bf16.msra.mxu1 %v811_v15  ;;  %v729_v14 = vunpack.c.h.s8.bf16 %v649_v4  ;;  %v793_v15 = vunpack.c.h.s8.bf16 %v681_v5 }
  0xc6   :  { %851 = vmatprep.subr.bf16.mxu0 %v744_v16  ;;  %894 = vmatprep.subr.bf16.mxu1 %v808_v17 }
  0xc9   :  { %852 = vmatpush2.bf16.msra.mxu0 %v743_v20  ;;  %895 = vmatpush2.bf16.msra.mxu1 %v807_v21  ;;  %v646_v20 = vld [vmem:[#allocation8 + $0x58] sm:$0xff] }
  0xca   :  { %853 = vmatprep.subr.bf16.mxu0 %v740_v22  ;;  %896 = vmatprep.subr.bf16.mxu1 %v804_v23  ;;  %v678_v21 = vld [vmem:[#allocation8 + $0x158] sm:$0xff]  ;;  %v725_v22 = vunpack.c.l.s8.bf16 %v649_v4  ;;  %v789_v23 = vunpack.c.l.s8.bf16 %v681_v5  ;;  %v718_v30 = vunpack.c.l.s8.bf16 %v646_v20 }
  0xcb   :  { %v662_v4 = vld [vmem:[#allocation8 + $0xd8] sm:$0xff] }
  0xcc   :  { %v694_v5 = vld [vmem:[#allocation8 + $0x1d8] sm:$0xff] }
  0xcd   :  { %854 = vmatpush2.bf16.msra.mxu0 %v739_v24  ;;  %897 = vmatpush2.bf16.msra.mxu1 %v803_v25  ;;  %v722_v24 = vunpack.c.h.s8.bf16 %v646_v20  ;;  %v786_v25 = vunpack.c.h.s8.bf16 %v678_v21  ;;  %v658_v20 = vld [vmem:[#allocation8 + $0xb8] sm:$0xff] }
  0xce   :  { %855 = vmatprep.subr.bf16.mxu0 %v736_v27  ;;  %898 = vmatprep.subr.bf16.mxu1 %v800_v31  ;;  %v677_v27 = vld [vmem:[#allocation8 + $0x150] sm:$0xff]  ;;  %v782_v31 = vunpack.c.l.s8.bf16 %v678_v21  ;;  %v690_v21 = vld [vmem:[#allocation8 + $0x1b8] sm:$0xff] }
  0xcf   :  { %v785_v29 = vunpack.c.h.s8.bf16 %v677_v27 }
  0xd1   :  { %856 = vmatpush2.bf16.msra.mxu0 %v735_v32  ;;  %899 = vmatpush2.bf16.msra.mxu1 %v799_v33  ;;  %v642_v32 = vld [vmem:[#allocation8 + $0x38] sm:$0xff] }
  0xd2   :  { %857 = vmatprep.subr.bf16.mxu0 %v732_v34  ;;  %900 = vmatprep.subr.bf16.mxu1 %v796_v35  ;;  %v674_v33 = vld [vmem:[#allocation8 + $0x138] sm:$0xff]  ;;  %v717_v34 = vunpack.c.l.s8.bf16 %v645_v26  ;;  %v781_v35 = vunpack.c.l.s8.bf16 %v677_v27  ;;  %v657_v26 = vld [vmem:[#allocation8 + $0xb0] sm:$0xff] }
  0xd3   :  { %v689_v27 = vld [vmem:[#allocation8 + $0x1b0] sm:$0xff] }
  0xd5   :  { %858 = vmatpush2.bf16.msra.mxu0 %v731_v36  ;;  %901 = vmatpush2.bf16.msra.mxu1 %v795_v37  ;;  %v714_v36 = vunpack.c.h.s8.bf16 %v642_v32  ;;  %v778_v37 = vunpack.c.h.s8.bf16 %v674_v33 }
  0xd6   :  { %913 = vmatprep.subr.bf16.mxu0 %v730_v40  ;;  %956 = vmatprep.subr.bf16.mxu1 %v794_v41  ;;  %v713_v40 = vunpack.c.h.s8.bf16 %v641_v38  ;;  %v777_v41 = vunpack.c.h.s8.bf16 %v673_v39 }
 0x158   :  { %v570_v42 = vpop.f32.mrf.mxu0  ;;  %v613_v43 = vpop.f32.mrf.mxu1 }
 0x159   :  { %v571_v60 = vadd.f32 %v570_v42, %v208_v50  ;;  %v614_v61 = vadd.f32 %v613_v43, %v210_v51  ;;  %v710_v42 = vunpack.c.l.s8.bf16 %v642_v32  ;;  %v774_v43 = vunpack.c.l.s8.bf16 %v674_v33  ;;  %v637_v50 = vld [vmem:[#allocation8 + $0x10] sm:$0xff]  ;;  %v654_v32 = vld [vmem:[#allocation8 + $0x98] sm:$0xff] }
 0x15a   :  { %v572_v45 = vpop.f32.mrf.mxu0  ;;  %v615_v47 = vpop.f32.mrf.mxu1  ;;  %v669_v51 = vld [vmem:[#allocation8 + $0x110] sm:$0xff]  ;;  %v686_v33 = vld [vmem:[#allocation8 + $0x198] sm:$0xff] }
 0x15b   :  { %v573_v56 = vadd.f32 %v572_v45, %v209_v44  ;;  %v616_v57 = vadd.f32 %v615_v47, %v211_v46  ;;  %v622_v10 = vmax.f32 %v571_v60, 0.0  ;;  %v624_v11 = vmax.f32 %v614_v61, 0.0  ;;  %v638_v44 = vld [vmem:[#allocation8 + $0x18] sm:$0xff] }
 0x15c   :  { %v574_v52 = vpop.f32.mrf.mxu0  ;;  %v617_v53 = vpop.f32.mrf.mxu1  ;;  %v670_v45 = vld [vmem:[#allocation8 + $0x118] sm:$0xff]  ;;  %v709_v46 = vunpack.c.l.s8.bf16 %v641_v38  ;;  %v773_v47 = vunpack.c.l.s8.bf16 %v673_v39  ;;  %v653_v38 = vld [vmem:[#allocation8 + $0x90] sm:$0xff] }
 0x15d   :  { %v575_v58 = vadd.f32 %v574_v52, %v212_v48  ;;  %v618_v59 = vadd.f32 %v617_v53, %v214_v49  ;;  %v623_v6 = vmax.f32 %v573_v56, 0.0  ;;  %v625_v7 = vmax.f32 %v616_v57, 0.0  ;;  %v666_v56 = vld [vmem:[#allocation8 + $0xf8] sm:$0xff]  ;;  %v685_v39 = vld [vmem:[#allocation8 + $0x190] sm:$0xff] }
 0x15e   :  { %v576_v62 = vpop.f32.mrf.mxu0  ;;  %v619_v63 = vpop.f32.mrf.mxu1  ;;  %v706_v48 = vunpack.c.h.s8.bf16 %v638_v44  ;;  %v770_v49 = vunpack.c.h.s8.bf16 %v670_v45  ;;  %v705_v52 = vunpack.c.h.s8.bf16 %v637_v50  ;;  %v769_v53 = vunpack.c.h.s8.bf16 %v669_v51  ;;  %v698_v57 = vld [vmem:[#allocation8 + $0x1f8] sm:$0xff] }
 0x15f   :  { %v577_v0 = vadd.f32 %v576_v62, %v213_v54  ;;  %v620_v1 = vadd.f32 %v619_v63, %v215_v55  ;;  %v626_v2 = vmax.f32 %v575_v58, 0.0  ;;  %v628_v3 = vmax.f32 %v618_v59, 0.0  ;;  %v665_v62 = vld [vmem:[#allocation8 + $0xf0] sm:$0xff] }
 0x160   :  { %v702_v54 = vunpack.c.l.s8.bf16 %v638_v44  ;;  %v766_v55 = vunpack.c.l.s8.bf16 %v670_v45  ;;  %v701_v58 = vunpack.c.l.s8.bf16 %v637_v50  ;;  %v765_v59 = vunpack.c.l.s8.bf16 %v669_v51  ;;  %v697_v63 = vld [vmem:[#allocation8 + $0x1f0] sm:$0xff] }
 0x161   :  { %v627_v8 = vmax.f32 %v577_v0, 0.0  ;;  %v629_v9 = vmax.f32 %v620_v1, 0.0  ;;  %v6135_v16 = vpack.c.bf16 %v626_v2, %v622_v10  ;;  %v6137_v17 = vpack.c.bf16 %v628_v3, %v624_v11  ;;  %v661_v10 = vld [vmem:[#allocation8 + $0xd0] sm:$0xff] }
 0x162   :  { %v762_v60 = vunpack.c.h.s8.bf16 %v666_v56  ;;  %v826_v61 = vunpack.c.h.s8.bf16 %v698_v57  ;;  %v761_v0 = vunpack.c.h.s8.bf16 %v665_v62  ;;  %v825_v1 = vunpack.c.h.s8.bf16 %v697_v63  ;;  %v693_v11 = vld [vmem:[#allocation8 + $0x1d0] sm:$0xff] }
 0x163   :  { %v6131_v12 = vpack.c.bf16 %v627_v8, %v623_v6  ;;  %v6133_v13 = vpack.c.bf16 %v629_v9, %v625_v7  ;;  %v758_v2 = vunpack.c.l.s8.bf16 %v666_v56  ;;  %v822_v3 = vunpack.c.l.s8.bf16 %v698_v57 }
 0x164   :  { %v757_v6 = vunpack.c.l.s8.bf16 %v665_v62  ;;  %v821_v7 = vunpack.c.l.s8.bf16 %v697_v63  ;;  %v754_v8 = vunpack.c.h.s8.bf16 %v662_v4  ;;  %v818_v9 = vunpack.c.h.s8.bf16 %v694_v5 }
 0x165   :  { %859 = vmatprep.mubr.bf16.mxu0 %v6131_v12  ;;  %902 = vmatprep.mubr.bf16.mxu1 %v6133_v13  ;;  %v733_v44 = vunpack.c.l.s8.bf16 %v653_v38  ;;  %v797_v45 = vunpack.c.l.s8.bf16 %v685_v39 }
 0x166   :  { %860 = vmatmul.mubr.bf16.vlgmr.msra.gmra.mxu0 %v6135_v16  ;;  %903 = vmatmul.mubr.bf16.vlgmr.msra.gmra.mxu1 %v6137_v17 }
 0x167   :  { %914 = vmatpush1.bf16.msra.mxu0 %v729_v14  ;;  %957 = vmatpush1.bf16.msra.mxu1 %v793_v15  ;;  %v753_v14 = vunpack.c.h.s8.bf16 %v661_v10  ;;  %v817_v15 = vunpack.c.h.s8.bf16 %v693_v11 }
 0x168   :  { %945 = vmatprep.mubr.bf16.mxu0 %v6131_v12  ;;  %988 = vmatprep.mubr.bf16.mxu1 %v6133_v13 }
 0x169   :  { %915 = vmatprep.subr.bf16.mxu0 %v726_v18  ;;  %958 = vmatprep.subr.bf16.mxu1 %v790_v19  ;;  %v750_v18 = vunpack.c.l.s8.bf16 %v662_v4  ;;  %v814_v19 = vunpack.c.l.s8.bf16 %v694_v5  ;;  %v6151_v4 = vld [vmem:[#allocation7] sm:$0xff]  }
 0x16b   :  { %916 = vmatpush1.bf16.msra.mxu0 %v725_v22  ;;  %959 = vmatpush1.bf16.msra.mxu1 %v789_v23  ;;  %v749_v22 = vunpack.c.l.s8.bf16 %v661_v10  ;;  %v813_v23 = vunpack.c.l.s8.bf16 %v693_v11  ;;  %v1184_v10 = vld [vmem:[#allocation8 + $0x240] sm:$0xff]  ;;  %v6156_v11 = vld [vmem:[#allocation7 + $0x8] sm:$0xff]  }
 0x16c   :  { %917 = vmatprep.subr.bf16.mxu0 %v722_v24  ;;  %960 = vmatprep.subr.bf16.mxu1 %v786_v25  ;;  %v746_v24 = vunpack.c.h.s8.bf16 %v658_v20  ;;  %v810_v25 = vunpack.c.h.s8.bf16 %v690_v21 }
 0x16f   :  { %918 = vmatpush1.bf16.msra.mxu0 %v721_v28  ;;  %961 = vmatpush1.bf16.msra.mxu1 %v785_v29  ;;  %v745_v28 = vunpack.c.h.s8.bf16 %v657_v26  ;;  %v809_v29 = vunpack.c.h.s8.bf16 %v689_v27 }
 0x170   :  { %919 = vmatprep.subr.bf16.mxu0 %v718_v30  ;;  %962 = vmatprep.subr.bf16.mxu1 %v782_v31  ;;  %v742_v30 = vunpack.c.l.s8.bf16 %v658_v20  ;;  %v806_v31 = vunpack.c.l.s8.bf16 %v690_v21  ;;  %v1180_v21 = vld [vmem:[#allocation8 + $0x220] sm:$0xff] }
 0x173   :  { %920 = vmatpush1.bf16.msra.mxu0 %v717_v34  ;;  %963 = vmatpush1.bf16.msra.mxu1 %v781_v35  ;;  %v741_v34 = vunpack.c.l.s8.bf16 %v657_v26  ;;  %v805_v35 = vunpack.c.l.s8.bf16 %v689_v27  ;;  %v1176_v27 = vld [vmem:[#allocation8 + $0x200] sm:$0xff] }
 0x174   :  { %921 = vmatprep.subr.bf16.mxu0 %v714_v36  ;;  %964 = vmatprep.subr.bf16.mxu1 %v778_v37  ;;  %v738_v36 = vunpack.c.h.s8.bf16 %v654_v32  ;;  %v802_v37 = vunpack.c.h.s8.bf16 %v686_v33 }
 0x177   :  { %922 = vmatpush1.bf16.msra.mxu0 %v713_v40  ;;  %965 = vmatpush1.bf16.msra.mxu1 %v777_v41  ;;  %v737_v40 = vunpack.c.h.s8.bf16 %v653_v38  ;;  %v801_v41 = vunpack.c.h.s8.bf16 %v685_v39  ;;  %v1200_v39 = vld [vmem:[#allocation8 + $0x2c0] sm:$0xff] }
 0x178   :  { %923 = vmatprep.subr.bf16.mxu0 %v710_v42  ;;  %966 = vmatprep.subr.bf16.mxu1 %v774_v43  ;;  %v734_v42 = vunpack.c.l.s8.bf16 %v654_v32  ;;  %v798_v43 = vunpack.c.l.s8.bf16 %v686_v33  ;;  %v1204_v33 = vld [vmem:[#allocation8 + $0x2e0] sm:$0xff] }
 0x17b   :  { %924 = vmatpush1.bf16.msra.mxu0 %v709_v46  ;;  %967 = vmatpush1.bf16.msra.mxu1 %v773_v47  ;;  %v7069_v46 = vmov 0  }
 0x17c   :  { %925 = vmatprep.subr.bf16.mxu0 %v706_v48  ;;  %968 = vmatprep.subr.bf16.mxu1 %v770_v49 }
 0x17f   :  { %926 = vmatpush1.bf16.msra.mxu0 %v705_v52  ;;  %969 = vmatpush1.bf16.msra.mxu1 %v769_v53 }
 0x180   :  { %927 = vmatprep.subr.bf16.mxu0 %v702_v54  ;;  %970 = vmatprep.subr.bf16.mxu1 %v766_v55 }
 0x183   :  { %928 = vmatpush1.bf16.msra.mxu0 %v701_v58  ;;  %971 = vmatpush1.bf16.msra.mxu1 %v765_v59 }
 0x184   :  { %929 = vmatprep.subr.bf16.mxu0 %v762_v60  ;;  %972 = vmatprep.subr.bf16.mxu1 %v826_v61  ;;  %v1189_v60 = vld [vmem:[#allocation8 + $0x268] sm:$0xff] }
 0x187   :  { %930 = vmatpush2.bf16.msra.mxu0 %v761_v0  ;;  %973 = vmatpush2.bf16.msra.mxu1 %v825_v1  ;;  %v1269_v1 = vunpack.c.h.s8.bf16 %v1189_v60 }
 0x188   :  { %931 = vmatprep.subr.bf16.mxu0 %v758_v2  ;;  %974 = vmatprep.subr.bf16.mxu1 %v822_v3  ;;  %v1188_v2 = vld [vmem:[#allocation8 + $0x260] sm:$0xff] }
 0x189   :  { %v1268_v5 = vunpack.c.h.s8.bf16 %v1188_v2 }
 0x18b   :  { %932 = vmatpush2.bf16.msra.mxu0 %v757_v6  ;;  %975 = vmatpush2.bf16.msra.mxu1 %v821_v7  ;;  %v1265_v6 = vunpack.c.l.s8.bf16 %v1189_v60  ;;  %v1185_v7 = vld [vmem:[#allocation8 + $0x248] sm:$0xff] }
 0x18c   :  { %933 = vmatprep.subr.bf16.mxu0 %v754_v8  ;;  %976 = vmatprep.subr.bf16.mxu1 %v818_v9  ;;  %v1264_v8 = vunpack.c.l.s8.bf16 %v1188_v2  ;;  %v1261_v9 = vunpack.c.h.s8.bf16 %v1185_v7 }
 0x18f   :  { %934 = vmatpush2.bf16.msra.mxu0 %v753_v14  ;;  %977 = vmatpush2.bf16.msra.mxu1 %v817_v15  ;;  %v1260_v14 = vunpack.c.h.s8.bf16 %v1184_v10  ;;  %v1257_v15 = vunpack.c.l.s8.bf16 %v1185_v7 }
 0x190   :  { %935 = vmatprep.subr.bf16.mxu0 %v750_v18  ;;  %978 = vmatprep.subr.bf16.mxu1 %v814_v19  ;;  %v1181_v18 = vld [vmem:[#allocation8 + $0x228] sm:$0xff]  ;;  %v1256_v19 = vunpack.c.l.s8.bf16 %v1184_v10 }
 0x191   :  { %v1253_v20 = vunpack.c.h.s8.bf16 %v1181_v18 }
 0x193   :  { %936 = vmatpush2.bf16.msra.mxu0 %v749_v22  ;;  %979 = vmatpush2.bf16.msra.mxu1 %v813_v23  ;;  %v1252_v22 = vunpack.c.h.s8.bf16 %v1180_v21  ;;  %v1249_v23 = vunpack.c.l.s8.bf16 %v1181_v18  ;;  %v1220_v18 = vld [vmem:[#allocation8 + $0x360] sm:$0xff] }
 0x194   :  { %937 = vmatprep.subr.bf16.mxu0 %v746_v24  ;;  %980 = vmatprep.subr.bf16.mxu1 %v810_v25  ;;  %v1177_v24 = vld [vmem:[#allocation8 + $0x208] sm:$0xff]  ;;  %v1248_v25 = vunpack.c.l.s8.bf16 %v1180_v21 }
 0x195   :  { %v1245_v26 = vunpack.c.h.s8.bf16 %v1177_v24 }
 0x197   :  { %938 = vmatpush2.bf16.msra.mxu0 %v745_v28  ;;  %981 = vmatpush2.bf16.msra.mxu1 %v809_v29  ;;  %v1244_v28 = vunpack.c.h.s8.bf16 %v1176_v27  ;;  %v1241_v29 = vunpack.c.l.s8.bf16 %v1177_v24 }
 0x198   :  { %939 = vmatprep.subr.bf16.mxu0 %v742_v30  ;;  %982 = vmatprep.subr.bf16.mxu1 %v806_v31  ;;  %v1205_v30 = vld [vmem:[#allocation8 + $0x2e8] sm:$0xff]  ;;  %v1240_v31 = vunpack.c.l.s8.bf16 %v1176_v27  ;;  %v1187_v27 = vld [vmem:[#allocation8 + $0x258] sm:$0xff] }
 0x199   :  { %v1301_v32 = vunpack.c.h.s8.bf16 %v1205_v30 }
 0x19b   :  { %940 = vmatpush2.bf16.msra.mxu0 %v741_v34  ;;  %983 = vmatpush2.bf16.msra.mxu1 %v805_v35  ;;  %v1300_v34 = vunpack.c.h.s8.bf16 %v1204_v33  ;;  %v1297_v35 = vunpack.c.l.s8.bf16 %v1205_v30 }
 0x19c   :  { %941 = vmatprep.subr.bf16.mxu0 %v738_v36  ;;  %984 = vmatprep.subr.bf16.mxu1 %v802_v37  ;;  %v1201_v36 = vld [vmem:[#allocation8 + $0x2c8] sm:$0xff]  ;;  %v1296_v37 = vunpack.c.l.s8.bf16 %v1204_v33  ;;  %v1186_v33 = vld [vmem:[#allocation8 + $0x250] sm:$0xff] }
 0x19d   :  { %v1293_v38 = vunpack.c.h.s8.bf16 %v1201_v36 }
 0x19f   :  { %942 = vmatpush2.bf16.msra.mxu0 %v737_v40  ;;  %985 = vmatpush2.bf16.msra.mxu1 %v801_v41  ;;  %v1292_v40 = vunpack.c.h.s8.bf16 %v1200_v39  ;;  %v1289_v41 = vunpack.c.l.s8.bf16 %v1201_v36  ;;  %v1259_v36 = vunpack.c.l.s8.bf16 %v1187_v27 }
 0x1a0   :  { %943 = vmatprep.subr.bf16.mxu0 %v734_v42  ;;  %986 = vmatprep.subr.bf16.mxu1 %v798_v43  ;;  %v1197_v42 = vld [vmem:[#allocation8 + $0x2a8] sm:$0xff]  ;;  %v1288_v43 = vunpack.c.l.s8.bf16 %v1200_v39 }
 0x1a3   :  { %944 = vmatpush2.bf16.msra.mxu0 %v733_v44  ;;  %987 = vmatpush2.bf16.msra.mxu1 %v797_v45  ;;  %v1285_v44 = vunpack.c.h.s8.bf16 %v1197_v42  ;;  %v1196_v45 = vld [vmem:[#allocation8 + $0x2a0] sm:$0xff] }
 0x1a6   :  { %946 = vmatmul.mubr.bf16.vlgmr.msra.gmra.mxu0 %v6135_v16  ;;  %989 = vmatmul.mubr.bf16.vlgmr.msra.gmra.mxu1 %v6137_v17 }
 0x1a7   :  { %1064 = vmatprep.mubr.bf16.mxu0 %v7069_v46  ;;  %1117 = vmatprep.mubr.bf16.mxu1 %v7069_v46 }
 0x226   :  { %v861_v47 = vpop.f32.mrf.mxu0  ;;  %v904_v48 = vpop.f32.mrf.mxu1 }
 0x227   :  { %v905_v55 = vadd.f32 %v904_v48, %v861_v47  ;;  %v1284_v47 = vunpack.c.h.s8.bf16 %v1196_v45  ;;  %v1281_v48 = vunpack.c.l.s8.bf16 %v1197_v42  ;;  %v1212_v42 = vld [vmem:[#allocation8 + $0x320] sm:$0xff] }
 0x228   :  { %v863_v49 = vpop.f32.mrf.mxu0  ;;  %v906_v50 = vpop.f32.mrf.mxu1 }
 0x229   :  { %v907_v53 = vadd.f32 %v906_v50, %v863_v49  ;;  %v999_v63 = vmul.f32 0.00046397475, %v905_v55 }
 0x22a   :  { %v865_v51 = vpop.f32.mrf.mxu0  ;;  %v908_v52 = vpop.f32.mrf.mxu1 }
 0x22b   :  { %v909_v54 = vadd.f32 %v908_v52, %v865_v51  ;;  %v1000_v61 = vmul.f32 0.00046397475, %v907_v53  ;;  %v1193_v51 = vld [vmem:[#allocation8 + $0x288] sm:$0xff] }
 0x22c   :  { %v867_v56 = vpop.f32.mrf.mxu0  ;;  %v910_v57 = vpop.f32.mrf.mxu1  ;;  %v1277_v55 = vunpack.c.h.s8.bf16 %v1193_v51  ;;  %v1273_v2 = vunpack.c.l.s8.bf16 %v1193_v51  ;;  %v1312_v51 = vunpack.c.l.s8.bf16 %v1212_v42 }
 0x22d   :  { %v911_v58 = vadd.f32 %v910_v57, %v867_v56  ;;  %v1003_v59 = vmul.f32 0.00046397475, %v909_v54  ;;  %v1280_v54 = vunpack.c.l.s8.bf16 %v1196_v45  ;;  %v1192_v56 = vld [vmem:[#allocation8 + $0x280] sm:$0xff]  ;;  %v1316_v45 = vunpack.c.h.s8.bf16 %v1212_v42 }
 0x22e   :  { %v1272_v10 = vunpack.c.l.s8.bf16 %v1192_v56 }
 0x22f   :  { %v1004_v62 = vmul.f32 0.00046397475, %v911_v58  ;;  %v1011_v3 = vpack.c.bf16 %v1003_v59, %v999_v63 }
 0x231   :  { %v1012_v0 = vpack.c.bf16 %v1004_v62, %v1000_v61 }
 0x233   :  { %1046 = vmatprep.subr.bf16.mxu0 %v1012_v0  ;;  %v1276_v0 = vunpack.c.h.s8.bf16 %v1192_v56  ;;  %v1178_v56 = vld [vmem:[#allocation8 + $0x210] sm:$0xff] }
 0x234   :  { %1047 = vmatpush1.bf16.msra.mxu0 %v1011_v3 }
 0x235   :  { %1368 = vmatprep.subr.bf16.mxu0 %v1269_v1 }
 0x237   :  { %5267 = vmatmul.mubr.msk.bf16.vlgmr.msra.gmra.mxu0 %vm1025_vm0, %v6151_v4 }
 0x238   :  { %1369 = vmatpush1.bf16.msra.mxu0 %v1268_v5  ;;  %1074 = vmatprep.mubr.bf16.mxu0 %v7069_v46  ;;  %v1221_v5 = vld [vmem:[#allocation8 + $0x368] sm:$0xff] }
 0x239   :  { %1370 = vmatprep.subr.bf16.mxu0 %v1265_v6  ;;  %v1191_v6 = vld [vmem:[#allocation8 + $0x278] sm:$0xff]  ;;  %v1329_v24 = vunpack.c.l.s8.bf16 %v1221_v5 }
 0x23c   :  { %1371 = vmatpush1.bf16.msra.mxu0 %v1264_v8 }
 0x23d   :  { %1372 = vmatprep.subr.bf16.mxu0 %v1261_v9 }
 0x23f   :  { %5268 = vmatmul.mubr.msk.bf16.gmra.mxu0 %vm1025_vm0, %v6156_v11 }
 0x240   :  { %1373 = vmatpush1.bf16.msra.mxu0 %v1260_v14  ;;  %1400 = vmatprep.mubr.bf16.mxu0 %v6131_v12 }
 0x241   :  { %1374 = vmatprep.subr.bf16.mxu0 %v1257_v15  ;;  %v1333_v15 = vunpack.c.h.s8.bf16 %v1221_v5  ;;  %v1206_v5 = vld [vmem:[#allocation8 + $0x2f0] sm:$0xff] }
 0x244   :  { %1375 = vmatpush1.bf16.msra.mxu0 %v1256_v19  ;;  %v1271_v19 = vunpack.c.h.s8.bf16 %v1191_v6 }
 0x245   :  { %1376 = vmatprep.subr.bf16.mxu0 %v1253_v20  ;;  %v1190_v20 = vld [vmem:[#allocation8 + $0x270] sm:$0xff] }
 0x248   :  { %1377 = vmatpush1.bf16.msra.mxu0 %v1252_v22  ;;  %v1332_v22 = vunpack.c.h.s8.bf16 %v1220_v18 }
 0x249   :  { %1378 = vmatprep.subr.bf16.mxu0 %v1249_v23  ;;  %v1270_v23 = vunpack.c.h.s8.bf16 %v1190_v20 }
 0x24c   :  { %1379 = vmatpush1.bf16.msra.mxu0 %v1248_v25  ;;  %v1267_v25 = vunpack.c.l.s8.bf16 %v1191_v6 }
 0x24d   :  { %1380 = vmatprep.subr.bf16.mxu0 %v1245_v26  ;;  %v1217_v26 = vld [vmem:[#allocation8 + $0x348] sm:$0xff] }
 0x24e   :  { %v1325_v30 = vunpack.c.h.s8.bf16 %v1217_v26 }
 0x250   :  { %1381 = vmatpush1.bf16.msra.mxu0 %v1244_v28  ;;  %v1328_v28 = vunpack.c.l.s8.bf16 %v1220_v18  ;;  %v1298_v18 = vunpack.c.l.s8.bf16 %v1206_v5 }
 0x251   :  { %1382 = vmatprep.subr.bf16.mxu0 %v1241_v29  ;;  %v1266_v29 = vunpack.c.l.s8.bf16 %v1190_v20  ;;  %v1232_v20 = vld [vmem:[#allocation8 + $0x3c0] sm:$0xff] }
 0x254   :  { %1383 = vmatpush1.bf16.msra.mxu0 %v1240_v31  ;;  %v1216_v31 = vld [vmem:[#allocation8 + $0x340] sm:$0xff] }
 0x255   :  { %1384 = vmatprep.subr.bf16.mxu0 %v1301_v32  ;;  %v1263_v32 = vunpack.c.h.s8.bf16 %v1187_v27  ;;  %v1320_v39 = vunpack.c.l.s8.bf16 %v1216_v31  ;;  %v1229_v27 = vld [vmem:[#allocation8 + $0x3a8] sm:$0xff] }
 0x258   :  { %1385 = vmatpush2.bf16.msra.mxu0 %v1300_v34  ;;  %v1324_v34 = vunpack.c.h.s8.bf16 %v1216_v31  ;;  %v1349_v31 = vunpack.c.h.s8.bf16 %v1229_v27 }
 0x259   :  { %1386 = vmatprep.subr.bf16.mxu0 %v1297_v35  ;;  %v1321_v35 = vunpack.c.l.s8.bf16 %v1217_v26 }
 0x25c   :  { %1387 = vmatpush2.bf16.msra.mxu0 %v1296_v37  ;;  %v1213_v37 = vld [vmem:[#allocation8 + $0x328] sm:$0xff] }
 0x25d   :  { %1388 = vmatprep.subr.bf16.mxu0 %v1293_v38  ;;  %v1183_v38 = vld [vmem:[#allocation8 + $0x238] sm:$0xff] }
 0x260   :  { %1389 = vmatpush2.bf16.msra.mxu0 %v1292_v40  ;;  %v1258_v40 = vunpack.c.l.s8.bf16 %v1186_v33 }
 0x261   :  { %1390 = vmatprep.subr.bf16.mxu0 %v1289_v41  ;;  %v1317_v41 = vunpack.c.h.s8.bf16 %v1213_v37 }
 0x264   :  { %1391 = vmatpush2.bf16.msra.mxu0 %v1288_v43  ;;  %v1255_v43 = vunpack.c.h.s8.bf16 %v1183_v38 }
 0x265   :  { %1392 = vmatprep.subr.bf16.mxu0 %v1285_v44  ;;  %v1182_v44 = vld [vmem:[#allocation8 + $0x230] sm:$0xff] }
 0x266   :  { %v947_v49 = vpop.f32.mrf.mxu0  ;;  %v990_v50 = vpop.f32.mrf.mxu1 }
 0x267   :  { %v991_v61 = vadd.f32 %v990_v50, %v947_v49  ;;  %v1209_v49 = vld [vmem:[#allocation8 + $0x308] sm:$0xff]  ;;  %v1179_v50 = vld [vmem:[#allocation8 + $0x218] sm:$0xff] }
 0x268   :  { %v949_v52 = vpop.f32.mrf.mxu0  ;;  %v992_v53 = vpop.f32.mrf.mxu1  ;;  %1393 = vmatpush2.bf16.msra.mxu0 %v1284_v47  ;;  %v1254_v47 = vunpack.c.h.s8.bf16 %v1182_v44 }
 0x269   :  { %1394 = vmatprep.subr.bf16.mxu0 %v1281_v48  ;;  %v993_v59 = vadd.f32 %v992_v53, %v949_v52  ;;  %v1001_v9 = vmul.f32 0.00046397475, %v991_v61  ;;  %v1313_v48 = vunpack.c.l.s8.bf16 %v1213_v37  ;;  %v1250_v52 = vunpack.c.l.s8.bf16 %v1182_v44  ;;  %v1237_v61 = vld [vmem:[#allocation8 + $0x3e8] sm:$0xff] }
 0x26a   :  { %v951_v57 = vpop.f32.mrf.mxu0  ;;  %v994_v58 = vpop.f32.mrf.mxu1  ;;  %v1309_v53 = vunpack.c.h.s8.bf16 %v1209_v49 }
 0x26b   :  { %v995_v60 = vadd.f32 %v994_v58, %v951_v57  ;;  %v1002_v7 = vmul.f32 0.00046397475, %v993_v59  ;;  %v1246_v58 = vunpack.c.h.s8.bf16 %v1178_v56  ;;  %v1305_v59 = vunpack.c.l.s8.bf16 %v1209_v49 }
 0x26c   :  { %v953_v62 = vpop.f32.mrf.mxu0  ;;  %v996_v63 = vpop.f32.mrf.mxu1  ;;  %1395 = vmatpush2.bf16.msra.mxu0 %v1280_v54  ;;  %v1208_v54 = vld [vmem:[#allocation8 + $0x300] sm:$0xff] }
 0x26d   :  { %v997_v1 = vadd.f32 %v996_v63, %v953_v62  ;;  %1396 = vmatprep.subr.bf16.mxu0 %v1277_v55  ;;  %v1005_v3 = vmul.f32 0.00046397475, %v995_v60  ;;  %v1247_v55 = vunpack.c.h.s8.bf16 %v1179_v50  ;;  %v1308_v57 = vunpack.c.h.s8.bf16 %v1208_v54  ;;  %v1207_v62 = vld [vmem:[#allocation8 + $0x2f8] sm:$0xff] }
 0x26e   :  { %v1243_v60 = vunpack.c.l.s8.bf16 %v1179_v50  ;;  %v1304_v63 = vunpack.c.l.s8.bf16 %v1208_v54  ;;  %v1223_v50 = vld [vmem:[#allocation8 + $0x378] sm:$0xff] }
 0x26f   :  { %v1006_v8 = vmul.f32 0.00046397475, %v997_v1  ;;  %v1013_v21 = vpack.c.bf16 %v1005_v3, %v1001_v9  ;;  %v1365_v1 = vunpack.c.h.s8.bf16 %v1237_v61  ;;  %v1303_v3 = vunpack.c.h.s8.bf16 %v1207_v62 }
 0x270   :  { %1397 = vmatpush2.bf16.msra.mxu0 %v1276_v0  ;;  %v1242_v0 = vunpack.c.l.s8.bf16 %v1178_v56  ;;  %v1299_v9 = vunpack.c.l.s8.bf16 %v1207_v62  ;;  %v1335_v54 = vunpack.c.h.s8.bf16 %v1223_v50 }
 0x271   :  { %v1014_v14 = vpack.c.bf16 %v1006_v8, %v1002_v7  ;;  %1398 = vmatprep.subr.bf16.mxu0 %v1273_v2  ;;  %v1236_v2 = vld [vmem:[#allocation8 + $0x3e0] sm:$0xff]  ;;  %v1302_v7 = vunpack.c.h.s8.bf16 %v1206_v5  ;;  %v1361_v8 = vunpack.c.l.s8.bf16 %v1237_v61  ;;  %v1215_v5 = vld [vmem:[#allocation8 + $0x338] sm:$0xff] }
 0x272   :  { %v1364_v6 = vunpack.c.h.s8.bf16 %v1236_v2 }
 0x273   :  { %1099 = vmatprep.subr.bf16.mxu1 %v1014_v14  ;;  %v1203_v14 = vld [vmem:[#allocation8 + $0x2d8] sm:$0xff] }
 0x274   :  { %1100 = vmatpush1.bf16.msra.mxu1 %v1013_v21  ;;  %1399 = vmatpush2.bf16.msra.mxu0 %v1272_v10  ;;  %v1233_v10 = vld [vmem:[#allocation8 + $0x3c8] sm:$0xff]  ;;  %v1295_v21 = vunpack.c.h.s8.bf16 %v1203_v14  ;;  %v1291_v26 = vunpack.c.l.s8.bf16 %v1203_v14  ;;  %v1211_v14 = vld [vmem:[#allocation8 + $0x318] sm:$0xff] }
 0x275   :  { %1411 = vmatprep.subr.bf16.mxu1 %v1333_v15  ;;  %1454 = vmatprep.subr.bf16.mxu0 %v1271_v19  ;;  %v1360_v15 = vunpack.c.l.s8.bf16 %v1236_v2  ;;  %v1357_v19 = vunpack.c.h.s8.bf16 %v1233_v10 }
 0x277   :  { %5269 = vmatmul.mubr.msk.bf16.vlgmr.msra.gmra.mxu1 %vm1025_vm0, %v6151_v4  ;;  %1401 = vmatmul.mubr.bf16.vlgmr.msra.gmra.mxu0 %v6135_v16  ;;  %v1262_v4 = vunpack.c.h.s8.bf16 %v1186_v33 }
 0x278   :  { %1412 = vmatpush1.bf16.msra.mxu1 %v1332_v22  ;;  %1455 = vmatpush1.bf16.msra.mxu0 %v1270_v23  ;;  %v1202_v22 = vld [vmem:[#allocation8 + $0x2d0] sm:$0xff]  ;;  %v1356_v23 = vunpack.c.h.s8.bf16 %v1232_v20 }
 0x279   :  { %1486 = vmatprep.mubr.bf16.mxu0 %v6131_v12  ;;  %1413 = vmatprep.subr.bf16.mxu1 %v1329_v24  ;;  %v1294_v24 = vunpack.c.h.s8.bf16 %v1202_v22 }
 0x27a   :  { %1456 = vmatprep.subr.bf16.mxu0 %v1267_v25  ;;  %1127 = vmatprep.mubr.bf16.mxu1 %v7069_v46  ;;  %v1353_v25 = vunpack.c.l.s8.bf16 %v1233_v10  ;;  %v1315_v10 = vunpack.c.l.s8.bf16 %v1215_v5 }
 0x27c   :  { %1414 = vmatpush1.bf16.msra.mxu1 %v1328_v28  ;;  %1457 = vmatpush1.bf16.msra.mxu0 %v1266_v29  ;;  %v1199_v28 = vld [vmem:[#allocation8 + $0x2b8] sm:$0xff]  ;;  %v1352_v29 = vunpack.c.l.s8.bf16 %v1232_v20 }
 0x27d   :  { %1415 = vmatprep.subr.bf16.mxu1 %v1325_v30  ;;  %1458 = vmatprep.subr.bf16.mxu0 %v1263_v32  ;;  %v1290_v30 = vunpack.c.l.s8.bf16 %v1202_v22  ;;  %v1228_v32 = vld [vmem:[#allocation8 + $0x3a0] sm:$0xff]  ;;  %v1287_v33 = vunpack.c.h.s8.bf16 %v1199_v28  ;;  %v1283_v37 = vunpack.c.l.s8.bf16 %v1199_v28  ;;  %v1239_v22 = vld [vmem:[#allocation8 + $0x3f8] sm:$0xff] }
 0x27e   :  { %v1235_v28 = vld [vmem:[#allocation8 + $0x3d8] sm:$0xff] }
 0x27f   :  { %5270 = vmatmul.mubr.msk.bf16.gmra.mxu1 %vm1025_vm0, %v6156_v11  ;;  %v1251_v11 = vunpack.c.l.s8.bf16 %v1183_v38  ;;  %v1225_v38 = vld [vmem:[#allocation8 + $0x388] sm:$0xff] }
 0x280   :  { %1416 = vmatpush1.bf16.msra.mxu1 %v1324_v34  ;;  %1443 = vmatprep.mubr.bf16.mxu1 %v6133_v13  ;;  %v1198_v34 = vld [vmem:[#allocation8 + $0x2b0] sm:$0xff]  ;;  %v1341_v42 = vunpack.c.h.s8.bf16 %v1225_v38 }
 0x281   :  { %1459 = vmatpush1.bf16.msra.mxu0 %v1262_v4  ;;  %1417 = vmatprep.subr.bf16.mxu1 %v1321_v35  ;;  %v1348_v4 = vunpack.c.h.s8.bf16 %v1228_v32  ;;  %v1286_v35 = vunpack.c.h.s8.bf16 %v1198_v34 }
 0x282   :  { %1460 = vmatprep.subr.bf16.mxu0 %v1259_v36  ;;  %v1345_v36 = vunpack.c.l.s8.bf16 %v1229_v27  ;;  %v1363_v27 = vunpack.c.l.s8.bf16 %v1239_v22 }
 0x284   :  { %1418 = vmatpush1.bf16.msra.mxu1 %v1320_v39  ;;  %v1195_v39 = vld [vmem:[#allocation8 + $0x298] sm:$0xff] }
 0x285   :  { %1461 = vmatpush1.bf16.msra.mxu0 %v1258_v40  ;;  %1419 = vmatprep.subr.bf16.mxu1 %v1317_v41  ;;  %v1344_v40 = vunpack.c.l.s8.bf16 %v1228_v32  ;;  %v1282_v41 = vunpack.c.l.s8.bf16 %v1198_v34  ;;  %v1279_v44 = vunpack.c.h.s8.bf16 %v1195_v39  ;;  %v1275_v49 = vunpack.c.l.s8.bf16 %v1195_v39  ;;  %v1231_v34 = vld [vmem:[#allocation8 + $0x3b8] sm:$0xff] }
 0x286   :  { %1462 = vmatprep.subr.bf16.mxu0 %v1255_v43  ;;  %v1224_v43 = vld [vmem:[#allocation8 + $0x380] sm:$0xff]  ;;  %v1227_v39 = vld [vmem:[#allocation8 + $0x398] sm:$0xff] }
 0x288   :  { %1420 = vmatpush1.bf16.msra.mxu1 %v1316_v45  ;;  %v1194_v45 = vld [vmem:[#allocation8 + $0x290] sm:$0xff] }
 0x289   :  { %1463 = vmatpush1.bf16.msra.mxu0 %v1254_v47  ;;  %1421 = vmatprep.subr.bf16.mxu1 %v1313_v48  ;;  %v1340_v47 = vunpack.c.h.s8.bf16 %v1224_v43  ;;  %v1278_v48 = vunpack.c.h.s8.bf16 %v1194_v45 }
 0x28a   :  { %1464 = vmatprep.subr.bf16.mxu0 %v1251_v11  ;;  %v1337_v11 = vunpack.c.l.s8.bf16 %v1225_v38  ;;  %v1347_v38 = vunpack.c.l.s8.bf16 %v1231_v34 }
 0x28c   :  { %1422 = vmatpush1.bf16.msra.mxu1 %v1312_v51  ;;  %v1139_v51 = vlaneseq }
 0x28d   :  { %1465 = vmatpush1.bf16.msra.mxu0 %v1250_v52  ;;  %1423 = vmatprep.subr.bf16.mxu1 %v1309_v53  ;;  %v1336_v52 = vunpack.c.l.s8.bf16 %v1224_v43  ;;  %v1274_v53 = vunpack.c.l.s8.bf16 %v1194_v45 }
 0x28e   :  { %1466 = vmatprep.subr.bf16.mxu0 %v1247_v55  ;;  %v1222_v55 = vld [vmem:[#allocation8 + $0x370] sm:$0xff]  ;;  %v6169_v56 = vshrl.u32 %v1139_v51, 7 }
 0x28f   :  { %v1330_v62 = vunpack.c.l.s8.bf16 %v1222_v55 }
 0x290   :  { %1424 = vmatpush1.bf16.msra.mxu1 %v1308_v57  ;;  %v1334_v57 = vunpack.c.h.s8.bf16 %v1222_v55  ;;  %v1153_v61 = vsub.s32 3, %v6169_v56 }
 0x291   :  { %1467 = vmatpush1.bf16.msra.mxu0 %v1246_v58  ;;  %1425 = vmatprep.subr.bf16.mxu1 %v1305_v59  ;;  %v1331_v58 = vunpack.c.l.s8.bf16 %v1223_v50  ;;  %v1219_v59 = vld [vmem:[#allocation8 + $0x358] sm:$0xff] }
 0x292   :  { %1468 = vmatprep.subr.bf16.mxu0 %v1243_v60  ;;  %v6174_v60 = vld [vmem:[%s7059_s5] sm:$0xf] }
 0x294   :  { %1426 = vmatpush1.bf16.msra.mxu1 %v1304_v63  ;;  %v1327_v63 = vunpack.c.h.s8.bf16 %v1219_v59 }
 0x295   :  { %1469 = vmatpush1.bf16.msra.mxu0 %v1242_v0  ;;  %1427 = vmatprep.subr.bf16.mxu1 %v1365_v1  ;;  %v1218_v0 = vld [vmem:[#allocation8 + $0x350] sm:$0xff]  ;;  %v6183_v1 = vrot.slane %v6174_v60, %v1153_v61 }
 0x296   :  { %1470 = vmatprep.subr.bf16.mxu0 %v1303_v3  ;;  %v1326_v2 = vunpack.c.h.s8.bf16 %v1218_v0  ;;  %v1323_v3 = vunpack.c.l.s8.bf16 %v1219_v59 }
 0x298   :  { %1428 = vmatpush2.bf16.msra.mxu1 %v1364_v6  ;;  %v1322_v6 = vunpack.c.l.s8.bf16 %v1218_v0 }
 0x299   :  { %1471 = vmatpush2.bf16.msra.mxu0 %v1302_v7  ;;  %1429 = vmatprep.subr.bf16.mxu1 %v1361_v8  ;;  %v1319_v7 = vunpack.c.h.s8.bf16 %v1215_v5  ;;  %v1214_v8 = vld [vmem:[#allocation8 + $0x330] sm:$0xff] }
 0x29a   :  { %1472 = vmatprep.subr.bf16.mxu0 %v1299_v9  ;;  %v1318_v9 = vunpack.c.h.s8.bf16 %v1214_v8 }
 0x29c   :  { %1430 = vmatpush2.bf16.msra.mxu1 %v1360_v15  ;;  %v1314_v15 = vunpack.c.l.s8.bf16 %v1214_v8 }
 0x29d   :  { %1473 = vmatpush2.bf16.msra.mxu0 %v1298_v18  ;;  %1431 = vmatprep.subr.bf16.mxu1 %v1357_v19  ;;  %v1311_v18 = vunpack.c.h.s8.bf16 %v1211_v14  ;;  %v1210_v19 = vld [vmem:[#allocation8 + $0x310] sm:$0xff] }
 0x29e   :  { %1474 = vmatprep.subr.bf16.mxu0 %v1295_v21  ;;  %v1310_v20 = vunpack.c.h.s8.bf16 %v1210_v19  ;;  %v1307_v21 = vunpack.c.l.s8.bf16 %v1211_v14 }
 0x2a0   :  { %1432 = vmatpush2.bf16.msra.mxu1 %v1356_v23  ;;  %v1306_v23 = vunpack.c.l.s8.bf16 %v1210_v19 }
 0x2a1   :  { %1475 = vmatpush2.bf16.msra.mxu0 %v1294_v24  ;;  %1433 = vmatprep.subr.bf16.mxu1 %v1353_v25  ;;  %v1367_v24 = vunpack.c.h.s8.bf16 %v1239_v22  ;;  %v1238_v25 = vld [vmem:[#allocation8 + $0x3f0] sm:$0xff] }
 0x2a2   :  { %1476 = vmatprep.subr.bf16.mxu0 %v1291_v26  ;;  %v1366_v26 = vunpack.c.h.s8.bf16 %v1238_v25 }
 0x2a4   :  { %1434 = vmatpush2.bf16.msra.mxu1 %v1352_v29  ;;  %v1362_v29 = vunpack.c.l.s8.bf16 %v1238_v25 }
 0x2a5   :  { %1477 = vmatpush2.bf16.msra.mxu0 %v1290_v30  ;;  %1435 = vmatprep.subr.bf16.mxu1 %v1349_v31  ;;  %v1359_v30 = vunpack.c.h.s8.bf16 %v1235_v28  ;;  %v1234_v31 = vld [vmem:[#allocation8 + $0x3d0] sm:$0xff] }
 0x2a6   :  { %1478 = vmatprep.subr.bf16.mxu0 %v1287_v33  ;;  %v1358_v32 = vunpack.c.h.s8.bf16 %v1234_v31  ;;  %v1355_v33 = vunpack.c.l.s8.bf16 %v1235_v28 }
 0x2a8   :  { %1436 = vmatpush2.bf16.msra.mxu1 %v1348_v4  ;;  %v1354_v4 = vunpack.c.l.s8.bf16 %v1234_v31 }
 0x2a9   :  { %1479 = vmatpush2.bf16.msra.mxu0 %v1286_v35  ;;  %1437 = vmatprep.subr.bf16.mxu1 %v1345_v36  ;;  %v1351_v35 = vunpack.c.h.s8.bf16 %v1231_v34  ;;  %v1230_v36 = vld [vmem:[#allocation8 + $0x3b0] sm:$0xff] }
 0x2aa   :  { %1480 = vmatprep.subr.bf16.mxu0 %v1283_v37  ;;  %v1350_v37 = vunpack.c.h.s8.bf16 %v1230_v36 }
 0x2ac   :  { %1438 = vmatpush2.bf16.msra.mxu1 %v1344_v40  ;;  %v1346_v40 = vunpack.c.l.s8.bf16 %v1230_v36  ;;  %v6226_v36 = vld [vmem:[#allocation7 + $0x10] sm:$0xff]  }
 0x2ad   :  { %1481 = vmatpush2.bf16.msra.mxu0 %v1282_v41  ;;  %1439 = vmatprep.subr.bf16.mxu1 %v1341_v42  ;;  %v1343_v41 = vunpack.c.h.s8.bf16 %v1227_v39  ;;  %v1226_v42 = vld [vmem:[#allocation8 + $0x390] sm:$0xff] }
 0x2ae   :  { %1482 = vmatprep.subr.bf16.mxu0 %v1279_v44  ;;  %v1342_v43 = vunpack.c.h.s8.bf16 %v1226_v42  ;;  %v1339_v44 = vunpack.c.l.s8.bf16 %v1227_v39  ;;  %v1338_v45 = vunpack.c.l.s8.bf16 %v1226_v42  ;;  %v1705_v39 = vld [vmem:[#allocation8 + $0x448] sm:$0xff]  ;;  %v1704_v42 = vld [vmem:[#allocation8 + $0x440] sm:$0xff] }
 0x2b0   :  { %1440 = vmatpush2.bf16.msra.mxu1 %v1340_v47  ;;  %v7067_v47 = vsub.s32 2, %v6169_v56 }
 0x2b1   :  { %1483 = vmatpush2.bf16.msra.mxu0 %v1278_v48  ;;  %1441 = vmatprep.subr.bf16.mxu1 %v1337_v11 }
 0x2b2   :  { %1484 = vmatprep.subr.bf16.mxu0 %v1275_v49  ;;  %v1150_v48 = vrot.slane %v6174_v60, %v7067_v47 }
 0x2b4   :  { %1442 = vmatpush2.bf16.msra.mxu1 %v1336_v52 }
 0x2b5   :  { %1485 = vmatpush2.bf16.msra.mxu0 %v1274_v53  ;;  %1497 = vmatprep.subr.bf16.mxu1 %v1335_v54 }
 0x2b7   :  { %1444 = vmatmul.mubr.bf16.vlgmr.msra.gmra.mxu1 %v6137_v17 }
 0x2b8   :  { %1487 = vmatmul.mubr.bf16.vlgmr.msra.gmra.mxu0 %v6135_v16  ;;  %1498 = vmatpush1.bf16.msra.mxu1 %v1334_v57 }
 0x2b9   :  { %1529 = vmatprep.mubr.bf16.mxu1 %v6133_v13  ;;  %1499 = vmatprep.subr.bf16.mxu1 %v1331_v58 }
 0x2ba   :  { %1605 = vmatprep.mubr.bf16.mxu0 %v7069_v46 }
 0x2bc   :  { %1500 = vmatpush1.bf16.msra.mxu1 %v1330_v62 }
 0x2bd   :  { %1501 = vmatprep.subr.bf16.mxu1 %v1327_v63 }
 0x2c0   :  { %1502 = vmatpush1.bf16.msra.mxu1 %v1326_v2 }
 0x2c1   :  { %1503 = vmatprep.subr.bf16.mxu1 %v1323_v3 }
 0x2c4   :  { %1504 = vmatpush1.bf16.msra.mxu1 %v1322_v6 }
 0x2c5   :  { %1505 = vmatprep.subr.bf16.mxu1 %v1319_v7 }
 0x2c8   :  { %1506 = vmatpush1.bf16.msra.mxu1 %v1318_v9 }
 0x2c9   :  { %1507 = vmatprep.subr.bf16.mxu1 %v1315_v10 }
 0x2cc   :  { %1508 = vmatpush1.bf16.msra.mxu1 %v1314_v15 }
 0x2cd   :  { %1509 = vmatprep.subr.bf16.mxu1 %v1311_v18 }
 0x2d0   :  { %1510 = vmatpush1.bf16.msra.mxu1 %v1310_v20 }
 0x2d1   :  { %1511 = vmatprep.subr.bf16.mxu1 %v1307_v21 }
 0x2d4   :  { %1512 = vmatpush1.bf16.msra.mxu1 %v1306_v23 }
 0x2d5   :  { %1513 = vmatprep.subr.bf16.mxu1 %v1367_v24 }
 0x2d8   :  { %1514 = vmatpush2.bf16.msra.mxu1 %v1366_v26 }
 0x2d9   :  { %1515 = vmatprep.subr.bf16.mxu1 %v1363_v27 }
 0x2dc   :  { %1516 = vmatpush2.bf16.msra.mxu1 %v1362_v29  ;;  %v1709_v29 = vld [vmem:[#allocation8 + $0x468] sm:$0xff] }
 0x2dd   :  { %1517 = vmatprep.subr.bf16.mxu1 %v1359_v30  ;;  %v1789_v34 = vunpack.c.h.s8.bf16 %v1709_v29 }
 0x2e0   :  { %1518 = vmatpush2.bf16.msra.mxu1 %v1358_v32 }
 0x2e1   :  { %1519 = vmatprep.subr.bf16.mxu1 %v1355_v33 }
 0x2e4   :  { %1520 = vmatpush2.bf16.msra.mxu1 %v1354_v4  ;;  %v1708_v4 = vld [vmem:[#allocation8 + $0x460] sm:$0xff] }
 0x2e5   :  { %1521 = vmatprep.subr.bf16.mxu1 %v1351_v35 }
 0x2e8   :  { %1522 = vmatpush2.bf16.msra.mxu1 %v1350_v37  ;;  %v1788_v37 = vunpack.c.h.s8.bf16 %v1708_v4 }
 0x2e9   :  { %1523 = vmatprep.subr.bf16.mxu1 %v1347_v38  ;;  %v1785_v38 = vunpack.c.l.s8.bf16 %v1709_v29 }
 0x2ec   :  { %1524 = vmatpush2.bf16.msra.mxu1 %v1346_v40  ;;  %v1784_v40 = vunpack.c.l.s8.bf16 %v1708_v4 }
 0x2ed   :  { %1525 = vmatprep.subr.bf16.mxu1 %v1343_v41  ;;  %v1781_v41 = vunpack.c.h.s8.bf16 %v1705_v39 }
 0x2f0   :  { %1526 = vmatpush2.bf16.msra.mxu1 %v1342_v43  ;;  %v6231_v43 = vld [vmem:[#allocation7 + $0x18] sm:$0xff]  }
 0x2f1   :  { %1527 = vmatprep.subr.bf16.mxu1 %v1339_v44  ;;  %v1780_v44 = vunpack.c.h.s8.bf16 %v1704_v42 }
 0x2f4   :  { %1528 = vmatpush2.bf16.msra.mxu1 %v1338_v45  ;;  %v1777_v45 = vunpack.c.l.s8.bf16 %v1705_v39 }
 0x2f7   :  { %1530 = vmatmul.mubr.bf16.vlgmr.msra.gmra.mxu1 %v6137_v17  ;;  %v6208_v0 = vpop.f32.mrf.mxu0 }
 0x2f8   :  { %1658 = vmatprep.mubr.bf16.mxu1 %v7069_v46 }
 0x2f9   :  { %v6210_v2 = vpop.f32.mrf.mxu0 }
 0x2fb   :  { %v6212_v3 = vpop.f32.mrf.mxu0 }
 0x2fd   :  { %v6214_v5 = vpop.f32.mrf.mxu0 }
 0x2ff   :  { %v6216_v6 = vpop.f32.mrf.mxu0 }
 0x301   :  { %v6218_v7 = vpop.f32.mrf.mxu0 }
 0x303   :  { %v6220_v8 = vpop.f32.mrf.mxu0 }
 0x305   :  { %v6222_v9 = vpop.f32.mrf.mxu0 }
 0x337   :  { %v1119_v11 = vpop.f32.mrf.mxu1  ;;  %v1402_v10 = vpop.f32.mrf.mxu0 }
 0x338   :  { %v6192_v49 = vadd.f32 %v1150_v48, %v1119_v11  ;;  %v1776_v11 = vunpack.c.l.s8.bf16 %v1704_v42  ;;  %v1713_v42 = vld [vmem:[#allocation8 + $0x488] sm:$0xff] }
 0x339   :  { %v1121_v50 = vpop.f32.mrf.mxu1  ;;  %v1404_v14 = vpop.f32.mrf.mxu0 }
 0x33a   :  { %v6195_v51 = vadd.f32 %v6183_v1, %v1121_v50 }
 0x33b   :  { %v1123_v52 = vpop.f32.mrf.mxu1  ;;  %v1406_v19 = vpop.f32.mrf.mxu0 }
 0x33c   :  { %v6197_v53 = vadd.f32 %v1150_v48, %v1123_v52  ;;  %v1700_v52 = vld [vmem:[#allocation8 + $0x420] sm:$0xff] }
 0x33d   :  { %v6199_v54 = vpop.f32.mrf.mxu1  ;;  %v1408_v24 = vpop.f32.mrf.mxu0 }
 0x33f   :  { %v1129_v55 = vpop.f32.mrf.mxu1 }
 0x340   :  { %v6201_v57 = vadd.f32 %v1150_v48, %v1129_v55  ;;  %v1772_v55 = vunpack.c.h.s8.bf16 %v1700_v52 }
 0x341   :  { %v1131_v58 = vpop.f32.mrf.mxu1 }
 0x342   :  { %v6204_v59 = vadd.f32 %v6183_v1, %v1131_v58 }
 0x343   :  { %v1133_v62 = vpop.f32.mrf.mxu1 }
 0x344   :  { %v6206_v63 = vadd.f32 %v1150_v48, %v1133_v62  ;;  %v1701_v48 = vld [vmem:[#allocation8 + $0x428] sm:$0xff] }
 0x345   :  { %v6224_v15 = vpop.f32.mrf.mxu1  ;;  %v1773_v50 = vunpack.c.h.s8.bf16 %v1701_v48  ;;  %v1769_v58 = vunpack.c.l.s8.bf16 %v1701_v48  ;;  %v1697_v62 = vld [vmem:[#allocation8 + $0x408] sm:$0xff] }
 0x377   :  { %v1445_v18 = vpop.f32.mrf.mxu1 }
 0x378   :  { %v1446_v25 = vadd.f32 %v1445_v18, %v1402_v10  ;;  %v1768_v10 = vunpack.c.l.s8.bf16 %v1700_v52  ;;  %v1696_v18 = vld [vmem:[#allocation8 + $0x400] sm:$0xff] }
 0x379   :  { %v1447_v20 = vpop.f32.mrf.mxu1 }
 0x37a   :  { %v1448_v22 = vadd.f32 %v1447_v20, %v1404_v14  ;;  %v1540_v32 = vmul.f32 0.00046397475, %v1446_v25  ;;  %v1765_v14 = vunpack.c.h.s8.bf16 %v1697_v62  ;;  %v1761_v20 = vunpack.c.l.s8.bf16 %v1697_v62 }
 0x37b   :  { %v1449_v21 = vpop.f32.mrf.mxu1 }
 0x37c   :  { %v1450_v23 = vadd.f32 %v1449_v21, %v1406_v19  ;;  %v1541_v30 = vmul.f32 0.00046397475, %v1448_v22  ;;  %v1764_v19 = vunpack.c.h.s8.bf16 %v1696_v18  ;;  %v1725_v21 = vld [vmem:[#allocation8 + $0x4e8] sm:$0xff]  ;;  %v1760_v22 = vunpack.c.l.s8.bf16 %v1696_v18 }
 0x37d   :  { %v1451_v26 = vpop.f32.mrf.mxu1 }
 0x37e   :  { %v1452_v27 = vadd.f32 %v1451_v26, %v1408_v24  ;;  %v1544_v28 = vmul.f32 0.00046397475, %v1450_v23  ;;  %v1821_v23 = vunpack.c.h.s8.bf16 %v1725_v21  ;;  %v1724_v24 = vld [vmem:[#allocation8 + $0x4e0] sm:$0xff]  ;;  %v1817_v26 = vunpack.c.l.s8.bf16 %v1725_v21 }
 0x37f   :  { %v1820_v25 = vunpack.c.h.s8.bf16 %v1724_v24 }
 0x380   :  { %v1545_v31 = vmul.f32 0.00046397475, %v1452_v27  ;;  %v1553_v35 = vpack.c.bf16 %v1544_v28, %v1540_v32  ;;  %v1721_v27 = vld [vmem:[#allocation8 + $0x4c8] sm:$0xff]  ;;  %v1816_v28 = vunpack.c.l.s8.bf16 %v1724_v24 }
 0x381   :  { %v1813_v29 = vunpack.c.h.s8.bf16 %v1721_v27  ;;  %v1809_v32 = vunpack.c.l.s8.bf16 %v1721_v27 }
 0x382   :  { %v1554_v33 = vpack.c.bf16 %v1545_v31, %v1541_v30  ;;  %v1720_v30 = vld [vmem:[#allocation8 + $0x4c0] sm:$0xff] }
 0x383   :  { %v1812_v31 = vunpack.c.h.s8.bf16 %v1720_v30  ;;  %v1808_v4 = vunpack.c.l.s8.bf16 %v1720_v30 }
 0x384   :  { %1587 = vmatprep.subr.bf16.mxu0 %v1554_v33  ;;  %v1717_v33 = vld [vmem:[#allocation8 + $0x4a8] sm:$0xff] }
 0x385   :  { %1588 = vmatpush1.bf16.msra.mxu0 %v1553_v35  ;;  %v1805_v35 = vunpack.c.h.s8.bf16 %v1717_v33 }
 0x386   :  { %1888 = vmatprep.subr.bf16.mxu0 %v1789_v34  ;;  %v1488_v34 = vpop.f32.mrf.mxu0 }
 0x388   :  { %5273 = vmatmul.mubr.msk.bf16.vlgmr.msra.gmra.mxu0 %vm1025_vm0, %v6226_v36 }
 0x389   :  { %1889 = vmatpush1.bf16.msra.mxu0 %v1788_v37  ;;  %1615 = vmatprep.mubr.bf16.mxu0 %v7069_v46  ;;  %v1716_v37 = vld [vmem:[#allocation8 + $0x4a0] sm:$0xff] }
 0x38a   :  { %1890 = vmatprep.subr.bf16.mxu0 %v1785_v38  ;;  %v1490_v38 = vpop.f32.mrf.mxu0  ;;  %v1804_v39 = vunpack.c.h.s8.bf16 %v1716_v37  ;;  %v1800_v48 = vunpack.c.l.s8.bf16 %v1716_v37 }
 0x38d   :  { %1891 = vmatpush1.bf16.msra.mxu0 %v1784_v40  ;;  %v1801_v40 = vunpack.c.l.s8.bf16 %v1717_v33 }
 0x38e   :  { %1892 = vmatprep.subr.bf16.mxu0 %v1781_v41 }
 0x390   :  { %5274 = vmatmul.mubr.msk.bf16.gmra.mxu0 %vm1025_vm0, %v6231_v43 }
 0x391   :  { %1893 = vmatpush1.bf16.msra.mxu0 %v1780_v44  ;;  %1920 = vmatprep.mubr.bf16.mxu0 %v6131_v12  ;;  %v1492_v44 = vpop.f32.mrf.mxu0 }
 0x392   :  { %1894 = vmatprep.subr.bf16.mxu0 %v1777_v45 }
 0x393   :  { %v1494_v62 = vpop.f32.mrf.mxu0 }
 0x395   :  { %1895 = vmatpush1.bf16.msra.mxu0 %v1776_v11  ;;  %v1797_v11 = vunpack.c.h.s8.bf16 %v1713_v42 }
 0x396   :  { %1896 = vmatprep.subr.bf16.mxu0 %v1773_v50  ;;  %v1712_v50 = vld [vmem:[#allocation8 + $0x480] sm:$0xff] }
 0x397   :  { %v1796_v18 = vunpack.c.h.s8.bf16 %v1712_v50  ;;  %v1792_v27 = vunpack.c.l.s8.bf16 %v1712_v50 }
 0x399   :  { %1897 = vmatpush1.bf16.msra.mxu0 %v1772_v55 }
 0x39a   :  { %1898 = vmatprep.subr.bf16.mxu0 %v1769_v58 }
 0x39d   :  { %1899 = vmatpush1.bf16.msra.mxu0 %v1768_v10 }
 0x39e   :  { %1900 = vmatprep.subr.bf16.mxu0 %v1765_v14 }
 0x3a1   :  { %1901 = vmatpush1.bf16.msra.mxu0 %v1764_v19 }
 0x3a2   :  { %1902 = vmatprep.subr.bf16.mxu0 %v1761_v20  ;;  %v1793_v20 = vunpack.c.l.s8.bf16 %v1713_v42 }
 0x3a5   :  { %1903 = vmatpush1.bf16.msra.mxu0 %v1760_v22  ;;  %v1741_v22 = vld [vmem:[#allocation8 + $0x568] sm:$0xff] }
 0x3a6   :  { %1904 = vmatprep.subr.bf16.mxu0 %v1821_v23  ;;  %v1711_v23 = vld [vmem:[#allocation8 + $0x478] sm:$0xff] }
 0x3a7   :  { %v1791_v30 = vunpack.c.h.s8.bf16 %v1711_v23  ;;  %v1787_v37 = vunpack.c.l.s8.bf16 %v1711_v23  ;;  %v1729_v23 = vld [vmem:[#allocation8 + $0x508] sm:$0xff] }
 0x3a9   :  { %1905 = vmatpush2.bf16.msra.mxu0 %v1820_v25 }
 0x3aa   :  { %1906 = vmatprep.subr.bf16.mxu0 %v1817_v26 }
 0x3ad   :  { %1907 = vmatpush2.bf16.msra.mxu0 %v1816_v28 }
 0x3ae   :  { %1908 = vmatprep.subr.bf16.mxu0 %v1813_v29  ;;  %v1853_v29 = vunpack.c.h.s8.bf16 %v1741_v22 }
 0x3b1   :  { %1909 = vmatpush2.bf16.msra.mxu0 %v1812_v31  ;;  %v1740_v31 = vld [vmem:[#allocation8 + $0x560] sm:$0xff] }
 0x3b2   :  { %1910 = vmatprep.subr.bf16.mxu0 %v1809_v32  ;;  %v1710_v32 = vld [vmem:[#allocation8 + $0x470] sm:$0xff] }
 0x3b5   :  { %1911 = vmatpush2.bf16.msra.mxu0 %v1808_v4  ;;  %v1790_v4 = vunpack.c.h.s8.bf16 %v1710_v32 }
 0x3b6   :  { %1912 = vmatprep.subr.bf16.mxu0 %v1805_v35  ;;  %v1849_v35 = vunpack.c.l.s8.bf16 %v1741_v22 }
 0x3b7   :  { %v1531_v41 = vpop.f32.mrf.mxu1 }
 0x3b8   :  { %v1532_v10 = vadd.f32 %v1531_v41, %v1488_v34  ;;  %v1852_v34 = vunpack.c.h.s8.bf16 %v1740_v31  ;;  %v1786_v41 = vunpack.c.l.s8.bf16 %v1710_v32 }
 0x3b9   :  { %v1533_v45 = vpop.f32.mrf.mxu1  ;;  %1913 = vmatpush2.bf16.msra.mxu0 %v1804_v39  ;;  %v1707_v39 = vld [vmem:[#allocation8 + $0x458] sm:$0xff] }
 0x3ba   :  { %1914 = vmatprep.subr.bf16.mxu0 %v1801_v40  ;;  %v1534_v55 = vadd.f32 %v1533_v45, %v1490_v38  ;;  %v1542_v26 = vmul.f32 0.00046397475, %v1532_v10  ;;  %v1737_v38 = vld [vmem:[#allocation8 + $0x548] sm:$0xff]  ;;  %v1848_v40 = vunpack.c.l.s8.bf16 %v1740_v31  ;;  %v1736_v45 = vld [vmem:[#allocation8 + $0x540] sm:$0xff] }
 0x3bb   :  { %v1535_v52 = vpop.f32.mrf.mxu1  ;;  %v1845_v42 = vunpack.c.h.s8.bf16 %v1737_v38  ;;  %v1841_v50 = vunpack.c.l.s8.bf16 %v1737_v38 }
 0x3bc   :  { %v1536_v58 = vadd.f32 %v1535_v52, %v1492_v44  ;;  %v1543_v24 = vmul.f32 0.00046397475, %v1534_v55  ;;  %v1783_v44 = vunpack.c.h.s8.bf16 %v1707_v39  ;;  %v1779_v52 = vunpack.c.l.s8.bf16 %v1707_v39  ;;  %v1733_v55 = vld [vmem:[#allocation8 + $0x528] sm:$0xff] }
 0x3bd   :  { %v1537_v14 = vpop.f32.mrf.mxu1  ;;  %1915 = vmatpush2.bf16.msra.mxu0 %v1800_v48  ;;  %v1706_v48 = vld [vmem:[#allocation8 + $0x450] sm:$0xff]  ;;  %v1837_v10 = vunpack.c.h.s8.bf16 %v1733_v55  ;;  %v1833_v22 = vunpack.c.l.s8.bf16 %v1733_v55 }
 0x3be   :  { %v1538_v19 = vadd.f32 %v1537_v14, %v1494_v62  ;;  %1916 = vmatprep.subr.bf16.mxu0 %v1797_v11  ;;  %v1546_v21 = vmul.f32 0.00046397475, %v1536_v58  ;;  %v1844_v11 = vunpack.c.h.s8.bf16 %v1736_v45  ;;  %v1840_v58 = vunpack.c.l.s8.bf16 %v1736_v45  ;;  %v1732_v14 = vld [vmem:[#allocation8 + $0x520] sm:$0xff] }
 0x3bf   :  { %v1778_v62 = vunpack.c.l.s8.bf16 %v1706_v48 }
 0x3c0   :  { %v1547_v25 = vmul.f32 0.00046397475, %v1538_v19  ;;  %v1555_v33 = vpack.c.bf16 %v1546_v21, %v1542_v26  ;;  %v1702_v19 = vld [vmem:[#allocation8 + $0x430] sm:$0xff] }
 0x3c1   :  { %1917 = vmatpush2.bf16.msra.mxu0 %v1796_v18  ;;  %v1774_v21 = vunpack.c.h.s8.bf16 %v1702_v19  ;;  %v1770_v26 = vunpack.c.l.s8.bf16 %v1702_v19 }
 0x3c2   :  { %v1556_v28 = vpack.c.bf16 %v1547_v25, %v1543_v24  ;;  %1918 = vmatprep.subr.bf16.mxu0 %v1793_v20  ;;  %v1836_v20 = vunpack.c.h.s8.bf16 %v1732_v14  ;;  %v1699_v24 = vld [vmem:[#allocation8 + $0x418] sm:$0xff]  ;;  %v1832_v25 = vunpack.c.l.s8.bf16 %v1732_v14 }
 0x3c4   :  { %1640 = vmatprep.subr.bf16.mxu1 %v1556_v28  ;;  %v1728_v28 = vld [vmem:[#allocation8 + $0x500] sm:$0xff] }
 0x3c5   :  { %1641 = vmatpush1.bf16.msra.mxu1 %v1555_v33  ;;  %1919 = vmatpush2.bf16.msra.mxu0 %v1792_v27  ;;  %v1829_v27 = vunpack.c.h.s8.bf16 %v1729_v23  ;;  %v1828_v31 = vunpack.c.h.s8.bf16 %v1728_v28  ;;  %v1825_v33 = vunpack.c.l.s8.bf16 %v1729_v23 }
 0x3c6   :  { %1931 = vmatprep.subr.bf16.mxu1 %v1853_v29  ;;  %1974 = vmatprep.subr.bf16.mxu0 %v1791_v30  ;;  %v1767_v29 = vunpack.c.h.s8.bf16 %v1699_v24  ;;  %v1698_v30 = vld [vmem:[#allocation8 + $0x410] sm:$0xff] }
 0x3c7   :  { %v1766_v32 = vunpack.c.h.s8.bf16 %v1698_v30  ;;  %v1762_v38 = vunpack.c.l.s8.bf16 %v1698_v30 }
 0x3c8   :  { %5275 = vmatmul.mubr.msk.bf16.vlgmr.msra.gmra.mxu1 %vm1025_vm0, %v6226_v36  ;;  %1921 = vmatmul.mubr.bf16.vlgmr.msra.gmra.mxu0 %v6135_v16  ;;  %v1782_v36 = vunpack.c.h.s8.bf16 %v1706_v48 }
 0x3c9   :  { %1932 = vmatpush1.bf16.msra.mxu1 %v1852_v34  ;;  %1975 = vmatpush1.bf16.msra.mxu0 %v1790_v4  ;;  %v1763_v34 = vunpack.c.l.s8.bf16 %v1699_v24  ;;  %v1757_v4 = vld [vmem:[#allocation8 + $0x5e8] sm:$0xff] }
 0x3ca   :  { %2006 = vmatprep.mubr.bf16.mxu0 %v6131_v12  ;;  %1933 = vmatprep.subr.bf16.mxu1 %v1849_v35  ;;  %v1703_v12 = vld [vmem:[#allocation8 + $0x438] sm:$0xff]  ;;  %v1885_v39 = vunpack.c.h.s8.bf16 %v1757_v4  ;;  %v1881_v48 = vunpack.c.l.s8.bf16 %v1757_v4 }
 0x3cb   :  { %1976 = vmatprep.subr.bf16.mxu0 %v1787_v37  ;;  %1668 = vmatprep.mubr.bf16.mxu1 %v7069_v46  ;;  %v1775_v18 = vunpack.c.h.s8.bf16 %v1703_v12  ;;  %v1727_v35 = vld [vmem:[#allocation8 + $0x4f8] sm:$0xff]  ;;  %v1824_v37 = vunpack.c.l.s8.bf16 %v1728_v28 }
 0x3cd   :  { %1934 = vmatpush1.bf16.msra.mxu1 %v1848_v40  ;;  %1977 = vmatpush1.bf16.msra.mxu0 %v1786_v41  ;;  %v1756_v40 = vld [vmem:[#allocation8 + $0x5e0] sm:$0xff]  ;;  %v1823_v41 = vunpack.c.h.s8.bf16 %v1727_v35 }
 0x3ce   :  { %1935 = vmatprep.subr.bf16.mxu1 %v1845_v42  ;;  %1978 = vmatprep.subr.bf16.mxu0 %v1783_v44  ;;  %v1726_v42 = vld [vmem:[#allocation8 + $0x4f0] sm:$0xff]  ;;  %v1884_v44 = vunpack.c.h.s8.bf16 %v1756_v40 }
 0x3cf   :  { %v1822_v45 = vunpack.c.h.s8.bf16 %v1726_v42  ;;  %v1818_v55 = vunpack.c.l.s8.bf16 %v1726_v42 }
 0x3d0   :  { %5276 = vmatmul.mubr.msk.bf16.gmra.mxu1 %vm1025_vm0, %v6231_v43  ;;  %v1771_v43 = vunpack.c.l.s8.bf16 %v1703_v12 }
 0x3d1   :  { %1936 = vmatpush1.bf16.msra.mxu1 %v1844_v11  ;;  %1963 = vmatprep.mubr.bf16.mxu1 %v6133_v13  ;;  %v1819_v11 = vunpack.c.l.s8.bf16 %v1727_v35 }
 0x3d2   :  { %1979 = vmatpush1.bf16.msra.mxu0 %v1782_v36  ;;  %1937 = vmatprep.subr.bf16.mxu1 %v1841_v50  ;;  %v1753_v36 = vld [vmem:[#allocation8 + $0x5c8] sm:$0xff]  ;;  %v1723_v50 = vld [vmem:[#allocation8 + $0x4d8] sm:$0xff] }
 0x3d3   :  { %1980 = vmatprep.subr.bf16.mxu0 %v1779_v52  ;;  %v1880_v52 = vunpack.c.l.s8.bf16 %v1756_v40  ;;  %v1877_v12 = vunpack.c.h.s8.bf16 %v1753_v36  ;;  %v1873_v19 = vunpack.c.l.s8.bf16 %v1753_v36 }
 0x3d5   :  { %1938 = vmatpush1.bf16.msra.mxu1 %v1840_v58  ;;  %v1752_v58 = vld [vmem:[#allocation8 + $0x5c0] sm:$0xff] }
 0x3d6   :  { %1981 = vmatpush1.bf16.msra.mxu0 %v1778_v62  ;;  %1939 = vmatprep.subr.bf16.mxu1 %v1837_v10  ;;  %v1815_v62 = vunpack.c.h.s8.bf16 %v1723_v50  ;;  %v1722_v10 = vld [vmem:[#allocation8 + $0x4d0] sm:$0xff]  ;;  %v1876_v14 = vunpack.c.h.s8.bf16 %v1752_v58 }
 0x3d7   :  { %1982 = vmatprep.subr.bf16.mxu0 %v1775_v18  ;;  %v1814_v18 = vunpack.c.h.s8.bf16 %v1722_v10  ;;  %v1810_v23 = vunpack.c.l.s8.bf16 %v1722_v10  ;;  %v1738_v10 = vld [vmem:[#allocation8 + $0x550] sm:$0xff] }
 0x3d9   :  { %1940 = vmatpush1.bf16.msra.mxu1 %v1836_v20  ;;  %v1811_v20 = vunpack.c.l.s8.bf16 %v1723_v50  ;;  %v1742_v50 = vld [vmem:[#allocation8 + $0x570] sm:$0xff] }
 0x3da   :  { %1983 = vmatpush1.bf16.msra.mxu0 %v1774_v21  ;;  %1941 = vmatprep.subr.bf16.mxu1 %v1833_v22  ;;  %v1749_v21 = vld [vmem:[#allocation8 + $0x5a8] sm:$0xff]  ;;  %v1719_v22 = vld [vmem:[#allocation8 + $0x4b8] sm:$0xff] }
 0x3db   :  { %1984 = vmatprep.subr.bf16.mxu0 %v1771_v43  ;;  %v1872_v43 = vunpack.c.l.s8.bf16 %v1752_v58  ;;  %v1869_v24 = vunpack.c.h.s8.bf16 %v1749_v21  ;;  %v1865_v30 = vunpack.c.l.s8.bf16 %v1749_v21  ;;  %v1850_v58 = vunpack.c.l.s8.bf16 %v1742_v50 }
 0x3dd   :  { %1942 = vmatpush1.bf16.msra.mxu1 %v1832_v25  ;;  %v1748_v25 = vld [vmem:[#allocation8 + $0x5a0] sm:$0xff] }
 0x3de   :  { %1985 = vmatpush1.bf16.msra.mxu0 %v1770_v26  ;;  %1943 = vmatprep.subr.bf16.mxu1 %v1829_v27  ;;  %v1807_v26 = vunpack.c.h.s8.bf16 %v1719_v22  ;;  %v1718_v27 = vld [vmem:[#allocation8 + $0x4b0] sm:$0xff]  ;;  %v1868_v28 = vunpack.c.h.s8.bf16 %v1748_v25 }
 0x3df   :  { %1986 = vmatprep.subr.bf16.mxu0 %v1767_v29  ;;  %v1806_v29 = vunpack.c.h.s8.bf16 %v1718_v27  ;;  %v1802_v4 = vunpack.c.l.s8.bf16 %v1718_v27 }
 0x3e1   :  { %1944 = vmatpush1.bf16.msra.mxu1 %v1828_v31  ;;  %v1803_v31 = vunpack.c.l.s8.bf16 %v1719_v22  ;;  %v1734_v22 = vld [vmem:[#allocation8 + $0x530] sm:$0xff] }
 0x3e2   :  { %1987 = vmatpush1.bf16.msra.mxu0 %v1766_v32  ;;  %1945 = vmatprep.subr.bf16.mxu1 %v1825_v33  ;;  %v1745_v32 = vld [vmem:[#allocation8 + $0x588] sm:$0xff]  ;;  %v1715_v33 = vld [vmem:[#allocation8 + $0x498] sm:$0xff] }
 0x3e3   :  { %1988 = vmatprep.subr.bf16.mxu0 %v1763_v34  ;;  %v1864_v34 = vunpack.c.l.s8.bf16 %v1748_v25  ;;  %v1861_v35 = vunpack.c.h.s8.bf16 %v1745_v32  ;;  %v1857_v42 = vunpack.c.l.s8.bf16 %v1745_v32  ;;  %v1730_v25 = vld [vmem:[#allocation8 + $0x510] sm:$0xff] }
 0x3e5   :  { %1946 = vmatpush1.bf16.msra.mxu1 %v1824_v37  ;;  %v1744_v37 = vld [vmem:[#allocation8 + $0x580] sm:$0xff] }
 0x3e6   :  { %1989 = vmatpush1.bf16.msra.mxu0 %v1762_v38  ;;  %1947 = vmatprep.subr.bf16.mxu1 %v1885_v39  ;;  %v1799_v38 = vunpack.c.h.s8.bf16 %v1715_v33  ;;  %v1714_v39 = vld [vmem:[#allocation8 + $0x490] sm:$0xff]  ;;  %v1860_v40 = vunpack.c.h.s8.bf16 %v1744_v37 }
 0x3e7   :  { %1990 = vmatprep.subr.bf16.mxu0 %v1823_v41  ;;  %v1798_v41 = vunpack.c.h.s8.bf16 %v1714_v39 }
 0x3e9   :  { %1948 = vmatpush2.bf16.msra.mxu1 %v1884_v44  ;;  %v1795_v44 = vunpack.c.l.s8.bf16 %v1715_v33 }
 0x3ea   :  { %1991 = vmatpush2.bf16.msra.mxu0 %v1822_v45  ;;  %1949 = vmatprep.subr.bf16.mxu1 %v1881_v48  ;;  %v1743_v45 = vld [vmem:[#allocation8 + $0x578] sm:$0xff]  ;;  %v1856_v48 = vunpack.c.l.s8.bf16 %v1744_v37  ;;  %v1754_v37 = vld [vmem:[#allocation8 + $0x5d0] sm:$0xff] }
 0x3eb   :  { %1992 = vmatprep.subr.bf16.mxu0 %v1819_v11  ;;  %v1794_v11 = vunpack.c.l.s8.bf16 %v1714_v39  ;;  %v1855_v36 = vunpack.c.h.s8.bf16 %v1743_v45 }
 0x3ed   :  { %1950 = vmatpush2.bf16.msra.mxu1 %v1880_v52  ;;  %v1854_v52 = vunpack.c.h.s8.bf16 %v1742_v50 }
 0x3ee   :  { %1993 = vmatpush2.bf16.msra.mxu0 %v1818_v55  ;;  %1951 = vmatprep.subr.bf16.mxu1 %v1877_v12  ;;  %v1851_v55 = vunpack.c.l.s8.bf16 %v1743_v45  ;;  %v1739_v12 = vld [vmem:[#allocation8 + $0x558] sm:$0xff] }
 0x3ef   :  { %1994 = vmatprep.subr.bf16.mxu0 %v1815_v62  ;;  %v1847_v62 = vunpack.c.h.s8.bf16 %v1739_v12 }
 0x3f1   :  { %1952 = vmatpush2.bf16.msra.mxu1 %v1876_v14  ;;  %v1846_v14 = vunpack.c.h.s8.bf16 %v1738_v10 }
 0x3f2   :  { %1995 = vmatpush2.bf16.msra.mxu0 %v1814_v18  ;;  %1953 = vmatprep.subr.bf16.mxu1 %v1873_v19  ;;  %v1843_v18 = vunpack.c.l.s8.bf16 %v1739_v12  ;;  %v1735_v19 = vld [vmem:[#allocation8 + $0x538] sm:$0xff] }
 0x3f3   :  { %1996 = vmatprep.subr.bf16.mxu0 %v1811_v20  ;;  %v1842_v20 = vunpack.c.l.s8.bf16 %v1738_v10  ;;  %v1839_v21 = vunpack.c.h.s8.bf16 %v1735_v19 }
 0x3f5   :  { %1954 = vmatpush2.bf16.msra.mxu1 %v1872_v43  ;;  %v1835_v43 = vunpack.c.l.s8.bf16 %v1735_v19 }
 0x3f6   :  { %1997 = vmatpush2.bf16.msra.mxu0 %v1810_v23  ;;  %1955 = vmatprep.subr.bf16.mxu1 %v1869_v24  ;;  %v1834_v23 = vunpack.c.l.s8.bf16 %v1734_v22 }
 0x3f7   :  { %1998 = vmatprep.subr.bf16.mxu0 %v1807_v26  ;;  %v1830_v26 = vunpack.c.h.s8.bf16 %v1730_v25 }
 0x3f9   :  { %1956 = vmatpush2.bf16.msra.mxu1 %v1868_v28  ;;  %v1759_v28 = vld [vmem:[#allocation8 + $0x5f8] sm:$0xff] }
 0x3fa   :  { %1999 = vmatpush2.bf16.msra.mxu0 %v1806_v29  ;;  %1957 = vmatprep.subr.bf16.mxu1 %v1865_v30  ;;  %v1826_v29 = vunpack.c.l.s8.bf16 %v1730_v25  ;;  %v1887_v30 = vunpack.c.h.s8.bf16 %v1759_v28  ;;  %v1883_v33 = vunpack.c.l.s8.bf16 %v1759_v28 }
 0x3fb   :  { %2000 = vmatprep.subr.bf16.mxu0 %v1803_v31  ;;  %v1758_v31 = vld [vmem:[#allocation8 + $0x5f0] sm:$0xff] }
 0x3fc   :  { %v1886_v32 = vunpack.c.h.s8.bf16 %v1758_v31 }
 0x3fd   :  { %1958 = vmatpush2.bf16.msra.mxu1 %v1864_v34  ;;  %v1755_v34 = vld [vmem:[#allocation8 + $0x5d8] sm:$0xff] }
 0x3fe   :  { %2001 = vmatpush2.bf16.msra.mxu0 %v1802_v4  ;;  %1959 = vmatprep.subr.bf16.mxu1 %v1861_v35  ;;  %v1882_v4 = vunpack.c.l.s8.bf16 %v1758_v31  ;;  %v1879_v35 = vunpack.c.h.s8.bf16 %v1755_v34  ;;  %v1875_v39 = vunpack.c.l.s8.bf16 %v1755_v34 }
 0x3ff   :  { %2002 = vmatprep.subr.bf16.mxu0 %v1799_v38  ;;  %v1878_v38 = vunpack.c.h.s8.bf16 %v1754_v37 }
 0x401   :  { %1960 = vmatpush2.bf16.msra.mxu1 %v1860_v40  ;;  %v1751_v40 = vld [vmem:[#allocation8 + $0x5b8] sm:$0xff] }
 0x402   :  { %2003 = vmatpush2.bf16.msra.mxu0 %v1798_v41  ;;  %1961 = vmatprep.subr.bf16.mxu1 %v1857_v42  ;;  %v1874_v41 = vunpack.c.l.s8.bf16 %v1754_v37  ;;  %v1871_v42 = vunpack.c.h.s8.bf16 %v1751_v40 }
 0x403   :  { %2004 = vmatprep.subr.bf16.mxu0 %v1795_v44  ;;  %v1750_v44 = vld [vmem:[#allocation8 + $0x5b0] sm:$0xff] }
 0x404   :  { %v1870_v45 = vunpack.c.h.s8.bf16 %v1750_v44 }
 0x405   :  { %1962 = vmatpush2.bf16.msra.mxu1 %v1856_v48  ;;  %v1867_v48 = vunpack.c.l.s8.bf16 %v1751_v40 }
 0x406   :  { %2005 = vmatpush2.bf16.msra.mxu0 %v1794_v11  ;;  %2017 = vmatprep.subr.bf16.mxu1 %v1855_v36  ;;  %v1747_v11 = vld [vmem:[#allocation8 + $0x598] sm:$0xff]  ;;  %v1866_v36 = vunpack.c.l.s8.bf16 %v1750_v44 }
 0x407   :  { %v1863_v50 = vunpack.c.h.s8.bf16 %v1747_v11  ;;  %v1859_v12 = vunpack.c.l.s8.bf16 %v1747_v11 }
 0x408   :  { %1964 = vmatmul.mubr.bf16.vlgmr.msra.gmra.mxu1 %v6137_v17 }
 0x409   :  { %2007 = vmatmul.mubr.bf16.vlgmr.msra.gmra.mxu0 %v6135_v16  ;;  %2018 = vmatpush1.bf16.msra.mxu1 %v1854_v52  ;;  %v1838_v16 = vunpack.c.h.s8.bf16 %v1734_v22  ;;  %v1746_v52 = vld [vmem:[#allocation8 + $0x590] sm:$0xff] }
 0x40a   :  { %2049 = vmatprep.mubr.bf16.mxu1 %v6133_v13  ;;  %2019 = vmatprep.subr.bf16.mxu1 %v1851_v55  ;;  %v1731_v13 = vld [vmem:[#allocation8 + $0x518] sm:$0xff]  ;;  %v1862_v55 = vunpack.c.h.s8.bf16 %v1746_v52  ;;  %v1858_v10 = vunpack.c.l.s8.bf16 %v1746_v52 }
 0x40b   :  { %2125 = vmatprep.mubr.bf16.mxu0 %v7069_v46  ;;  %v1831_v24 = vunpack.c.h.s8.bf16 %v1731_v13  ;;  %v1827_v27 = vunpack.c.l.s8.bf16 %v1731_v13 }
 0x40d   :  { %2020 = vmatpush1.bf16.msra.mxu1 %v1850_v58  ;;  %v7068_v58 = vsub.s32 0, %v6169_v56 }
 0x40e   :  { %2021 = vmatprep.subr.bf16.mxu1 %v1847_v62  ;;  %v1145_v62 = vsub.s32 1, %v6169_v56 }
 0x411   :  { %2022 = vmatpush1.bf16.msra.mxu1 %v1846_v14  ;;  %v1142_v14 = vrot.slane %v6174_v60, %v7068_v58 }
 0x412   :  { %2023 = vmatprep.subr.bf16.mxu1 %v1843_v18  ;;  %v6256_v18 = vrot.slane %v6174_v60, %v1145_v62 }
 0x413   :  { %v1159_v19 = vadd.f32 %v1142_v14, %v6208_v0  ;;  %v1167_v0 = vadd.f32 %v1142_v14, %v6216_v6 }
 0x415   :  { %2024 = vmatpush1.bf16.msra.mxu1 %v1842_v20 }
 0x416   :  { %2025 = vmatprep.subr.bf16.mxu1 %v1839_v21  ;;  %v1160_v21 = vadd.f32 %v6256_v18, %v6210_v2  ;;  %v1168_v2 = vadd.f32 %v6256_v18, %v6218_v7 }
 0x419   :  { %2026 = vmatpush1.bf16.msra.mxu1 %v1838_v16 }
 0x41a   :  { %2027 = vmatprep.subr.bf16.mxu1 %v1835_v43  ;;  %v1163_v43 = vadd.f32 %v1142_v14, %v6212_v3 }
 0x41d   :  { %2028 = vmatpush1.bf16.msra.mxu1 %v1834_v23 }
 0x41e   :  { %2029 = vmatprep.subr.bf16.mxu1 %v1831_v24 }
 0x421   :  { %2030 = vmatpush1.bf16.msra.mxu1 %v1830_v26 }
 0x422   :  { %2031 = vmatprep.subr.bf16.mxu1 %v1827_v27  ;;  %v1171_v27 = vadd.f32 %v1142_v14, %v6220_v8 }
 0x425   :  { %2032 = vmatpush1.bf16.msra.mxu1 %v1826_v29 }
 0x426   :  { %2033 = vmatprep.subr.bf16.mxu1 %v1887_v30 }
 0x429   :  { %2034 = vmatpush2.bf16.msra.mxu1 %v1886_v32 }
 0x42a   :  { %2035 = vmatprep.subr.bf16.mxu1 %v1883_v33 }
 0x42d   :  { %2036 = vmatpush2.bf16.msra.mxu1 %v1882_v4 }
 0x42e   :  { %2037 = vmatprep.subr.bf16.mxu1 %v1879_v35 }
 0x431   :  { %2038 = vmatpush2.bf16.msra.mxu1 %v1878_v38 }
 0x432   :  { %2039 = vmatprep.subr.bf16.mxu1 %v1875_v39 }
 0x435   :  { %2040 = vmatpush2.bf16.msra.mxu1 %v1874_v41 }
 0x436   :  { %2041 = vmatprep.subr.bf16.mxu1 %v1871_v42 }
 0x439   :  { %2042 = vmatpush2.bf16.msra.mxu1 %v1870_v45 }
 0x43a   :  { %2043 = vmatprep.subr.bf16.mxu1 %v1867_v48 }
 0x43d   :  { %2044 = vmatpush2.bf16.msra.mxu1 %v1866_v36 }
 0x43e   :  { %2045 = vmatprep.subr.bf16.mxu1 %v1863_v50 }
 0x441   :  { %2046 = vmatpush2.bf16.msra.mxu1 %v1862_v55  ;;  %v2253_v55 = vld [vmem:[#allocation11 + $0x68] sm:$0xff] }
 0x442   :  { %2047 = vmatprep.subr.bf16.mxu1 %v1859_v12 }
 0x445   :  { %2048 = vmatpush2.bf16.msra.mxu1 %v1858_v10 }
 0x448   :  { %v1607_v20 = vpop.f32.mrf.mxu0  ;;  %2050 = vmatmul.mubr.bf16.vlgmr.msra.gmra.mxu1 %v6137_v17 }
 0x449   :  { %v6262_v22 = vadd.f32 %v1607_v20, %v1159_v19  ;;  %2178 = vmatprep.mubr.bf16.mxu1 %v7069_v46  ;;  %v2333_v19 = vunpack.c.h.s8.bf16 %v2253_v55  ;;  %v2252_v20 = vld [vmem:[#allocation11 + $0x60] sm:$0xff] }
 0x44a   :  { %v1609_v16 = vpop.f32.mrf.mxu0 }
 0x44b   :  { %v6266_v13 = vadd.f32 %v1609_v16, %v1160_v21  ;;  %v6306_v16 = vld [vmem:[#allocation7 + $0x20] sm:$0xff]  }
 0x44c   :  { %v1611_v60 = vpop.f32.mrf.mxu0 }
 0x44d   :  { %v6268_v23 = vadd.f32 %v1611_v60, %v1163_v43  ;;  %v2332_v43 = vunpack.c.h.s8.bf16 %v2252_v20  ;;  %v2329_v60 = vunpack.c.l.s8.bf16 %v2253_v55  ;;  %v2265_v55 = vld [vmem:[#allocation11 + $0xc8] sm:$0xff] }
 0x44e   :  { %v6270_v24 = vpop.f32.mrf.mxu0 }
 0x450   :  { %v1617_v17 = vpop.f32.mrf.mxu0 }
 0x451   :  { %v6275_v25 = vadd.f32 %v1617_v17, %v1167_v0  ;;  %v2249_v0 = vld [vmem:[#allocation11 + $0x48] sm:$0xff]  ;;  %v2328_v17 = vunpack.c.l.s8.bf16 %v2252_v20 }
 0x452   :  { %v1619_v26 = vpop.f32.mrf.mxu0  ;;  %v2261_v20 = vld [vmem:[#allocation11 + $0xa8] sm:$0xff] }
 0x453   :  { %v6278_v28 = vadd.f32 %v1619_v26, %v1168_v2  ;;  %v2325_v2 = vunpack.c.h.s8.bf16 %v2249_v0  ;;  %v2248_v26 = vld [vmem:[#allocation11 + $0x40] sm:$0xff] }
 0x454   :  { %v1621_v3 = vpop.f32.mrf.mxu0 }
 0x455   :  { %v6280_v29 = vadd.f32 %v1621_v3, %v1171_v27  ;;  %v6311_v27 = vld [vmem:[#allocation7 + $0x28] sm:$0xff]   ;;  %v2324_v3 = vunpack.c.h.s8.bf16 %v2248_v26 }
 0x488   :  { %v1660_v30 = vpop.f32.mrf.mxu1 }
 0x489   :  { %v6283_v31 = vadd.f32 %v1660_v30, %v6192_v49  ;;  %v2321_v30 = vunpack.c.l.s8.bf16 %v2249_v0  ;;  %v2260_v0 = vld [vmem:[#allocation11 + $0xa0] sm:$0xff] }
 0x48a   :  { %v1662_v32 = vpop.f32.mrf.mxu1 }
 0x48b   :  { %v6286_v6 = vadd.f32 %v1662_v32, %v6195_v51  ;;  %v6302_v51 = vpop.f32.mrf.mxu0  ;;  %v2245_v32 = vld [vmem:[#allocation11 + $0x28] sm:$0xff] }
 0x48c   :  { %v1664_v33 = vpop.f32.mrf.mxu1 }
 0x48d   :  { %v6289_v7 = vadd.f32 %v1664_v33, %v6197_v53  ;;  %v1922_v39 = vpop.f32.mrf.mxu0  ;;  %v2320_v33 = vunpack.c.l.s8.bf16 %v2248_v26 }
 0x48e   :  { %v6291_v34 = vpop.f32.mrf.mxu1 }
 0x48f   :  { %v1924_v40 = vpop.f32.mrf.mxu0 }
 0x490   :  { %v1670_v8 = vpop.f32.mrf.mxu1 }
 0x491   :  { %v6294_v4 = vadd.f32 %v1670_v8, %v6201_v57  ;;  %v1926_v42 = vpop.f32.mrf.mxu0  ;;  %v2317_v8 = vunpack.c.h.s8.bf16 %v2245_v32 }
 0x492   :  { %v1672_v35 = vpop.f32.mrf.mxu1 }
 0x493   :  { %v6297_v37 = vadd.f32 %v1672_v35, %v6204_v59  ;;  %v1928_v11 = vpop.f32.mrf.mxu0  ;;  %v2244_v35 = vld [vmem:[#allocation11 + $0x20] sm:$0xff] }
 0x494   :  { %v1674_v49 = vpop.f32.mrf.mxu1 }
 0x495   :  { %v6300_v38 = vadd.f32 %v1674_v49, %v6206_v63  ;;  %v2316_v49 = vunpack.c.h.s8.bf16 %v2244_v35 }
 0x496   :  { %v6304_v53 = vpop.f32.mrf.mxu1 }
 0x4c8   :  { %v1965_v41 = vpop.f32.mrf.mxu1 }
 0x4c9   :  { %v1966_v36 = vadd.f32 %v1965_v41, %v1922_v39  ;;  %v2313_v39 = vunpack.c.l.s8.bf16 %v2245_v32  ;;  %v2312_v41 = vunpack.c.l.s8.bf16 %v2244_v35 }
 0x4ca   :  { %v1967_v44 = vpop.f32.mrf.mxu1 }
 0x4cb   :  { %v1968_v57 = vadd.f32 %v1967_v44, %v1924_v40  ;;  %v2060_v10 = vmul.f32 0.00046397475, %v1966_v36  ;;  %v2241_v40 = vld [vmem:[#allocation11 + $0x8] sm:$0xff]  ;;  %v2240_v44 = vld [vmem:[#allocation11] sm:$0xff] }
 0x4cc   :  { %v1969_v45 = vpop.f32.mrf.mxu1 }
 0x4cd   :  { %v1970_v48 = vadd.f32 %v1969_v45, %v1926_v42  ;;  %v2061_v63 = vmul.f32 0.00046397475, %v1968_v57  ;;  %v2309_v42 = vunpack.c.h.s8.bf16 %v2241_v40  ;;  %v2308_v45 = vunpack.c.h.s8.bf16 %v2240_v44 }
 0x4ce   :  { %v1971_v59 = vpop.f32.mrf.mxu1  ;;  %v2305_v57 = vunpack.c.l.s8.bf16 %v2241_v40 }
 0x4cf   :  { %v1972_v50 = vadd.f32 %v1971_v59, %v1928_v11  ;;  %v2064_v52 = vmul.f32 0.00046397475, %v1970_v48  ;;  %v2269_v48 = vld [vmem:[#allocation11 + $0xe8] sm:$0xff]  ;;  %v2304_v11 = vunpack.c.l.s8.bf16 %v2240_v44  ;;  %v2268_v59 = vld [vmem:[#allocation11 + $0xe0] sm:$0xff] }
 0x4d0   :  { %v2365_v36 = vunpack.c.h.s8.bf16 %v2269_v48 }
 0x4d1   :  { %v2065_v12 = vmul.f32 0.00046397475, %v1972_v50  ;;  %v2073_v21 = vpack.c.bf16 %v2064_v52, %v2060_v10  ;;  %v2364_v50 = vunpack.c.h.s8.bf16 %v2268_v59  ;;  %v2361_v52 = vunpack.c.l.s8.bf16 %v2269_v48  ;;  %v2264_v10 = vld [vmem:[#allocation11 + $0xc0] sm:$0xff] }
 0x4d3   :  { %v2074_v14 = vpack.c.bf16 %v2065_v12, %v2061_v63  ;;  %v2360_v63 = vunpack.c.l.s8.bf16 %v2268_v59  ;;  %v2357_v12 = vunpack.c.h.s8.bf16 %v2265_v55  ;;  %v2257_v59 = vld [vmem:[#allocation11 + $0x88] sm:$0xff] }
 0x4d5   :  { %2107 = vmatprep.subr.bf16.mxu0 %v2074_v14  ;;  %v2356_v14 = vunpack.c.h.s8.bf16 %v2264_v10 }
 0x4d6   :  { %2108 = vmatpush1.bf16.msra.mxu0 %v2073_v21  ;;  %v2008_v21 = vpop.f32.mrf.mxu0 }
 0x4d7   :  { %2432 = vmatprep.subr.bf16.mxu0 %v2333_v19  ;;  %v2353_v19 = vunpack.c.l.s8.bf16 %v2265_v55 }
 0x4d9   :  { %5279 = vmatmul.mubr.msk.bf16.vlgmr.msra.gmra.mxu0 %vm1025_vm0, %v6306_v16 }
 0x4da   :  { %2135 = vmatprep.mubr.bf16.mxu0 %v7069_v46  ;;  %2433 = vmatpush1.bf16.msra.mxu0 %v2332_v43  ;;  %v2352_v43 = vunpack.c.l.s8.bf16 %v2264_v10  ;;  %v6320_v10 = vld [vmem:[#allocation11 + $0x78] sm:$0xff] }
 0x4db   :  { %2434 = vmatprep.subr.bf16.mxu0 %v2329_v60  ;;  %v2349_v60 = vunpack.c.h.s8.bf16 %v2261_v20 }
 0x4de   :  { %2435 = vmatpush1.bf16.msra.mxu0 %v2328_v17  ;;  %v2010_v17 = vpop.f32.mrf.mxu0 }
 0x4df   :  { %2436 = vmatprep.subr.bf16.mxu0 %v2325_v2  ;;  %v2348_v2 = vunpack.c.h.s8.bf16 %v2260_v0 }
 0x4e1   :  { %5280 = vmatmul.mubr.msk.bf16.gmra.mxu0 %vm1025_vm0, %v6311_v27 }
 0x4e2   :  { %2437 = vmatpush1.bf16.msra.mxu0 %v2324_v3  ;;  %v2012_v3 = vpop.f32.mrf.mxu0 }
 0x4e3   :  { %2438 = vmatprep.subr.bf16.mxu0 %v2321_v30 }
 0x4e4   :  { %v2014_v35 = vpop.f32.mrf.mxu0 }
 0x4e6   :  { %2439 = vmatpush1.bf16.msra.mxu0 %v2320_v33 }
 0x4e7   :  { %2440 = vmatprep.subr.bf16.mxu0 %v2317_v8 }
 0x4ea   :  { %2441 = vmatpush1.bf16.msra.mxu0 %v2316_v49 }
 0x4eb   :  { %2442 = vmatprep.subr.bf16.mxu0 %v2313_v39 }
 0x4ee   :  { %2443 = vmatpush1.bf16.msra.mxu0 %v2312_v41 }
 0x4ef   :  { %2444 = vmatprep.subr.bf16.mxu0 %v2309_v42 }
 0x4f2   :  { %2445 = vmatpush1.bf16.msra.mxu0 %v2308_v45 }
 0x4f3   :  { %2446 = vmatprep.subr.bf16.mxu0 %v2305_v57 }
 0x4f6   :  { %2447 = vmatpush1.bf16.msra.mxu0 %v2304_v11  ;;  %v2345_v11 = vunpack.c.l.s8.bf16 %v2261_v20  ;;  %v2284_v20 = vld [vmem:[#allocation11 + $0x160] sm:$0xff] }
 0x4f7   :  { %2448 = vmatprep.subr.bf16.mxu0 %v2365_v36  ;;  %v2344_v36 = vunpack.c.l.s8.bf16 %v2260_v0 }
 0x4fa   :  { %2449 = vmatpush2.bf16.msra.mxu0 %v2364_v50  ;;  %v2341_v50 = vunpack.c.h.s8.bf16 %v2257_v59 }
 0x4fb   :  { %2450 = vmatprep.subr.bf16.mxu0 %v2361_v52  ;;  %v2256_v52 = vld [vmem:[#allocation11 + $0x80] sm:$0xff] }
 0x4fc   :  { %v2340_v55 = vunpack.c.h.s8.bf16 %v2256_v52 }
 0x4fe   :  { %2451 = vmatpush2.bf16.msra.mxu0 %v2360_v63  ;;  %v2337_v63 = vunpack.c.l.s8.bf16 %v2257_v59 }
 0x4ff   :  { %2452 = vmatprep.subr.bf16.mxu0 %v2357_v12  ;;  %v2336_v12 = vunpack.c.l.s8.bf16 %v2256_v52  ;;  %v2297_v52 = vld [vmem:[#allocation11 + $0x1c8] sm:$0xff] }
 0x502   :  { %2453 = vmatpush2.bf16.msra.mxu0 %v2356_v14 }
 0x503   :  { %2454 = vmatprep.subr.bf16.mxu0 %v2353_v19  ;;  %v2335_v19 = vunpack.c.h.s8.bf16 %v6320_v10 }
 0x506   :  { %2455 = vmatpush2.bf16.msra.mxu0 %v2352_v43 }
 0x507   :  { %2456 = vmatprep.subr.bf16.mxu0 %v2349_v60  ;;  %v2392_v60 = vunpack.c.l.s8.bf16 %v2284_v20 }
 0x508   :  { %v2051_v26 = vpop.f32.mrf.mxu1 }
 0x509   :  { %v2052_v49 = vadd.f32 %v2051_v26, %v2008_v21  ;;  %v2396_v21 = vunpack.c.h.s8.bf16 %v2284_v20 }
 0x50a   :  { %v2053_v30 = vpop.f32.mrf.mxu1  ;;  %2457 = vmatpush2.bf16.msra.mxu0 %v2348_v2 }
 0x50b   :  { %v2054_v33 = vadd.f32 %v2053_v30, %v2010_v17  ;;  %v2062_v45 = vmul.f32 0.00046397475, %v2052_v49  ;;  %2458 = vmatprep.subr.bf16.mxu0 %v2345_v11  ;;  %v2280_v17 = vld [vmem:[#allocation11 + $0x140] sm:$0xff]  ;;  %v2277_v30 = vld [vmem:[#allocation11 + $0x128] sm:$0xff] }
 0x50c   :  { %v2055_v32 = vpop.f32.mrf.mxu1  ;;  %v2388_v2 = vunpack.c.h.s8.bf16 %v2280_v17  ;;  %v2300_v11 = vld [vmem:[#allocation11 + $0x1e0] sm:$0xff] }
 0x50d   :  { %v2056_v8 = vadd.f32 %v2055_v32, %v2012_v3  ;;  %v2063_v42 = vmul.f32 0.00046397475, %v2054_v33  ;;  %v2384_v3 = vunpack.c.l.s8.bf16 %v2280_v17  ;;  %v2381_v32 = vunpack.c.h.s8.bf16 %v2277_v30  ;;  %v2276_v33 = vld [vmem:[#allocation11 + $0x120] sm:$0xff] }
 0x50e   :  { %v2057_v39 = vpop.f32.mrf.mxu1  ;;  %2459 = vmatpush2.bf16.msra.mxu0 %v2344_v36  ;;  %v2376_v49 = vunpack.c.l.s8.bf16 %v2276_v33  ;;  %v2428_v36 = vunpack.c.h.s8.bf16 %v2300_v11 }
 0x50f   :  { %v2058_v40 = vadd.f32 %v2057_v39, %v2014_v35  ;;  %v2066_v41 = vmul.f32 0.00046397475, %v2056_v8  ;;  %2460 = vmatprep.subr.bf16.mxu0 %v2341_v50  ;;  %v2380_v8 = vunpack.c.h.s8.bf16 %v2276_v33  ;;  %v2377_v35 = vunpack.c.l.s8.bf16 %v2277_v30  ;;  %v2273_v39 = vld [vmem:[#allocation11 + $0x108] sm:$0xff] }
 0x510   :  { %v2424_v50 = vunpack.c.l.s8.bf16 %v2300_v11 }
 0x511   :  { %v2067_v44 = vmul.f32 0.00046397475, %v2058_v40  ;;  %v2075_v48 = vpack.c.bf16 %v2066_v41, %v2062_v45  ;;  %v2373_v40 = vunpack.c.h.s8.bf16 %v2273_v39  ;;  %v2272_v41 = vld [vmem:[#allocation11 + $0x100] sm:$0xff] }
 0x512   :  { %2461 = vmatpush2.bf16.msra.mxu0 %v2340_v55  ;;  %v2368_v45 = vunpack.c.l.s8.bf16 %v2272_v41  ;;  %v2421_v55 = vunpack.c.h.s8.bf16 %v2297_v52 }
 0x513   :  { %v2076_v57 = vpack.c.bf16 %v2067_v44, %v2063_v42  ;;  %2462 = vmatprep.subr.bf16.mxu0 %v2337_v63  ;;  %v2372_v42 = vunpack.c.h.s8.bf16 %v2272_v41  ;;  %v2369_v44 = vunpack.c.l.s8.bf16 %v2273_v39  ;;  %v2296_v63 = vld [vmem:[#allocation11 + $0x1c0] sm:$0xff] }
 0x515   :  { %2160 = vmatprep.subr.bf16.mxu1 %v2076_v57  ;;  %v2301_v57 = vld [vmem:[#allocation11 + $0x1e8] sm:$0xff] }
 0x516   :  { %2161 = vmatpush1.bf16.msra.mxu1 %v2075_v48  ;;  %2463 = vmatpush2.bf16.msra.mxu0 %v2336_v12  ;;  %v2429_v48 = vunpack.c.h.s8.bf16 %v2301_v57  ;;  %v2425_v59 = vunpack.c.l.s8.bf16 %v2301_v57  ;;  %v2420_v12 = vunpack.c.h.s8.bf16 %v2296_v63 }
 0x517   :  { %2538 = vmatprep.subr.bf16.mxu0 %v2335_v19  ;;  %v2293_v19 = vld [vmem:[#allocation11 + $0x1a8] sm:$0xff] }
 0x518   :  { %v2413_v20 = vunpack.c.h.s8.bf16 %v2293_v19 }
 0x519   :  { %5281 = vmatmul.mubr.msk.bf16.vlgmr.msra.gmra.mxu1 %vm1025_vm0, %v6306_v16  ;;  %v2285_v16 = vld [vmem:[#allocation11 + $0x168] sm:$0xff] }
 0x51a   :  { %2188 = vmatprep.mubr.bf16.mxu1 %v7069_v46  ;;  %v2397_v14 = vunpack.c.h.s8.bf16 %v2285_v16  ;;  %v2393_v43 = vunpack.c.l.s8.bf16 %v2285_v16  ;;  %v2417_v16 = vunpack.c.l.s8.bf16 %v2297_v52 }
 0x51c   :  { %2485 = vmatprep.subr.bf16.mxu1 %v2397_v14  ;;  %v2416_v14 = vunpack.c.l.s8.bf16 %v2296_v63 }
 0x51d   :  { %2486 = vmatpush1.bf16.msra.mxu1 %v2396_v21  ;;  %v2292_v21 = vld [vmem:[#allocation11 + $0x1a0] sm:$0xff] }
 0x51e   :  { %2487 = vmatprep.subr.bf16.mxu1 %v2393_v43  ;;  %v2412_v43 = vunpack.c.h.s8.bf16 %v2292_v21 }
 0x521   :  { %5282 = vmatmul.mubr.msk.bf16.gmra.mxu1 %vm1025_vm0, %v6311_v27  ;;  %v2281_v27 = vld [vmem:[#allocation11 + $0x148] sm:$0xff] }
 0x522   :  { %2488 = vmatpush1.bf16.msra.mxu1 %v2392_v60  ;;  %v2389_v0 = vunpack.c.h.s8.bf16 %v2281_v27  ;;  %v2385_v26 = vunpack.c.l.s8.bf16 %v2281_v27  ;;  %v2409_v60 = vunpack.c.l.s8.bf16 %v2293_v19  ;;  %v2408_v27 = vunpack.c.l.s8.bf16 %v2292_v21 }
 0x524   :  { %2489 = vmatprep.subr.bf16.mxu1 %v2389_v0  ;;  %v2289_v0 = vld [vmem:[#allocation11 + $0x188] sm:$0xff] }
 0x525   :  { %v2405_v17 = vunpack.c.h.s8.bf16 %v2289_v0 }
 0x526   :  { %2490 = vmatpush1.bf16.msra.mxu1 %v2388_v2  ;;  %v2288_v2 = vld [vmem:[#allocation11 + $0x180] sm:$0xff] }
 0x527   :  { %2491 = vmatprep.subr.bf16.mxu1 %v2385_v26  ;;  %v2404_v26 = vunpack.c.h.s8.bf16 %v2288_v2  ;;  %v2400_v30 = vunpack.c.l.s8.bf16 %v2288_v2  ;;  %v2247_v2 = vld [vmem:[#allocation11 + $0x38] sm:$0xff] }
 0x52a   :  { %2492 = vmatpush1.bf16.msra.mxu1 %v2384_v3  ;;  %v2401_v3 = vunpack.c.l.s8.bf16 %v2289_v0 }
 0x52b   :  { %2493 = vmatprep.subr.bf16.mxu1 %v2381_v32  ;;  %v6323_v32 = vld [vmem:[#allocation11 + $0x178] sm:$0xff] }
 0x52c   :  { %v2399_v33 = vunpack.c.h.s8.bf16 %v6323_v32 }
 0x52e   :  { %2494 = vmatpush1.bf16.msra.mxu1 %v2380_v8 }
 0x52f   :  { %2495 = vmatprep.subr.bf16.mxu1 %v2377_v35 }
 0x532   :  { %2496 = vmatpush1.bf16.msra.mxu1 %v2376_v49  ;;  %v1164_v49 = vadd.f32 %v6256_v18, %v6214_v5 }
 0x533   :  { %2497 = vmatprep.subr.bf16.mxu1 %v2373_v40 }
 0x534   :  { %v1684_v41 = vadd.f32 %v6270_v24, %v1164_v49 }
 0x536   :  { %2498 = vmatpush1.bf16.msra.mxu1 %v2372_v42 }
 0x537   :  { %2499 = vmatprep.subr.bf16.mxu1 %v2369_v44 }
 0x53a   :  { %2500 = vmatpush1.bf16.msra.mxu1 %v2368_v45 }
 0x53b   :  { %2501 = vmatprep.subr.bf16.mxu1 %v2429_v48 }
 0x53e   :  { %2502 = vmatpush2.bf16.msra.mxu1 %v2428_v36 }
 0x53f   :  { %2503 = vmatprep.subr.bf16.mxu1 %v2425_v59  ;;  %v2254_v59 = vld [vmem:[#allocation11 + $0x70] sm:$0xff] }
 0x540   :  { %v2334_v24 = vunpack.c.h.s8.bf16 %v2254_v59 }
 0x542   :  { %2504 = vmatpush2.bf16.msra.mxu1 %v2424_v50 }
 0x543   :  { %2505 = vmatprep.subr.bf16.mxu1 %v2421_v55 }
 0x546   :  { %2506 = vmatpush2.bf16.msra.mxu1 %v2420_v12  ;;  %v2331_v12 = vunpack.c.l.s8.bf16 %v6320_v10  ;;  %v2250_v10 = vld [vmem:[#allocation11 + $0x50] sm:$0xff] }
 0x547   :  { %2507 = vmatprep.subr.bf16.mxu1 %v2417_v16 }
 0x54a   :  { %2508 = vmatpush2.bf16.msra.mxu1 %v2416_v14 }
 0x54b   :  { %2509 = vmatprep.subr.bf16.mxu1 %v2413_v20  ;;  %v2251_v20 = vld [vmem:[#allocation11 + $0x58] sm:$0xff] }
 0x54e   :  { %2510 = vmatpush2.bf16.msra.mxu1 %v2412_v43 }
 0x54f   :  { %2511 = vmatprep.subr.bf16.mxu1 %v2409_v60  ;;  %v2327_v60 = vunpack.c.h.s8.bf16 %v2251_v20 }
 0x552   :  { %2512 = vmatpush2.bf16.msra.mxu1 %v2408_v27 }
 0x553   :  { %2513 = vmatprep.subr.bf16.mxu1 %v2405_v17  ;;  %v2323_v17 = vunpack.c.l.s8.bf16 %v2251_v20  ;;  %v2259_v20 = vld [vmem:[#allocation11 + $0x98] sm:$0xff] }
 0x556   :  { %2514 = vmatpush2.bf16.msra.mxu1 %v2404_v26  ;;  %v2322_v26 = vunpack.c.l.s8.bf16 %v2250_v10 }
 0x557   :  { %2515 = vmatprep.subr.bf16.mxu1 %v2401_v3  ;;  %v2319_v3 = vunpack.c.h.s8.bf16 %v2247_v2 }
 0x55a   :  { %2516 = vmatpush2.bf16.msra.mxu1 %v2400_v30  ;;  %v2246_v30 = vld [vmem:[#allocation11 + $0x30] sm:$0xff] }
 0x55b   :  { %2591 = vmatprep.subr.bf16.mxu1 %v2399_v33  ;;  %v2318_v33 = vunpack.c.h.s8.bf16 %v2246_v30  ;;  %v2314_v49 = vunpack.c.l.s8.bf16 %v2246_v30 }
 0x599   :  { %v2127_v8 = vpop.f32.mrf.mxu0 }
 0x59a   :  { %v2199_v39 = vadd.f32 %v2127_v8, %v6262_v22  ;;  %v1172_v22 = vadd.f32 %v6256_v18, %v6222_v9  ;;  %v2315_v8 = vunpack.c.l.s8.bf16 %v2247_v2 }
 0x59b   :  { %v2129_v35 = vpop.f32.mrf.mxu0 }
 0x59c   :  { %v2200_v42 = vadd.f32 %v2129_v35, %v6266_v13  ;;  %v2215_v57 = vmax.f32 %v2199_v39, 0.0  ;;  %v1692_v16 = vadd.f32 %v6302_v51, %v1172_v22  ;;  %v2243_v35 = vld [vmem:[#allocation11 + $0x18] sm:$0xff] }
 0x59d   :  { %v2131_v40 = vpop.f32.mrf.mxu0  ;;  %v2311_v39 = vunpack.c.h.s8.bf16 %v2243_v35 }
 0x59e   :  { %v2203_v44 = vadd.f32 %v2131_v40, %v6268_v23  ;;  %v2216_v50 = vmax.f32 %v2200_v42, 0.0  ;;  %v2242_v40 = vld [vmem:[#allocation11 + $0x10] sm:$0xff]  ;;  %v2307_v42 = vunpack.c.l.s8.bf16 %v2243_v35 }
 0x59f   :  { %v2133_v45 = vpop.f32.mrf.mxu0 }
 0x5a0   :  { %v2219_v48 = vmax.f32 %v2203_v44, 0.0  ;;  %v2204_v11 = vadd.f32 %v2133_v45, %v1684_v41  ;;  %v2310_v41 = vunpack.c.h.s8.bf16 %v2242_v40  ;;  %v2271_v44 = vld [vmem:[#allocation11 + $0xf8] sm:$0xff]  ;;  %v2306_v45 = vunpack.c.l.s8.bf16 %v2242_v40 }
 0x5a1   :  { %v2137_v36 = vpop.f32.mrf.mxu0 }
 0x5a2   :  { %v6332_v52 = vpack.c.bf16 %v2219_v48, %v2215_v57  ;;  %v2220_v55 = vmax.f32 %v2204_v11, 0.0  ;;  %v2207_v13 = vadd.f32 %v2137_v36, %v6275_v25  ;;  %v2330_v25 = vunpack.c.l.s8.bf16 %v2254_v59  ;;  %v2270_v48 = vld [vmem:[#allocation11 + $0xf0] sm:$0xff]  ;;  %v2267_v59 = vld [vmem:[#allocation11 + $0xd8] sm:$0xff] }
 0x5a3   :  { %v2139_v5 = vpop.f32.mrf.mxu0  ;;  %v2367_v57 = vunpack.c.h.s8.bf16 %v2271_v44  ;;  %v2366_v11 = vunpack.c.h.s8.bf16 %v2270_v48  ;;  %v2363_v36 = vunpack.c.l.s8.bf16 %v2271_v44 }
 0x5a4   :  { %v6336_v63 = vpack.c.bf16 %v2220_v55, %v2216_v50  ;;  %v2208_v14 = vadd.f32 %v2139_v5, %v6278_v28  ;;  %v2223_v9 = vmax.f32 %v2207_v13, 0.0  ;;  %v2362_v50 = vunpack.c.l.s8.bf16 %v2270_v48  ;;  %v2266_v5 = vld [vmem:[#allocation11 + $0xd0] sm:$0xff] }
 0x5a5   :  { %v2141_v23 = vpop.f32.mrf.mxu0  ;;  %v2359_v55 = vunpack.c.h.s8.bf16 %v2267_v59  ;;  %v2358_v22 = vunpack.c.h.s8.bf16 %v2266_v5  ;;  %v2355_v13 = vunpack.c.l.s8.bf16 %v2267_v59 }
 0x5a6   :  { %v2211_v19 = vadd.f32 %v2141_v23, %v6280_v29  ;;  %2464 = vmatprep.mubr.bf16.mxu0 %v6336_v63  ;;  %v2224_v27 = vmax.f32 %v2208_v14, 0.0  ;;  %v2326_v29 = vunpack.c.h.s8.bf16 %v2250_v10  ;;  %v2354_v23 = vunpack.c.l.s8.bf16 %v2266_v5 }
 0x5a7   :  { %v2143_v21 = vpop.f32.mrf.mxu0  ;;  %2465 = vmatmul.mubr.bf16.vlgmr.msra.gmra.mxu0 %v6332_v52 }
 0x5a8   :  { %v2227_v18 = vmax.f32 %v2211_v19, 0.0  ;;  %v2212_v43 = vadd.f32 %v2143_v21, %v1692_v16  ;;  %2539 = vmatpush1.bf16.msra.mxu0 %v2334_v24  ;;  %v2263_v24 = vld [vmem:[#allocation11 + $0xb8] sm:$0xff]  ;;  %v2262_v16 = vld [vmem:[#allocation11 + $0xb0] sm:$0xff] }
 0x5a9   :  { %2540 = vmatprep.subr.bf16.mxu0 %v2331_v12  ;;  %v2351_v12 = vunpack.c.h.s8.bf16 %v2263_v24  ;;  %v2350_v14 = vunpack.c.h.s8.bf16 %v2262_v16  ;;  %v2347_v19 = vunpack.c.l.s8.bf16 %v2263_v24  ;;  %v2346_v21 = vunpack.c.l.s8.bf16 %v2262_v16  ;;  %v2279_v24 = vld [vmem:[#allocation11 + $0x138] sm:$0xff]  ;;  %v2278_v16 = vld [vmem:[#allocation11 + $0x130] sm:$0xff] }
 0x5aa   :  { %v6345_v51 = vpack.c.bf16 %v2227_v18, %v2223_v9  ;;  %v2228_v28 = vmax.f32 %v2212_v43, 0.0  ;;  %v2343_v18 = vunpack.c.h.s8.bf16 %v2259_v20  ;;  %v2258_v43 = vld [vmem:[#allocation11 + $0x90] sm:$0xff] }
 0x5ab   :  { %v2338_v35 = vunpack.c.l.s8.bf16 %v2258_v43 }
 0x5ac   :  { %v6347_v0 = vpack.c.bf16 %v2228_v28, %v2224_v27  ;;  %2541 = vmatpush1.bf16.msra.mxu0 %v2330_v25  ;;  %v2342_v27 = vunpack.c.h.s8.bf16 %v2258_v43 }
 0x5ad   :  { %2542 = vmatprep.subr.bf16.mxu0 %v2327_v60  ;;  %v1166_v60 = vadd.f32 %v6183_v1, %v6199_v54 }
 0x5ae   :  { %2474 = vmatprep.mubr.bf16.mxu0 %v6347_v0 }
 0x5af   :  { %2475 = vmatmul.mubr.bf16.gmra.mxu0 %v6345_v51 }
 0x5b0   :  { %2543 = vmatpush1.bf16.msra.mxu0 %v2326_v29  ;;  %2570 = vmatprep.mubr.bf16.mxu0 %v6336_v63  ;;  %v2339_v29 = vunpack.c.l.s8.bf16 %v2259_v20  ;;  %v2275_v20 = vld [vmem:[#allocation11 + $0x118] sm:$0xff] }
 0x5b1   :  { %2544 = vmatprep.subr.bf16.mxu0 %v2323_v17  ;;  %v1686_v17 = vadd.f32 %v6291_v34, %v1166_v60  ;;  %v1174_v34 = vadd.f32 %v6183_v1, %v6224_v15  ;;  %v2303_v60 = vld [vmem:[#allocation11 + $0x1f8] sm:$0xff] }
 0x5b4   :  { %2545 = vmatpush1.bf16.msra.mxu0 %v2322_v26 }
 0x5b5   :  { %2546 = vmatprep.subr.bf16.mxu0 %v2319_v3 }
 0x5b8   :  { %2547 = vmatpush1.bf16.msra.mxu0 %v2318_v33 }
 0x5b9   :  { %2548 = vmatprep.subr.bf16.mxu0 %v2315_v8 }
 0x5bc   :  { %2549 = vmatpush1.bf16.msra.mxu0 %v2314_v49 }
 0x5bd   :  { %2550 = vmatprep.subr.bf16.mxu0 %v2311_v39 }
 0x5c0   :  { %2551 = vmatpush1.bf16.msra.mxu0 %v2310_v41 }
 0x5c1   :  { %2552 = vmatprep.subr.bf16.mxu0 %v2307_v42 }
 0x5c4   :  { %2553 = vmatpush1.bf16.msra.mxu0 %v2306_v45  ;;  %v2395_v45 = vunpack.c.l.s8.bf16 %v6323_v32 }
 0x5c5   :  { %2554 = vmatprep.subr.bf16.mxu0 %v2367_v57  ;;  %v1694_v57 = vadd.f32 %v6304_v53, %v1174_v34  ;;  %v2291_v34 = vld [vmem:[#allocation11 + $0x198] sm:$0xff] }
 0x5c8   :  { %2555 = vmatpush2.bf16.msra.mxu0 %v2366_v11 }
 0x5c9   :  { %2556 = vmatprep.subr.bf16.mxu0 %v2363_v36  ;;  %v2283_v36 = vld [vmem:[#allocation11 + $0x158] sm:$0xff] }
 0x5ca   :  { %v2391_v53 = vunpack.c.h.s8.bf16 %v2283_v36 }
 0x5cc   :  { %2557 = vmatpush2.bf16.msra.mxu0 %v2362_v50 }
 0x5cd   :  { %2558 = vmatprep.subr.bf16.mxu0 %v2359_v55 }
 0x5d0   :  { %2559 = vmatpush2.bf16.msra.mxu0 %v2358_v22 }
 0x5d1   :  { %2560 = vmatprep.subr.bf16.mxu0 %v2355_v13  ;;  %v2387_v13 = vunpack.c.l.s8.bf16 %v2283_v36 }
 0x5d4   :  { %2561 = vmatpush2.bf16.msra.mxu0 %v2354_v23 }
 0x5d5   :  { %2562 = vmatprep.subr.bf16.mxu0 %v2351_v12  ;;  %v2383_v12 = vunpack.c.h.s8.bf16 %v2279_v24 }
 0x5d8   :  { %2563 = vmatpush2.bf16.msra.mxu0 %v2350_v14  ;;  %v2382_v14 = vunpack.c.h.s8.bf16 %v2278_v16 }
 0x5d9   :  { %v2180_v9 = vpop.f32.mrf.mxu1  ;;  %2564 = vmatprep.subr.bf16.mxu0 %v2347_v19  ;;  %v2379_v19 = vunpack.c.l.s8.bf16 %v2279_v24 }
 0x5da   :  { %v2201_v10 = vadd.f32 %v2180_v9, %v6283_v31  ;;  %v2286_v31 = vld [vmem:[#allocation11 + $0x170] sm:$0xff]  ;;  %v2375_v9 = vunpack.c.h.s8.bf16 %v2275_v20 }
 0x5db   :  { %v2182_v25 = vpop.f32.mrf.mxu1  ;;  %v2398_v42 = vunpack.c.h.s8.bf16 %v2286_v31  ;;  %v2394_v32 = vunpack.c.l.s8.bf16 %v2286_v31 }
 0x5dc   :  { %2565 = vmatpush2.bf16.msra.mxu0 %v2346_v21  ;;  %v2202_v2 = vadd.f32 %v2182_v25, %v6286_v6  ;;  %v2217_v30 = vmax.f32 %v2201_v10, 0.0  ;;  %v2378_v21 = vunpack.c.l.s8.bf16 %v2278_v16  ;;  %v2371_v25 = vunpack.c.l.s8.bf16 %v2275_v20 }
 0x5dd   :  { %v2184_v28 = vpop.f32.mrf.mxu1  ;;  %2566 = vmatprep.subr.bf16.mxu0 %v2343_v18  ;;  %v2274_v18 = vld [vmem:[#allocation11 + $0x110] sm:$0xff] }
 0x5de   :  { %v2205_v26 = vadd.f32 %v2184_v28, %v6289_v7  ;;  %v2218_v49 = vmax.f32 %v2202_v2, 0.0  ;;  %v2374_v43 = vunpack.c.h.s8.bf16 %v2274_v18  ;;  %v2370_v10 = vunpack.c.l.s8.bf16 %v2274_v18  ;;  %v2302_v28 = vld [vmem:[#allocation11 + $0x1f0] sm:$0xff]  ;;  %v2299_v2 = vld [vmem:[#allocation11 + $0x1d8] sm:$0xff] }
 0x5df   :  { %v2186_v3 = vpop.f32.mrf.mxu1 }
 0x5e0   :  { %v2221_v33 = vmax.f32 %v2205_v26, 0.0  ;;  %v2206_v8 = vadd.f32 %v2186_v3, %v1686_v17  ;;  %2567 = vmatpush2.bf16.msra.mxu0 %v2342_v27  ;;  %v2431_v27 = vunpack.c.h.s8.bf16 %v2303_v60  ;;  %v2427_v17 = vunpack.c.l.s8.bf16 %v2303_v60 }
 0x5e1   :  { %v2190_v54 = vpop.f32.mrf.mxu1  ;;  %2568 = vmatprep.subr.bf16.mxu0 %v2339_v29  ;;  %v2430_v29 = vunpack.c.h.s8.bf16 %v2302_v28  ;;  %v2426_v26 = vunpack.c.l.s8.bf16 %v2302_v28  ;;  %v2423_v3 = vunpack.c.h.s8.bf16 %v2299_v2 }
 0x5e2   :  { %v6358_v39 = vpack.c.bf16 %v2221_v33, %v2217_v30  ;;  %v2222_v40 = vmax.f32 %v2206_v8, 0.0  ;;  %v2209_v7 = vadd.f32 %v2190_v54, %v6294_v4  ;;  %v2298_v30 = vld [vmem:[#allocation11 + $0x1d0] sm:$0xff]  ;;  %v2419_v8 = vunpack.c.l.s8.bf16 %v2299_v2 }
 0x5e3   :  { %v2192_v41 = vpop.f32.mrf.mxu1  ;;  %v2422_v33 = vunpack.c.h.s8.bf16 %v2298_v30  ;;  %v2418_v54 = vunpack.c.l.s8.bf16 %v2298_v30 }
 0x5e4   :  { %v6362_v6 = vpack.c.bf16 %v2222_v40, %v2218_v49  ;;  %2569 = vmatpush2.bf16.msra.mxu0 %v2338_v35  ;;  %v2210_v48 = vadd.f32 %v2192_v41, %v6297_v37  ;;  %v2225_v15 = vmax.f32 %v2209_v7, 0.0  ;;  %v2282_v37 = vld [vmem:[#allocation11 + $0x150] sm:$0xff]  ;;  %v2295_v35 = vld [vmem:[#allocation11 + $0x1b8] sm:$0xff] }
 0x5e5   :  { %v2194_v44 = vpop.f32.mrf.mxu1  ;;  %v2390_v22 = vunpack.c.h.s8.bf16 %v2282_v37  ;;  %v2386_v23 = vunpack.c.l.s8.bf16 %v2282_v37  ;;  %v2415_v31 = vunpack.c.h.s8.bf16 %v2295_v35  ;;  %v2294_v49 = vld [vmem:[#allocation11 + $0x1b0] sm:$0xff]  ;;  %v2411_v41 = vunpack.c.l.s8.bf16 %v2295_v35  ;;  %v2921_v35 = vld [vmem:[#allocation11 + $0x260] sm:$0xff] }
 0x5e6   :  { %v2213_v11 = vadd.f32 %v2194_v44, %v6300_v38  ;;  %2517 = vmatprep.mubr.bf16.mxu1 %v6362_v6  ;;  %v2226_v50 = vmax.f32 %v2210_v48, 0.0  ;;  %v2414_v40 = vunpack.c.h.s8.bf16 %v2294_v49  ;;  %v2410_v7 = vunpack.c.l.s8.bf16 %v2294_v49  ;;  %v2290_v44 = vld [vmem:[#allocation11 + $0x190] sm:$0xff] }
 0x5e7   :  { %2571 = vmatmul.mubr.bf16.vlgmr.msra.gmra.mxu0 %v6332_v52  ;;  %v2196_v1 = vpop.f32.mrf.mxu1  ;;  %2518 = vmatmul.mubr.bf16.vlgmr.msra.gmra.mxu1 %v6358_v39  ;;  %v2402_v48 = vunpack.c.l.s8.bf16 %v2290_v44  ;;  %v3001_v49 = vunpack.c.h.s8.bf16 %v2921_v35 }
 0x5e8   :  { %v2229_v4 = vmax.f32 %v2213_v11, 0.0  ;;  %v2214_v59 = vadd.f32 %v2196_v1, %v1694_v57  ;;  %2580 = vmatprep.mubr.bf16.mxu0 %v6347_v0  ;;  %2592 = vmatpush1.bf16.msra.mxu1 %v2398_v42  ;;  %v2407_v42 = vunpack.c.h.s8.bf16 %v2291_v34  ;;  %v2403_v57 = vunpack.c.l.s8.bf16 %v2291_v34 }
 0x5e9   :  { %2593 = vmatprep.subr.bf16.mxu1 %v2395_v45  ;;  %v2406_v45 = vunpack.c.h.s8.bf16 %v2290_v44  ;;  %v2997_v34 = vunpack.c.l.s8.bf16 %v2921_v35  ;;  %v6391_v44 = vld [vmem:[#allocation10 + $0x8] sm:$0xff]  }
 0x5ea   :  { %v6373_v38 = vpack.c.bf16 %v2229_v4, %v2225_v15  ;;  %v2230_v55 = vmax.f32 %v2214_v59, 0.0 }
 0x5ec   :  { %v6375_v5 = vpack.c.bf16 %v2230_v55, %v2226_v50  ;;  %2594 = vmatpush1.bf16.msra.mxu1 %v2394_v32 }
 0x5ed   :  { %2595 = vmatprep.subr.bf16.mxu1 %v2391_v53 }
 0x5ee   :  { %2527 = vmatprep.mubr.bf16.mxu1 %v6375_v5 }
 0x5ef   :  { %2581 = vmatmul.mubr.bf16.gmra.mxu0 %v6345_v51  ;;  %2528 = vmatmul.mubr.bf16.gmra.mxu1 %v6373_v38 }
 0x5f0   :  { %2596 = vmatpush1.bf16.msra.mxu1 %v2390_v22  ;;  %2623 = vmatprep.mubr.bf16.mxu1 %v6362_v6 }
 0x5f1   :  { %2597 = vmatprep.subr.bf16.mxu1 %v2387_v13  ;;  %2741 = vmatprep.mubr.bf16.mxu0 %v7069_v46 }
 0x5f4   :  { %2598 = vmatpush1.bf16.msra.mxu1 %v2386_v23 }
 0x5f5   :  { %2599 = vmatprep.subr.bf16.mxu1 %v2383_v12 }
 0x5f8   :  { %2600 = vmatpush1.bf16.msra.mxu1 %v2382_v14 }
 0x5f9   :  { %2601 = vmatprep.subr.bf16.mxu1 %v2379_v19 }
 0x5fc   :  { %2602 = vmatpush1.bf16.msra.mxu1 %v2378_v21 }
 0x5fd   :  { %2603 = vmatprep.subr.bf16.mxu1 %v2375_v9 }
 0x600   :  { %2604 = vmatpush1.bf16.msra.mxu1 %v2374_v43 }
 0x601   :  { %2605 = vmatprep.subr.bf16.mxu1 %v2371_v25 }
 0x604   :  { %2606 = vmatpush1.bf16.msra.mxu1 %v2370_v10 }
 0x605   :  { %2607 = vmatprep.subr.bf16.mxu1 %v2431_v27 }
 0x608   :  { %2608 = vmatpush2.bf16.msra.mxu1 %v2430_v29 }
 0x609   :  { %2609 = vmatprep.subr.bf16.mxu1 %v2427_v17 }
 0x60c   :  { %2610 = vmatpush2.bf16.msra.mxu1 %v2426_v26 }
 0x60d   :  { %2611 = vmatprep.subr.bf16.mxu1 %v2423_v3  ;;  %v2922_v3 = vld [vmem:[#allocation11 + $0x268] sm:$0xff] }
 0x610   :  { %2612 = vmatpush2.bf16.msra.mxu1 %v2422_v33 }
 0x611   :  { %2613 = vmatprep.subr.bf16.mxu1 %v2419_v8  ;;  %v3002_v8 = vunpack.c.h.s8.bf16 %v2922_v3 }
 0x614   :  { %2614 = vmatpush2.bf16.msra.mxu1 %v2418_v54 }
 0x615   :  { %2615 = vmatprep.subr.bf16.mxu1 %v2415_v31  ;;  %v6386_v31 = vld [vmem:[#allocation10] sm:$0xff]  }
 0x618   :  { %2616 = vmatpush2.bf16.msra.mxu1 %v2414_v40  ;;  %v2998_v40 = vunpack.c.l.s8.bf16 %v2922_v3  ;;  %v2930_v3 = vld [vmem:[#allocation11 + $0x2a8] sm:$0xff] }
 0x619   :  { %2617 = vmatprep.subr.bf16.mxu1 %v2411_v41  ;;  %v2918_v41 = vld [vmem:[#allocation11 + $0x248] sm:$0xff]  ;;  %v3018_v35 = vunpack.c.h.s8.bf16 %v2930_v3 }
 0x61c   :  { %2618 = vmatpush2.bf16.msra.mxu1 %v2410_v7  ;;  %v2994_v7 = vunpack.c.h.s8.bf16 %v2918_v41 }
 0x61d   :  { %2619 = vmatprep.subr.bf16.mxu1 %v2407_v42  ;;  %v2917_v42 = vld [vmem:[#allocation11 + $0x240] sm:$0xff] }
 0x620   :  { %2620 = vmatpush2.bf16.msra.mxu1 %v2406_v45  ;;  %v2993_v45 = vunpack.c.h.s8.bf16 %v2917_v42 }
 0x621   :  { %2621 = vmatprep.subr.bf16.mxu1 %v2403_v57  ;;  %v2990_v57 = vunpack.c.l.s8.bf16 %v2918_v41 }
 0x624   :  { %2622 = vmatpush2.bf16.msra.mxu1 %v2402_v48  ;;  %v2914_v48 = vld [vmem:[#allocation11 + $0x228] sm:$0xff] }
 0x627   :  { %2624 = vmatmul.mubr.bf16.vlgmr.msra.gmra.mxu1 %v6358_v39 }
 0x628   :  { %2633 = vmatprep.mubr.bf16.mxu1 %v6375_v5 }
 0x62f   :  { %2634 = vmatmul.mubr.bf16.gmra.mxu1 %v6373_v38 }
 0x630   :  { %2814 = vmatprep.mubr.bf16.mxu1 %v7069_v46 }
 0x667   :  { %v2466_v11 = vpop.f32.mrf.mxu0 }
 0x669   :  { %v2468_v36 = vpop.f32.mrf.mxu0 }
 0x66b   :  { %v2470_v1 = vpop.f32.mrf.mxu0 }
 0x66d   :  { %v2472_v15 = vpop.f32.mrf.mxu0 }
 0x66f   :  { %v2476_v59 = vpop.f32.mrf.mxu0 }
 0x671   :  { %v2478_v37 = vpop.f32.mrf.mxu0 }
 0x673   :  { %v2480_v22 = vpop.f32.mrf.mxu0 }
 0x675   :  { %v2482_v14 = vpop.f32.mrf.mxu0 }
 0x6a7   :  { %v2519_v4 = vpop.f32.mrf.mxu1 }
 0x6a8   :  { %v2520_v27 = vadd.f32 %v2519_v4, %v2466_v11  ;;  %v2989_v11 = vunpack.c.l.s8.bf16 %v2917_v42 }
 0x6a9   :  { %v2521_v32 = vpop.f32.mrf.mxu1 }
 0x6aa   :  { %v2522_v21 = vadd.f32 %v2521_v32, %v2468_v36  ;;  %v2644_v33 = vmul.f32 0.000656137, %v2520_v27  ;;  %v2986_v36 = vunpack.c.h.s8.bf16 %v2914_v48  ;;  %v2910_v32 = vld [vmem:[#allocation11 + $0x208] sm:$0xff] }
 0x6ab   :  { %v2523_v53 = vpop.f32.mrf.mxu1 }
 0x6ac   :  { %v2524_v18 = vadd.f32 %v2523_v53, %v2470_v1  ;;  %v2645_v29 = vmul.f32 0.000656137, %v2522_v21  ;;  %v2913_v1 = vld [vmem:[#allocation11 + $0x220] sm:$0xff] }
 0x6ad   :  { %v2525_v50 = vpop.f32.mrf.mxu1  ;;  %v2985_v4 = vunpack.c.h.s8.bf16 %v2913_v1  ;;  %v2981_v53 = vunpack.c.l.s8.bf16 %v2913_v1 }
 0x6ae   :  { %v2526_v23 = vadd.f32 %v2525_v50, %v2472_v15  ;;  %v2648_v2 = vmul.f32 0.000656137, %v2524_v18  ;;  %v6396_v15 = vld [vmem:[#allocation10 + $0x10] sm:$0xff]   ;;  %v2909_v50 = vld [vmem:[#allocation11 + $0x200] sm:$0xff]  ;;  %v2934_v18 = vld [vmem:[#allocation11 + $0x2c8] sm:$0xff] }
 0x6af   :  { %v2529_v55 = vpop.f32.mrf.mxu1 }
 0x6b0   :  { %v2530_v19 = vadd.f32 %v2529_v55, %v2476_v59  ;;  %v2649_v25 = vmul.f32 0.000656137, %v2526_v23  ;;  %v2668_v54 = vpack.c.bf16 %v2648_v2, %v2644_v33  ;;  %v2982_v59 = vunpack.c.l.s8.bf16 %v2914_v48  ;;  %v6401_v55 = vld [vmem:[#allocation10 + $0x18] sm:$0xff]   ;;  %v2938_v23 = vld [vmem:[#allocation11 + $0x2e8] sm:$0xff] }
 0x6b1   :  { %v2531_v13 = vpop.f32.mrf.mxu1  ;;  %v3022_v2 = vunpack.c.l.s8.bf16 %v2934_v18 }
 0x6b2   :  { %v2532_v12 = vadd.f32 %v2531_v13, %v2478_v37  ;;  %v2652_v28 = vmul.f32 0.000656137, %v2530_v19  ;;  %v2669_v30 = vpack.c.bf16 %v2649_v25, %v2645_v29  ;;  %v2978_v37 = vunpack.c.h.s8.bf16 %v2910_v32  ;;  %v2937_v19 = vld [vmem:[#allocation11 + $0x2e0] sm:$0xff] }
 0x6b3   :  { %v2533_v24 = vpop.f32.mrf.mxu1  ;;  %v2977_v13 = vunpack.c.h.s8.bf16 %v2909_v50  ;;  %v3033_v21 = vunpack.c.h.s8.bf16 %v2937_v19  ;;  %v3029_v25 = vunpack.c.l.s8.bf16 %v2937_v19 }
 0x6b4   :  { %v2534_v16 = vadd.f32 %v2533_v24, %v2480_v22  ;;  %v2653_v60 = vmul.f32 0.000656137, %v2532_v12  ;;  %v6403_v22 = vpop.f32.mrf.mxu0  ;;  %v2974_v24 = vunpack.c.l.s8.bf16 %v2910_v32 }
 0x6b5   :  { %v2535_v20 = vpop.f32.mrf.mxu1 }
 0x6b6   :  { %v2536_v9 = vadd.f32 %v2535_v20, %v2482_v14  ;;  %v2656_v43 = vmul.f32 0.000656137, %v2534_v16  ;;  %v2574_v12 = vpop.f32.mrf.mxu0  ;;  %v2973_v16 = vunpack.c.l.s8.bf16 %v2909_v50  ;;  %v3034_v14 = vunpack.c.h.s8.bf16 %v2938_v23  ;;  %v2925_v50 = vld [vmem:[#allocation11 + $0x280] sm:$0xff] }
 0x6b8   :  { %v2657_v10 = vmul.f32 0.000656137, %v2536_v9  ;;  %v2672_v26 = vpack.c.bf16 %v2656_v43, %v2652_v28  ;;  %v2576_v20 = vpop.f32.mrf.mxu0  ;;  %v3030_v9 = vunpack.c.l.s8.bf16 %v2938_v23 }
 0x6ba   :  { %v2673_v17 = vpack.c.bf16 %v2657_v10, %v2653_v60  ;;  %v2578_v43 = vpop.f32.mrf.mxu0  ;;  %v3026_v60 = vunpack.c.h.s8.bf16 %v2934_v18  ;;  %v2933_v10 = vld [vmem:[#allocation11 + $0x2c0] sm:$0xff] }
 0x6bc   :  { %2721 = vmatprep.subr.bf16.mxu0 %v2673_v17  ;;  %v2582_v28 = vpop.f32.mrf.mxu0  ;;  %v3025_v17 = vunpack.c.h.s8.bf16 %v2933_v10 }
 0x6bd   :  { %2722 = vmatpush1.bf16.msra.mxu0 %v2672_v26 }
 0x6be   :  { %2723 = vmatprep.subr.bf16.mxu0 %v2669_v30  ;;  %v2584_v30 = vpop.f32.mrf.mxu0 }
 0x6c1   :  { %2724 = vmatpush1.bf16.msra.mxu0 %v2668_v54  ;;  %v2929_v54 = vld [vmem:[#allocation11 + $0x2a0] sm:$0xff] }
 0x6c2   :  { %3101 = vmatprep.subr.bf16.mxu0 %v3002_v8  ;;  %v3021_v8 = vunpack.c.l.s8.bf16 %v2933_v10  ;;  %v2954_v10 = vld [vmem:[#allocation11 + $0x368] sm:$0xff] }
 0x6c4   :  { %5287 = vmatmul.mubr.msk.bf16.vlgmr.msra.gmra.mxu0 %vm2696_vm1, %v6386_v31 }
 0x6c5   :  { %3102 = vmatpush1.bf16.msra.mxu0 %v3001_v49  ;;  %2751 = vmatprep.mubr.bf16.mxu0 %v7069_v46 }
 0x6c6   :  { %3103 = vmatprep.subr.bf16.mxu0 %v2998_v40  ;;  %v2586_v40 = vpop.f32.mrf.mxu0 }
 0x6c9   :  { %3104 = vmatpush1.bf16.msra.mxu0 %v2997_v34  ;;  %v3017_v34 = vunpack.c.h.s8.bf16 %v2929_v54 }
 0x6ca   :  { %3105 = vmatprep.subr.bf16.mxu0 %v2994_v7  ;;  %v3014_v7 = vunpack.c.l.s8.bf16 %v2930_v3  ;;  %v2923_v3 = vld [vmem:[#allocation11 + $0x270] sm:$0xff] }
 0x6cc   :  { %5288 = vmatmul.mubr.msk.bf16.gmra.mxu0 %vm2696_vm1, %v6391_v44 }
 0x6cd   :  { %3106 = vmatpush1.bf16.msra.mxu0 %v2993_v45  ;;  %2761 = vmatprep.mubr.bf16.mxu0 %v7069_v46  ;;  %v2926_v45 = vld [vmem:[#allocation11 + $0x288] sm:$0xff] }
 0x6ce   :  { %3107 = vmatprep.subr.bf16.mxu0 %v2990_v57 }
 0x6d1   :  { %3108 = vmatpush1.bf16.msra.mxu0 %v2989_v11 }
 0x6d2   :  { %3109 = vmatprep.subr.bf16.mxu0 %v2986_v36  ;;  %v2588_v36 = vpop.f32.mrf.mxu0 }
 0x6d4   :  { %5289 = vmatmul.mubr.msk.bf16.gmra.mxu0 %vm2696_vm1, %v6396_v15 }
 0x6d5   :  { %3110 = vmatpush1.bf16.msra.mxu0 %v2985_v4  ;;  %2771 = vmatprep.mubr.bf16.mxu0 %v7069_v46 }
 0x6d6   :  { %3111 = vmatprep.subr.bf16.mxu0 %v2982_v59  ;;  %v3013_v59 = vunpack.c.l.s8.bf16 %v2929_v54  ;;  %v2950_v54 = vld [vmem:[#allocation11 + $0x348] sm:$0xff] }
 0x6d9   :  { %3112 = vmatpush1.bf16.msra.mxu0 %v2981_v53 }
 0x6da   :  { %3113 = vmatprep.subr.bf16.mxu0 %v2978_v37  ;;  %v3010_v37 = vunpack.c.h.s8.bf16 %v2926_v45 }
 0x6dc   :  { %5290 = vmatmul.mubr.msk.bf16.gmra.mxu0 %vm2696_vm1, %v6401_v55 }
 0x6dd   :  { %3114 = vmatpush1.bf16.msra.mxu0 %v2977_v13  ;;  %3133 = vmatprep.mubr.bf16.mxu0 %v6336_v63 }
 0x6de   :  { %3115 = vmatprep.subr.bf16.mxu0 %v2974_v24 }
 0x6e1   :  { %3116 = vmatpush1.bf16.msra.mxu0 %v2973_v16 }
 0x6e2   :  { %3117 = vmatprep.subr.bf16.mxu0 %v3034_v14 }
 0x6e5   :  { %3118 = vmatpush2.bf16.msra.mxu0 %v3033_v21 }
 0x6e6   :  { %3119 = vmatprep.subr.bf16.mxu0 %v3030_v9  ;;  %v3009_v9 = vunpack.c.h.s8.bf16 %v2925_v50 }
 0x6e7   :  { %v2625_v27 = vpop.f32.mrf.mxu1 }
 0x6e8   :  { %v2626_v19 = vadd.f32 %v2625_v27, %v6403_v22  ;;  %v3066_v22 = vunpack.c.h.s8.bf16 %v2954_v10  ;;  %v2953_v27 = vld [vmem:[#allocation11 + $0x360] sm:$0xff] }
 0x6e9   :  { %v2627_v29 = vpop.f32.mrf.mxu1  ;;  %3120 = vmatpush2.bf16.msra.mxu0 %v3029_v25  ;;  %v3006_v25 = vunpack.c.l.s8.bf16 %v2926_v45  ;;  %v2919_v45 = vld [vmem:[#allocation11 + $0x250] sm:$0xff] }
 0x6ea   :  { %3121 = vmatprep.subr.bf16.mxu0 %v3026_v60  ;;  %v2628_v32 = vadd.f32 %v2627_v29, %v2574_v12 }
 0x6eb   :  { %v2629_v26 = vpop.f32.mrf.mxu1 }
 0x6ec   :  { %v2630_v13 = vadd.f32 %v2629_v26, %v2576_v20  ;;  %v2647_v18 = vmul.f32 0.000656137, %v2628_v32  ;;  %v2646_v20 = vmul.f32 0.000656137, %v2626_v19 }
 0x6ed   :  { %v2631_v33 = vpop.f32.mrf.mxu1  ;;  %3122 = vmatpush2.bf16.msra.mxu0 %v3025_v17  ;;  %v3005_v17 = vunpack.c.l.s8.bf16 %v2925_v50  ;;  %v2915_v50 = vld [vmem:[#allocation11 + $0x230] sm:$0xff] }
 0x6ee   :  { %3123 = vmatprep.subr.bf16.mxu0 %v3022_v2  ;;  %v2632_v57 = vadd.f32 %v2631_v33, %v2578_v43  ;;  %v2650_v60 = vmul.f32 0.000656137, %v2630_v13  ;;  %v3003_v33 = vunpack.c.h.s8.bf16 %v2923_v3 }
 0x6ef   :  { %v2635_v49 = vpop.f32.mrf.mxu1 }
 0x6f0   :  { %v2636_v1 = vadd.f32 %v2635_v49, %v2582_v28  ;;  %v2651_v23 = vmul.f32 0.000656137, %v2632_v57  ;;  %v2924_v28 = vld [vmem:[#allocation11 + $0x278] sm:$0xff]  ;;  %v2670_v26 = vpack.c.bf16 %v2650_v60, %v2646_v20 }
 0x6f1   :  { %v2637_v41 = vpop.f32.mrf.mxu1  ;;  %3124 = vmatpush2.bf16.msra.mxu0 %v3021_v8  ;;  %v3004_v2 = vunpack.c.h.s8.bf16 %v2924_v28  ;;  %v3062_v8 = vunpack.c.l.s8.bf16 %v2954_v10  ;;  %v2920_v49 = vld [vmem:[#allocation11 + $0x258] sm:$0xff] }
 0x6f2   :  { %3125 = vmatprep.subr.bf16.mxu0 %v3018_v35  ;;  %v2638_v48 = vadd.f32 %v2637_v41, %v2584_v30  ;;  %v2654_v21 = vmul.f32 0.000656137, %v2636_v1  ;;  %v2671_v29 = vpack.c.bf16 %v2651_v23, %v2647_v18  ;;  %v3065_v30 = vunpack.c.h.s8.bf16 %v2953_v27  ;;  %v2916_v1 = vld [vmem:[#allocation11 + $0x238] sm:$0xff]  ;;  %v2941_v18 = vld [vmem:[#allocation11 + $0x300] sm:$0xff] }
 0x6f3   :  { %v2639_v42 = vpop.f32.mrf.mxu1  ;;  %v3000_v35 = vunpack.c.l.s8.bf16 %v2924_v28  ;;  %v2999_v41 = vunpack.c.l.s8.bf16 %v2923_v3  ;;  %v2984_v23 = vunpack.c.l.s8.bf16 %v2916_v1  ;;  %v3041_v60 = vunpack.c.h.s8.bf16 %v2941_v18  ;;  %v2970_v28 = vld [vmem:[#allocation11 + $0x3e8] sm:$0xff] }
 0x6f4   :  { %v2640_v11 = vadd.f32 %v2639_v42, %v2586_v40  ;;  %v2655_v16 = vmul.f32 0.000656137, %v2638_v48  ;;  %v3061_v40 = vunpack.c.l.s8.bf16 %v2953_v27  ;;  %v2996_v42 = vunpack.c.h.s8.bf16 %v2920_v49  ;;  %v2969_v27 = vld [vmem:[#allocation11 + $0x3e0] sm:$0xff] }
 0x6f5   :  { %v2641_v4 = vpop.f32.mrf.mxu1  ;;  %3126 = vmatpush2.bf16.msra.mxu0 %v3017_v34  ;;  %v3058_v34 = vunpack.c.h.s8.bf16 %v2950_v54  ;;  %v3054_v48 = vunpack.c.l.s8.bf16 %v2950_v54  ;;  %v3037_v20 = vunpack.c.l.s8.bf16 %v2941_v18  ;;  %v3097_v3 = vunpack.c.h.s8.bf16 %v2969_v27  ;;  %v2927_v18 = vld [vmem:[#allocation11 + $0x290] sm:$0xff] }
 0x6f6   :  { %v2642_v53 = vadd.f32 %v2641_v4, %v2588_v36  ;;  %3127 = vmatprep.subr.bf16.mxu0 %v3014_v7  ;;  %v2658_v24 = vmul.f32 0.000656137, %v2640_v11  ;;  %v2949_v7 = vld [vmem:[#allocation11 + $0x340] sm:$0xff]  ;;  %v2992_v11 = vunpack.c.l.s8.bf16 %v2920_v49  ;;  %v2946_v36 = vld [vmem:[#allocation11 + $0x328] sm:$0xff]  ;;  %v3093_v54 = vunpack.c.l.s8.bf16 %v2969_v27  ;;  %v2952_v27 = vld [vmem:[#allocation11 + $0x358] sm:$0xff] }
 0x6f7   :  { %v3057_v57 = vunpack.c.h.s8.bf16 %v2949_v7  ;;  %v3053_v4 = vunpack.c.l.s8.bf16 %v2949_v7  ;;  %v3050_v32 = vunpack.c.h.s8.bf16 %v2946_v36  ;;  %v2935_v7 = vld [vmem:[#allocation11 + $0x2d0] sm:$0xff] }
 0x6f8   :  { %v2659_v14 = vmul.f32 0.000656137, %v2642_v53  ;;  %v2674_v12 = vpack.c.bf16 %v2658_v24, %v2654_v21  ;;  %v2945_v53 = vld [vmem:[#allocation11 + $0x320] sm:$0xff]  ;;  %v3046_v24 = vunpack.c.l.s8.bf16 %v2946_v36  ;;  %v2983_v21 = vunpack.c.l.s8.bf16 %v2915_v50 }
 0x6f9   :  { %3128 = vmatpush2.bf16.msra.mxu0 %v3013_v59  ;;  %v2991_v59 = vunpack.c.l.s8.bf16 %v2919_v45  ;;  %v3049_v13 = vunpack.c.h.s8.bf16 %v2945_v53  ;;  %v3045_v19 = vunpack.c.l.s8.bf16 %v2945_v53  ;;  %v2931_v53 = vld [vmem:[#allocation11 + $0x2b0] sm:$0xff] }
 0x6fa   :  { %v2675_v43 = vpack.c.bf16 %v2659_v14, %v2655_v16  ;;  %3129 = vmatprep.subr.bf16.mxu0 %v3010_v37  ;;  %v2988_v37 = vunpack.c.h.s8.bf16 %v2916_v1  ;;  %v2942_v16 = vld [vmem:[#allocation11 + $0x308] sm:$0xff]  ;;  %v2912_v14 = vld [vmem:[#allocation11 + $0x218] sm:$0xff]  ;;  %v3023_v1 = vunpack.c.l.s8.bf16 %v2935_v7 }
 0x6fb   :  { %v3038_v10 = vunpack.c.l.s8.bf16 %v2942_v16 }
 0x6fc   :  { %2794 = vmatprep.subr.bf16.mxu1 %v2675_v43  ;;  %v2980_v43 = vunpack.c.h.s8.bf16 %v2912_v14 }
 0x6fd   :  { %2795 = vmatpush1.bf16.msra.mxu1 %v2674_v12  ;;  %3130 = vmatpush2.bf16.msra.mxu0 %v3009_v9  ;;  %v3042_v9 = vunpack.c.h.s8.bf16 %v2942_v16 }
 0x6fe   :  { %2796 = vmatprep.subr.bf16.mxu1 %v2671_v29  ;;  %3131 = vmatprep.subr.bf16.mxu0 %v3006_v25  ;;  %v2911_v25 = vld [vmem:[#allocation11 + $0x210] sm:$0xff]  ;;  %v2940_v29 = vld [vmem:[#allocation11 + $0x2f8] sm:$0xff] }
 0x6ff   :  { %v2979_v12 = vunpack.c.h.s8.bf16 %v2911_v25 }
 0x701   :  { %2797 = vmatpush1.bf16.msra.mxu1 %v2670_v26  ;;  %3132 = vmatpush2.bf16.msra.mxu0 %v3005_v17  ;;  %v2975_v17 = vunpack.c.l.s8.bf16 %v2911_v25  ;;  %v2939_v26 = vld [vmem:[#allocation11 + $0x2f0] sm:$0xff]  ;;  %v3011_v25 = vunpack.c.h.s8.bf16 %v2927_v18 }
 0x702   :  { %3154 = vmatprep.subr.bf16.mxu1 %v3066_v22  ;;  %3207 = vmatprep.subr.bf16.mxu0 %v3004_v2  ;;  %v3098_v22 = vunpack.c.h.s8.bf16 %v2970_v28  ;;  %v3036_v2 = vunpack.c.h.s8.bf16 %v2940_v29  ;;  %v3031_v49 = vunpack.c.l.s8.bf16 %v2939_v26 }
 0x704   :  { %5291 = vmatmul.mubr.msk.bf16.vlgmr.msra.gmra.mxu1 %vm2696_vm1, %v6386_v31  ;;  %3134 = vmatmul.mubr.bf16.vlgmr.msra.gmra.mxu0 %v6332_v52  ;;  %v2995_v31 = vunpack.c.h.s8.bf16 %v2919_v45  ;;  %v3027_v45 = vunpack.c.h.s8.bf16 %v2935_v7 }
 0x705   :  { %3155 = vmatpush1.bf16.msra.mxu1 %v3065_v30  ;;  %3143 = vmatprep.mubr.bf16.mxu0 %v6347_v0  ;;  %v3035_v30 = vunpack.c.h.s8.bf16 %v2939_v26  ;;  %v3060_v26 = vunpack.c.h.s8.bf16 %v2952_v27 }
 0x706   :  { %3208 = vmatpush1.bf16.msra.mxu0 %v3003_v33  ;;  %3156 = vmatprep.subr.bf16.mxu1 %v3062_v8  ;;  %v3094_v33 = vunpack.c.l.s8.bf16 %v2970_v28  ;;  %v2966_v8 = vld [vmem:[#allocation11 + $0x3c8] sm:$0xff]  ;;  %v3007_v28 = vunpack.c.l.s8.bf16 %v2927_v18 }
 0x707   :  { %3209 = vmatprep.subr.bf16.mxu0 %v3000_v35  ;;  %2824 = vmatprep.mubr.bf16.mxu1 %v7069_v46  ;;  %v2936_v35 = vld [vmem:[#allocation11 + $0x2d8] sm:$0xff] }
 0x709   :  { %3157 = vmatpush1.bf16.msra.mxu1 %v3061_v40  ;;  %v3090_v40 = vunpack.c.h.s8.bf16 %v2966_v8 }
 0x70a   :  { %3210 = vmatpush1.bf16.msra.mxu0 %v2999_v41  ;;  %3158 = vmatprep.subr.bf16.mxu1 %v3058_v34  ;;  %v2965_v41 = vld [vmem:[#allocation11 + $0x3c0] sm:$0xff]  ;;  %v3028_v34 = vunpack.c.h.s8.bf16 %v2936_v35 }
 0x70b   :  { %3211 = vmatprep.subr.bf16.mxu0 %v2996_v42  ;;  %v3089_v42 = vunpack.c.h.s8.bf16 %v2965_v41  ;;  %v3085_v36 = vunpack.c.l.s8.bf16 %v2965_v41  ;;  %v2944_v41 = vld [vmem:[#allocation11 + $0x318] sm:$0xff] }
 0x70c   :  { %5292 = vmatmul.mubr.msk.bf16.gmra.mxu1 %vm2696_vm1, %v6391_v44  ;;  %3144 = vmatmul.mubr.bf16.gmra.mxu0 %v6345_v51  ;;  %v2987_v44 = vunpack.c.h.s8.bf16 %v2915_v50  ;;  %v3019_v50 = vunpack.c.h.s8.bf16 %v2931_v53  ;;  %v3044_v7 = vunpack.c.h.s8.bf16 %v2944_v41 }
 0x70d   :  { %3159 = vmatpush1.bf16.msra.mxu1 %v3057_v57  ;;  %3239 = vmatprep.mubr.bf16.mxu0 %v6336_v63  ;;  %v3086_v57 = vunpack.c.l.s8.bf16 %v2966_v8 }
 0x70e   :  { %3212 = vmatpush1.bf16.msra.mxu0 %v2995_v31  ;;  %3160 = vmatprep.subr.bf16.mxu1 %v3054_v48  ;;  %v3024_v31 = vunpack.c.l.s8.bf16 %v2936_v35  ;;  %v2962_v48 = vld [vmem:[#allocation11 + $0x3a8] sm:$0xff] }
 0x70f   :  { %3213 = vmatprep.subr.bf16.mxu0 %v2992_v11  ;;  %2834 = vmatprep.mubr.bf16.mxu1 %v7069_v46  ;;  %v2932_v11 = vld [vmem:[#allocation11 + $0x2b8] sm:$0xff] }
 0x711   :  { %3161 = vmatpush1.bf16.msra.mxu1 %v3053_v4  ;;  %v3082_v4 = vunpack.c.h.s8.bf16 %v2962_v48 }
 0x712   :  { %3214 = vmatpush1.bf16.msra.mxu0 %v2991_v59  ;;  %3162 = vmatprep.subr.bf16.mxu1 %v3050_v32  ;;  %v2961_v59 = vld [vmem:[#allocation11 + $0x3a0] sm:$0xff]  ;;  %v3020_v32 = vunpack.c.h.s8.bf16 %v2932_v11 }
 0x713   :  { %3215 = vmatprep.subr.bf16.mxu0 %v2988_v37  ;;  %v3081_v37 = vunpack.c.h.s8.bf16 %v2961_v59  ;;  %v3077_v16 = vunpack.c.l.s8.bf16 %v2961_v59  ;;  %v2968_v59 = vld [vmem:[#allocation11 + $0x3d8] sm:$0xff] }
 0x714   :  { %5293 = vmatmul.mubr.msk.bf16.gmra.mxu1 %vm2696_vm1, %v6396_v15  ;;  %v2976_v15 = vunpack.c.l.s8.bf16 %v2912_v14  ;;  %v3015_v14 = vunpack.c.l.s8.bf16 %v2931_v53  ;;  %v3092_v53 = vunpack.c.h.s8.bf16 %v2968_v59 }
 0x715   :  { %3163 = vmatpush1.bf16.msra.mxu1 %v3049_v13  ;;  %2844 = vmatprep.mubr.bf16.mxu1 %v7069_v46  ;;  %v3078_v13 = vunpack.c.l.s8.bf16 %v2962_v48 }
 0x716   :  { %3216 = vmatpush1.bf16.msra.mxu0 %v2987_v44  ;;  %3164 = vmatprep.subr.bf16.mxu1 %v3046_v24  ;;  %v3016_v44 = vunpack.c.l.s8.bf16 %v2932_v11  ;;  %v2958_v24 = vld [vmem:[#allocation11 + $0x388] sm:$0xff] }
 0x717   :  { %3217 = vmatprep.subr.bf16.mxu0 %v2984_v23  ;;  %v2928_v23 = vld [vmem:[#allocation11 + $0x298] sm:$0xff] }
 0x719   :  { %3165 = vmatpush1.bf16.msra.mxu1 %v3045_v19  ;;  %v3074_v19 = vunpack.c.h.s8.bf16 %v2958_v24 }
 0x71a   :  { %3218 = vmatpush1.bf16.msra.mxu0 %v2983_v21  ;;  %3166 = vmatprep.subr.bf16.mxu1 %v3042_v9  ;;  %v2957_v21 = vld [vmem:[#allocation11 + $0x380] sm:$0xff]  ;;  %v3012_v9 = vunpack.c.h.s8.bf16 %v2928_v23 }
 0x71b   :  { %3219 = vmatprep.subr.bf16.mxu0 %v2980_v43  ;;  %v3073_v43 = vunpack.c.h.s8.bf16 %v2957_v21 }
 0x71c   :  { %5294 = vmatmul.mubr.msk.bf16.gmra.mxu1 %vm2696_vm1, %v6401_v55  ;;  %v3032_v55 = vunpack.c.l.s8.bf16 %v2940_v29 }
 0x71d   :  { %3167 = vmatpush1.bf16.msra.mxu1 %v3041_v60  ;;  %3186 = vmatprep.mubr.bf16.mxu1 %v6362_v6  ;;  %v3070_v60 = vunpack.c.l.s8.bf16 %v2958_v24 }
 0x71e   :  { %3220 = vmatpush1.bf16.msra.mxu0 %v2979_v12  ;;  %3168 = vmatprep.subr.bf16.mxu1 %v3038_v10  ;;  %v3008_v12 = vunpack.c.l.s8.bf16 %v2928_v23  ;;  %v2956_v10 = vld [vmem:[#allocation11 + $0x378] sm:$0xff] }
 0x71f   :  { %3221 = vmatprep.subr.bf16.mxu0 %v2976_v15  ;;  %v3069_v15 = vunpack.c.l.s8.bf16 %v2957_v21  ;;  %v3068_v29 = vunpack.c.h.s8.bf16 %v2956_v10  ;;  %v2960_v21 = vld [vmem:[#allocation11 + $0x398] sm:$0xff] }
 0x720   :  { %v3076_v18 = vunpack.c.h.s8.bf16 %v2960_v21 }
 0x721   :  { %3169 = vmatpush1.bf16.msra.mxu1 %v3037_v20  ;;  %v2955_v20 = vld [vmem:[#allocation11 + $0x370] sm:$0xff] }
 0x722   :  { %3222 = vmatpush1.bf16.msra.mxu0 %v2975_v17  ;;  %3170 = vmatprep.subr.bf16.mxu1 %v3098_v22  ;;  %v3067_v17 = vunpack.c.h.s8.bf16 %v2955_v20  ;;  %v3064_v22 = vunpack.c.l.s8.bf16 %v2956_v10  ;;  %v6436_v10 = vld [vmem:[%s7062_s8] sm:$0xf] }
 0x723   :  { %3223 = vmatprep.subr.bf16.mxu0 %v3036_v2  ;;  %v3063_v2 = vunpack.c.l.s8.bf16 %v2955_v20 }
 0x725   :  { %3171 = vmatpush2.bf16.msra.mxu1 %v3097_v3  ;;  %v2951_v3 = vld [vmem:[#allocation11 + $0x350] sm:$0xff] }
 0x726   :  { %3224 = vmatpush2.bf16.msra.mxu0 %v3035_v30  ;;  %3172 = vmatprep.subr.bf16.mxu1 %v3094_v33  ;;  %v3059_v30 = vunpack.c.h.s8.bf16 %v2951_v3  ;;  %v3056_v33 = vunpack.c.l.s8.bf16 %v2952_v27  ;;  %v3055_v8 = vunpack.c.l.s8.bf16 %v2951_v3 }
 0x727   :  { %3225 = vmatprep.subr.bf16.mxu0 %v3032_v55  ;;  %v2948_v55 = vld [vmem:[#allocation11 + $0x338] sm:$0xff] }
 0x728   :  { %v3052_v35 = vunpack.c.h.s8.bf16 %v2948_v55 }
 0x729   :  { %3173 = vmatpush2.bf16.msra.mxu1 %v3093_v54  ;;  %v2947_v54 = vld [vmem:[#allocation11 + $0x330] sm:$0xff] }
 0x72a   :  { %3226 = vmatpush2.bf16.msra.mxu0 %v3031_v49  ;;  %3174 = vmatprep.subr.bf16.mxu1 %v3090_v40  ;;  %v3051_v49 = vunpack.c.h.s8.bf16 %v2947_v54  ;;  %v3048_v40 = vunpack.c.l.s8.bf16 %v2948_v55 }
 0x72b   :  { %3227 = vmatprep.subr.bf16.mxu0 %v3028_v34  ;;  %v3047_v34 = vunpack.c.l.s8.bf16 %v2947_v54 }
 0x72d   :  { %3175 = vmatpush2.bf16.msra.mxu1 %v3089_v42  ;;  %v2943_v42 = vld [vmem:[#allocation11 + $0x310] sm:$0xff] }
 0x72e   :  { %3228 = vmatpush2.bf16.msra.mxu0 %v3027_v45  ;;  %3176 = vmatprep.subr.bf16.mxu1 %v3086_v57  ;;  %v3043_v45 = vunpack.c.h.s8.bf16 %v2943_v42  ;;  %v3040_v57 = vunpack.c.l.s8.bf16 %v2944_v41  ;;  %v3039_v48 = vunpack.c.l.s8.bf16 %v2943_v42  ;;  %v6482_v41 = vrot.slane %v6436_v10, %v1153_v61 }
 0x72f   :  { %3229 = vmatprep.subr.bf16.mxu0 %v3024_v31  ;;  %v2972_v31 = vld [vmem:[#allocation11 + $0x3f8] sm:$0xff] }
 0x730   :  { %v3100_v11 = vunpack.c.h.s8.bf16 %v2972_v31  ;;  %7076 = vst [vmem:[#allocation21_spill] sm:$0xff] %v6482_v41 }
 0x731   :  { %3177 = vmatpush2.bf16.msra.mxu1 %v3085_v36  ;;  %v2971_v36 = vld [vmem:[#allocation11 + $0x3f0] sm:$0xff] }
 0x732   :  { %3230 = vmatpush2.bf16.msra.mxu0 %v3023_v1  ;;  %3178 = vmatprep.subr.bf16.mxu1 %v3082_v4  ;;  %v3099_v1 = vunpack.c.h.s8.bf16 %v2971_v36  ;;  %v3096_v4 = vunpack.c.l.s8.bf16 %v2972_v31 }
 0x733   :  { %3231 = vmatprep.subr.bf16.mxu0 %v3020_v32  ;;  %v3095_v32 = vunpack.c.l.s8.bf16 %v2971_v36 }
 0x735   :  { %3179 = vmatpush2.bf16.msra.mxu1 %v3081_v37  ;;  %v2967_v37 = vld [vmem:[#allocation11 + $0x3d0] sm:$0xff] }
 0x736   :  { %3232 = vmatpush2.bf16.msra.mxu0 %v3019_v50  ;;  %3180 = vmatprep.subr.bf16.mxu1 %v3078_v13  ;;  %v3091_v50 = vunpack.c.h.s8.bf16 %v2967_v37  ;;  %v3088_v13 = vunpack.c.l.s8.bf16 %v2968_v59  ;;  %v3087_v24 = vunpack.c.l.s8.bf16 %v2967_v37 }
 0x737   :  { %3233 = vmatprep.subr.bf16.mxu0 %v3016_v44  ;;  %v2964_v44 = vld [vmem:[#allocation11 + $0x3b8] sm:$0xff] }
 0x738   :  { %v3084_v23 = vunpack.c.h.s8.bf16 %v2964_v44 }
 0x739   :  { %3181 = vmatpush2.bf16.msra.mxu1 %v3077_v16  ;;  %v2963_v16 = vld [vmem:[#allocation11 + $0x3b0] sm:$0xff] }
 0x73a   :  { %3234 = vmatpush2.bf16.msra.mxu0 %v3015_v14  ;;  %3182 = vmatprep.subr.bf16.mxu1 %v3074_v19  ;;  %v3083_v14 = vunpack.c.h.s8.bf16 %v2963_v16  ;;  %v3080_v19 = vunpack.c.l.s8.bf16 %v2964_v44 }
 0x73b   :  { %3235 = vmatprep.subr.bf16.mxu0 %v3012_v9  ;;  %v3079_v9 = vunpack.c.l.s8.bf16 %v2963_v16 }
 0x73d   :  { %3183 = vmatpush2.bf16.msra.mxu1 %v3073_v43  ;;  %v2959_v43 = vld [vmem:[#allocation11 + $0x390] sm:$0xff] }
 0x73e   :  { %3236 = vmatpush2.bf16.msra.mxu0 %v3011_v25  ;;  %3184 = vmatprep.subr.bf16.mxu1 %v3070_v60  ;;  %v3075_v25 = vunpack.c.h.s8.bf16 %v2959_v43  ;;  %v3072_v60 = vunpack.c.l.s8.bf16 %v2960_v21 }
 0x73f   :  { %3237 = vmatprep.subr.bf16.mxu0 %v3008_v12  ;;  %v3071_v12 = vunpack.c.l.s8.bf16 %v2959_v43 }
 0x741   :  { %3185 = vmatpush2.bf16.msra.mxu1 %v3069_v15  ;;  %v6441_v15 = vrot.slane %v6436_v10, %v1145_v62 }
 0x742   :  { %3238 = vmatpush2.bf16.msra.mxu0 %v3007_v28  ;;  %3260 = vmatprep.subr.bf16.mxu1 %v3068_v29 }
 0x744   :  { %3187 = vmatmul.mubr.bf16.vlgmr.msra.gmra.mxu1 %v6358_v39 }
 0x745   :  { %3196 = vmatprep.mubr.bf16.mxu1 %v6375_v5  ;;  %3240 = vmatmul.mubr.bf16.vlgmr.msra.gmra.mxu0 %v6332_v52 }
 0x746   :  { %3261 = vmatpush1.bf16.msra.mxu1 %v3067_v17  ;;  %3249 = vmatprep.mubr.bf16.mxu0 %v6347_v0 }
 0x747   :  { %3262 = vmatprep.subr.bf16.mxu1 %v3064_v22 }
 0x74a   :  { %3263 = vmatpush1.bf16.msra.mxu1 %v3063_v2 }
 0x74b   :  { %3264 = vmatprep.subr.bf16.mxu1 %v3060_v26 }
 0x74c   :  { %3197 = vmatmul.mubr.bf16.gmra.mxu1 %v6373_v38 }
 0x74d   :  { %3250 = vmatmul.mubr.bf16.gmra.mxu0 %v6345_v51  ;;  %3292 = vmatprep.mubr.bf16.mxu1 %v6362_v6 }
 0x74e   :  { %3265 = vmatpush1.bf16.msra.mxu1 %v3059_v30  ;;  %3410 = vmatprep.mubr.bf16.mxu0 %v7069_v46 }
 0x74f   :  { %3266 = vmatprep.subr.bf16.mxu1 %v3056_v33 }
 0x752   :  { %3267 = vmatpush1.bf16.msra.mxu1 %v3055_v8 }
 0x753   :  { %3268 = vmatprep.subr.bf16.mxu1 %v3052_v35 }
 0x756   :  { %3269 = vmatpush1.bf16.msra.mxu1 %v3051_v49 }
 0x757   :  { %3270 = vmatprep.subr.bf16.mxu1 %v3048_v40 }
 0x75a   :  { %3271 = vmatpush1.bf16.msra.mxu1 %v3047_v34 }
 0x75b   :  { %3272 = vmatprep.subr.bf16.mxu1 %v3044_v7 }
 0x75e   :  { %3273 = vmatpush1.bf16.msra.mxu1 %v3043_v45 }
 0x75f   :  { %3274 = vmatprep.subr.bf16.mxu1 %v3040_v57 }
 0x762   :  { %3275 = vmatpush1.bf16.msra.mxu1 %v3039_v48 }
 0x763   :  { %3276 = vmatprep.subr.bf16.mxu1 %v3100_v11 }
 0x766   :  { %3277 = vmatpush2.bf16.msra.mxu1 %v3099_v1 }
 0x767   :  { %3278 = vmatprep.subr.bf16.mxu1 %v3096_v4 }
 0x76a   :  { %3279 = vmatpush2.bf16.msra.mxu1 %v3095_v32 }
 0x76b   :  { %3280 = vmatprep.subr.bf16.mxu1 %v3092_v53 }
 0x76e   :  { %3281 = vmatpush2.bf16.msra.mxu1 %v3091_v50 }
 0x76f   :  { %3282 = vmatprep.subr.bf16.mxu1 %v3088_v13 }
 0x772   :  { %3283 = vmatpush2.bf16.msra.mxu1 %v3087_v24 }
 0x773   :  { %3284 = vmatprep.subr.bf16.mxu1 %v3084_v23 }
 0x776   :  { %3285 = vmatpush2.bf16.msra.mxu1 %v3083_v14 }
 0x777   :  { %3286 = vmatprep.subr.bf16.mxu1 %v3080_v19 }
 0x77a   :  { %3287 = vmatpush2.bf16.msra.mxu1 %v3079_v9 }
 0x77b   :  { %3288 = vmatprep.subr.bf16.mxu1 %v3076_v18 }
 0x77e   :  { %3289 = vmatpush2.bf16.msra.mxu1 %v3075_v25 }
 0x77f   :  { %3290 = vmatprep.subr.bf16.mxu1 %v3072_v60 }
 0x782   :  { %3291 = vmatpush2.bf16.msra.mxu1 %v3071_v12 }
 0x784   :  { %v6443_v28 = vpop.f32.mrf.mxu0 }
 0x785   :  { %3293 = vmatmul.mubr.bf16.vlgmr.msra.gmra.mxu1 %v6358_v39 }
 0x786   :  { %3302 = vmatprep.mubr.bf16.mxu1 %v6375_v5  ;;  %v2745_v29 = vpop.f32.mrf.mxu0 }
 0x787   :  { %v6448_v20 = vadd.f32 %v6441_v15, %v2745_v29 }
 0x788   :  { %v6450_v17 = vpop.f32.mrf.mxu0 }
 0x78a   :  { %v6452_v22 = vpop.f32.mrf.mxu0 }
 0x78c   :  { %v6454_v27 = vpop.f32.mrf.mxu0 }
 0x78d   :  { %3303 = vmatmul.mubr.bf16.gmra.mxu1 %v6373_v38 }
 0x78e   :  { %v2755_v62 = vpop.f32.mrf.mxu0  ;;  %3483 = vmatprep.mubr.bf16.mxu1 %v7069_v46 }
 0x78f   :  { %v6459_v2 = vadd.f32 %v6441_v15, %v2755_v62 }
 0x790   :  { %v6461_v26 = vpop.f32.mrf.mxu0 }
 0x792   :  { %v6463_v3 = vpop.f32.mrf.mxu0 }
 0x794   :  { %v6465_v30 = vpop.f32.mrf.mxu0 }
 0x796   :  { %v2765_v33 = vpop.f32.mrf.mxu0 }
 0x797   :  { %v6468_v55 = vadd.f32 %v6441_v15, %v2765_v33 }
 0x798   :  { %v6470_v8 = vpop.f32.mrf.mxu0 }
 0x79a   :  { %v6472_v35 = vpop.f32.mrf.mxu0 }
 0x79c   :  { %v6474_v54 = vpop.f32.mrf.mxu0 }
 0x79e   :  { %v2775_v49 = vpop.f32.mrf.mxu0 }
 0x79f   :  { %v6477_v40 = vadd.f32 %v6441_v15, %v2775_v49 }
 0x7a0   :  { %v6516_v44 = vpop.f32.mrf.mxu0 }
 0x7a1   :  { %7075 = vst [vmem:[#allocation20_spill] sm:$0xff] %v6477_v40  ;;  %7091 = vst [vmem:[#allocation36_spill] sm:$0xff] %v6516_v44 }
 0x7a2   :  { %v6518_v24 = vpop.f32.mrf.mxu0 }
 0x7a3   :  { %7092 = vst [vmem:[#allocation37_spill] sm:$0xff] %v6518_v24 }
 0x7c4   :  { %v6484_v34 = vpop.f32.mrf.mxu1  ;;  %v3135_v23 = vpop.f32.mrf.mxu0 }
 0x7c5   :  { %7077 = vst [vmem:[#allocation22_spill] sm:$0xff] %v6484_v34 }
 0x7c6   :  { %v2818_v7 = vpop.f32.mrf.mxu1  ;;  %v3137_v16 = vpop.f32.mrf.mxu0 }
 0x7c7   :  { %v6487_v42 = vadd.f32 %v6482_v41, %v2818_v7 }
 0x7c8   :  { %v6489_v45 = vpop.f32.mrf.mxu1  ;;  %v3139_v14 = vpop.f32.mrf.mxu0 }
 0x7c9   :  { %7078 = vst [vmem:[#allocation23_spill] sm:$0xff] %v6487_v42  ;;  %7079 = vst [vmem:[#allocation24_spill] sm:$0xff] %v6489_v45  ;;  %v3573_v42 = vld [vmem:[#allocation11 + $0x480] sm:$0xff] }
 0x7ca   :  { %v6491_v57 = vpop.f32.mrf.mxu1  ;;  %v3141_v21 = vpop.f32.mrf.mxu0  ;;  %v3657_v44 = vunpack.c.h.s8.bf16 %v3573_v42 }
 0x7cb   :  { %7080 = vst [vmem:[#allocation25_spill] sm:$0xff] %v6491_v57  ;;  %v3570_v57 = vld [vmem:[#allocation11 + $0x468] sm:$0xff] }
 0x7cc   :  { %v6493_v31 = vpop.f32.mrf.mxu1  ;;  %v3145_v43 = vpop.f32.mrf.mxu0 }
 0x7cd   :  { %7081 = vst [vmem:[#allocation26_spill] sm:$0xff] %v6493_v31 }
 0x7ce   :  { %v2828_v48 = vpop.f32.mrf.mxu1  ;;  %v3147_v12 = vpop.f32.mrf.mxu0 }
 0x7cf   :  { %v6496_v11 = vadd.f32 %v6482_v41, %v2828_v48 }
 0x7d0   :  { %v6498_v36 = vpop.f32.mrf.mxu1  ;;  %v3149_v33 = vpop.f32.mrf.mxu0 }
 0x7d1   :  { %7082 = vst [vmem:[#allocation27_spill] sm:$0xff] %v6496_v11  ;;  %7083 = vst [vmem:[#allocation28_spill] sm:$0xff] %v6498_v36 }
 0x7d2   :  { %v6500_v61 = vpop.f32.mrf.mxu1  ;;  %v3151_v47 = vpop.f32.mrf.mxu0 }
 0x7d3   :  { %7084 = vst [vmem:[#allocation29_spill] sm:$0xff] %v6500_v61 }
 0x7d4   :  { %v6502_v1 = vpop.f32.mrf.mxu1 }
 0x7d5   :  { %7085 = vst [vmem:[#allocation30_spill] sm:$0xff] %v6502_v1 }
 0x7d6   :  { %v2838_v4 = vpop.f32.mrf.mxu1 }
 0x7d7   :  { %v6505_v59 = vadd.f32 %v6482_v41, %v2838_v4 }
 0x7d8   :  { %v6507_v32 = vpop.f32.mrf.mxu1 }
 0x7d9   :  { %7086 = vst [vmem:[#allocation31_spill] sm:$0xff] %v6505_v59  ;;  %7087 = vst [vmem:[#allocation32_spill] sm:$0xff] %v6507_v32 }
 0x7da   :  { %v6509_v53 = vpop.f32.mrf.mxu1 }
 0x7db   :  { %7088 = vst [vmem:[#allocation33_spill] sm:$0xff] %v6509_v53 }
 0x7dc   :  { %v6511_v37 = vpop.f32.mrf.mxu1 }
 0x7dd   :  { %7089 = vst [vmem:[#allocation34_spill] sm:$0xff] %v6511_v37 }
 0x7de   :  { %v2848_v50 = vpop.f32.mrf.mxu1 }
 0x7df   :  { %v6514_v13 = vadd.f32 %v6482_v41, %v2848_v50 }
 0x7e0   :  { %v6520_v19 = vpop.f32.mrf.mxu1 }
 0x7e1   :  { %7090 = vst [vmem:[#allocation35_spill] sm:$0xff] %v6514_v13  ;;  %7093 = vst [vmem:[#allocation38_spill] sm:$0xff] %v6520_v19 }
 0x7e2   :  { %v6522_v9 = vpop.f32.mrf.mxu1 }
 0x7e3   :  { %7094 = vst [vmem:[#allocation39_spill] sm:$0xff] %v6522_v9 }
 0x804   :  { %v3188_v18 = vpop.f32.mrf.mxu1 }
 0x805   :  { %v3189_v1 = vadd.f32 %v3188_v18, %v3135_v23  ;;  %v3646_v23 = vunpack.c.l.s8.bf16 %v3570_v57  ;;  %v3558_v18 = vld [vmem:[#allocation11 + $0x408] sm:$0xff] }
 0x806   :  { %v3190_v25 = vpop.f32.mrf.mxu1 }
 0x807   :  { %v3191_v13 = vadd.f32 %v3190_v25, %v3137_v16  ;;  %v3569_v16 = vld [vmem:[#allocation11 + $0x460] sm:$0xff] }
 0x808   :  { %v3192_v60 = vpop.f32.mrf.mxu1 }
 0x809   :  { %v3193_v37 = vadd.f32 %v3192_v60, %v3139_v14  ;;  %v3314_v11 = vmul.f32 0.000656137, %v3191_v13  ;;  %v3649_v14 = vunpack.c.h.s8.bf16 %v3569_v16  ;;  %v6534_v13 = vld [vmem:[#allocation10 + $0x30] sm:$0xff]   ;;  %v3626_v60 = vunpack.c.h.s8.bf16 %v3558_v18 }
 0x80a   :  { %v3194_v29 = vpop.f32.mrf.mxu1 }
 0x80b   :  { %v3195_v48 = vadd.f32 %v3194_v29, %v3141_v21  ;;  %v3317_v31 = vmul.f32 0.000656137, %v3193_v37  ;;  %v3561_v37 = vld [vmem:[#allocation11 + $0x420] sm:$0xff] }
 0x80c   :  { %v3198_v62 = vpop.f32.mrf.mxu1  ;;  %v3629_v25 = vunpack.c.l.s8.bf16 %v3561_v37  ;;  %v3557_v29 = vld [vmem:[#allocation11 + $0x400] sm:$0xff] }
 0x80d   :  { %v3199_v58 = vadd.f32 %v3198_v62, %v3145_v43  ;;  %v3318_v53 = vmul.f32 0.000656137, %v3195_v48  ;;  %v3650_v43 = vunpack.c.h.s8.bf16 %v3570_v57  ;;  %v6539_v62 = vld [vmem:[#allocation10 + $0x38] sm:$0xff]   ;;  %v3586_v48 = vld [vmem:[#allocation11 + $0x4e8] sm:$0xff] }
 0x80e   :  { %v3200_v49 = vpop.f32.mrf.mxu1 }
 0x80f   :  { %v3201_v4 = vadd.f32 %v3200_v49, %v3147_v12  ;;  %v3321_v61 = vmul.f32 0.000656137, %v3199_v58  ;;  %v3339_v21 = vpack.c.bf16 %v3318_v53, %v3314_v11  ;;  %v3313_v12 = vmul.f32 0.000656137, %v3189_v1  ;;  %v3566_v58 = vld [vmem:[#allocation11 + $0x448] sm:$0xff]  ;;  %v3565_v11 = vld [vmem:[#allocation11 + $0x440] sm:$0xff]  ;;  %v6541_v49 = vpop.f32.mrf.mxu0 }
 0x810   :  { %v3202_v7 = vpop.f32.mrf.mxu1  ;;  %v6529_v1 = vld [vmem:[#allocation10 + $0x28] sm:$0xff]   ;;  %v3637_v57 = vunpack.c.l.s8.bf16 %v3565_v11 }
 0x811   :  { %v3203_v50 = vadd.f32 %v3202_v7, %v3149_v33  ;;  %v3322_v59 = vmul.f32 0.000656137, %v3201_v4  ;;  %v3625_v33 = vunpack.c.h.s8.bf16 %v3557_v29  ;;  %v3622_v7 = vunpack.c.l.s8.bf16 %v3558_v18 }
 0x812   :  { %v3204_v46 = vpop.f32.mrf.mxu1  ;;  %v3621_v4 = vunpack.c.l.s8.bf16 %v3557_v29 }
 0x813   :  { %v3205_v19 = vadd.f32 %v3204_v46, %v3151_v47  ;;  %v3325_v9 = vmul.f32 0.000656137, %v3203_v50  ;;  %v3338_v46 = vpack.c.bf16 %v3317_v31, %v3313_v12  ;;  %v6524_v47 = vld [vmem:[#allocation10 + $0x20] sm:$0xff]   ;;  %v3641_v31 = vunpack.c.h.s8.bf16 %v3565_v11  ;;  %v3243_v50 = vpop.f32.mrf.mxu0 }
 0x814   :  { %v3585_v12 = vld [vmem:[#allocation11 + $0x4e0] sm:$0xff] }
 0x815   :  { %v3326_v32 = vmul.f32 0.000656137, %v3205_v19  ;;  %v3342_v41 = vpack.c.bf16 %v3325_v9, %v3321_v61  ;;  %v3645_v61 = vunpack.c.l.s8.bf16 %v3569_v16  ;;  %v3633_v19 = vunpack.c.h.s8.bf16 %v3561_v37  ;;  %v3245_v16 = vpop.f32.mrf.mxu0 }
 0x817   :  { %v3343_v36 = vpack.c.bf16 %v3326_v32, %v3322_v59  ;;  %v3638_v59 = vunpack.c.l.s8.bf16 %v3566_v58  ;;  %v3562_v32 = vld [vmem:[#allocation11 + $0x428] sm:$0xff] }
 0x818   :  { %v3634_v53 = vunpack.c.h.s8.bf16 %v3562_v32  ;;  %v3630_v9 = vunpack.c.l.s8.bf16 %v3562_v32 }
 0x819   :  { %3390 = vmatprep.subr.bf16.mxu0 %v3343_v36  ;;  %v7095_v36 = vmov 0  }
 0x81a   :  { %3391 = vmatpush1.bf16.msra.mxu0 %v3342_v41  ;;  %v3642_v41 = vunpack.c.h.s8.bf16 %v3566_v58  ;;  %v3247_v58 = vpop.f32.mrf.mxu0 }
 0x81b   :  { %3392 = vmatprep.subr.bf16.mxu0 %v3339_v21  ;;  %v3682_v21 = vunpack.c.h.s8.bf16 %v3586_v48 }
 0x81e   :  { %3393 = vmatpush1.bf16.msra.mxu0 %v3338_v46  ;;  %v3678_v46 = vunpack.c.l.s8.bf16 %v3586_v48 }
 0x81f   :  { %3749 = vmatprep.subr.bf16.mxu0 %v3650_v43  ;;  %v3681_v43 = vunpack.c.h.s8.bf16 %v3585_v12 }
 0x821   :  { %5299 = vmatmul.mubr.msk.bf16.vlgmr.msra.gmra.mxu0 %vm2696_vm1, %v6524_v47 }
 0x822   :  { %3750 = vmatpush1.bf16.msra.mxu0 %v3649_v14  ;;  %3420 = vmatprep.mubr.bf16.mxu0 %v7095_v36  ;;  %v3582_v14 = vld [vmem:[#allocation11 + $0x4c8] sm:$0xff] }
 0x823   :  { %3751 = vmatprep.subr.bf16.mxu0 %v3646_v23  ;;  %v3677_v23 = vunpack.c.l.s8.bf16 %v3585_v12 }
 0x826   :  { %3752 = vmatpush1.bf16.msra.mxu0 %v3645_v61  ;;  %v3674_v61 = vunpack.c.h.s8.bf16 %v3582_v14 }
 0x827   :  { %3753 = vmatprep.subr.bf16.mxu0 %v3642_v41  ;;  %v3581_v41 = vld [vmem:[#allocation11 + $0x4c0] sm:$0xff] }
 0x829   :  { %5300 = vmatmul.mubr.msk.bf16.gmra.mxu0 %vm2696_vm1, %v6529_v1 }
 0x82a   :  { %3754 = vmatpush1.bf16.msra.mxu0 %v3641_v31  ;;  %3430 = vmatprep.mubr.bf16.mxu0 %v7095_v36  ;;  %v3673_v31 = vunpack.c.h.s8.bf16 %v3581_v41 }
 0x82b   :  { %3755 = vmatprep.subr.bf16.mxu0 %v3638_v59  ;;  %v3251_v59 = vpop.f32.mrf.mxu0 }
 0x82e   :  { %3756 = vmatpush1.bf16.msra.mxu0 %v3637_v57  ;;  %v3670_v57 = vunpack.c.l.s8.bf16 %v3582_v14 }
 0x82f   :  { %3757 = vmatprep.subr.bf16.mxu0 %v3634_v53  ;;  %v3578_v53 = vld [vmem:[#allocation11 + $0x4a8] sm:$0xff] }
 0x831   :  { %5301 = vmatmul.mubr.msk.bf16.gmra.mxu0 %vm2696_vm1, %v6534_v13 }
 0x832   :  { %3758 = vmatpush1.bf16.msra.mxu0 %v3633_v19  ;;  %3440 = vmatprep.mubr.bf16.mxu0 %v7095_v36  ;;  %v3669_v19 = vunpack.c.l.s8.bf16 %v3581_v41 }
 0x833   :  { %3759 = vmatprep.subr.bf16.mxu0 %v3630_v9  ;;  %v3253_v9 = vpop.f32.mrf.mxu0 }
 0x836   :  { %3760 = vmatpush1.bf16.msra.mxu0 %v3629_v25  ;;  %v3666_v25 = vunpack.c.h.s8.bf16 %v3578_v53 }
 0x837   :  { %3761 = vmatprep.subr.bf16.mxu0 %v3626_v60  ;;  %v3577_v60 = vld [vmem:[#allocation11 + $0x4a0] sm:$0xff] }
 0x839   :  { %5302 = vmatmul.mubr.msk.bf16.gmra.mxu0 %vm2696_vm1, %v6539_v62 }
 0x83a   :  { %3762 = vmatpush1.bf16.msra.mxu0 %v3625_v33  ;;  %3781 = vmatprep.mubr.bf16.mxu0 %v6336_v63  ;;  %v3665_v33 = vunpack.c.h.s8.bf16 %v3577_v60 }
 0x83b   :  { %3763 = vmatprep.subr.bf16.mxu0 %v3622_v7  ;;  %v3255_v7 = vpop.f32.mrf.mxu0 }
 0x83e   :  { %3764 = vmatpush1.bf16.msra.mxu0 %v3621_v4  ;;  %v3662_v4 = vunpack.c.l.s8.bf16 %v3578_v53 }
 0x83f   :  { %3765 = vmatprep.subr.bf16.mxu0 %v3682_v21  ;;  %v3574_v21 = vld [vmem:[#allocation11 + $0x488] sm:$0xff] }
 0x842   :  { %3766 = vmatpush2.bf16.msra.mxu0 %v3681_v43 }
 0x843   :  { %3767 = vmatprep.subr.bf16.mxu0 %v3678_v46 }
 0x845   :  { %v3294_v11 = vpop.f32.mrf.mxu1 }
 0x846   :  { %3768 = vmatpush2.bf16.msra.mxu0 %v3677_v23  ;;  %v3661_v23 = vunpack.c.l.s8.bf16 %v3577_v60 }
 0x847   :  { %v3296_v32 = vpop.f32.mrf.mxu1  ;;  %3769 = vmatprep.subr.bf16.mxu0 %v3674_v61  ;;  %v3257_v61 = vpop.f32.mrf.mxu0 }
 0x848   :  { %v3297_v45 = vadd.f32 %v3296_v32, %v3243_v50 }
 0x849   :  { %v3298_v37 = vpop.f32.mrf.mxu1 }
 0x84a   :  { %3770 = vmatpush2.bf16.msra.mxu0 %v3673_v31  ;;  %v3299_v34 = vadd.f32 %v3298_v37, %v3245_v16  ;;  %v3316_v60 = vmul.f32 0.000656137, %v3297_v45  ;;  %v3653_v16 = vunpack.c.l.s8.bf16 %v3573_v42  ;;  %v3568_v42 = vld [vmem:[#allocation11 + $0x458] sm:$0xff] }
 0x84b   :  { %v3300_v18 = vpop.f32.mrf.mxu1  ;;  %3771 = vmatprep.subr.bf16.mxu0 %v3670_v57  ;;  %v3658_v57 = vunpack.c.h.s8.bf16 %v3574_v21 }
 0x84c   :  { %v3301_v43 = vadd.f32 %v3300_v18, %v3247_v58  ;;  %v3295_v58 = vadd.f32 %v3294_v11, %v6541_v49  ;;  %v3654_v18 = vunpack.c.l.s8.bf16 %v3574_v21  ;;  %v3601_v49 = vld [vmem:[#allocation11 + $0x560] sm:$0xff]  ;;  %v3571_v11 = vld [vmem:[#allocation11 + $0x470] sm:$0xff] }
 0x84d   :  { %v3304_v29 = vpop.f32.mrf.mxu1  ;;  %v3713_v45 = vunpack.c.h.s8.bf16 %v3601_v49 }
 0x84e   :  { %3772 = vmatpush2.bf16.msra.mxu0 %v3669_v19  ;;  %v3305_v41 = vadd.f32 %v3304_v29, %v3251_v59  ;;  %v3320_v40 = vmul.f32 0.000656137, %v3301_v43  ;;  %v3572_v29 = vld [vmem:[#allocation11 + $0x478] sm:$0xff]  ;;  %v3315_v32 = vmul.f32 0.000656137, %v3295_v58  ;;  %v3647_v43 = vunpack.c.l.s8.bf16 %v3571_v11 }
 0x84f   :  { %v3306_v48 = vpop.f32.mrf.mxu1  ;;  %3773 = vmatprep.subr.bf16.mxu0 %v3666_v25  ;;  %v3652_v37 = vunpack.c.h.s8.bf16 %v3572_v29  ;;  %v3648_v21 = vunpack.c.l.s8.bf16 %v3572_v29 }
 0x850   :  { %v3307_v46 = vadd.f32 %v3306_v48, %v3253_v9  ;;  %v3323_v9 = vmul.f32 0.000656137, %v3305_v41  ;;  %v3602_v48 = vld [vmem:[#allocation11 + $0x568] sm:$0xff]  ;;  %v3341_v50 = vpack.c.bf16 %v3320_v40, %v3316_v60  ;;  %v3593_v60 = vld [vmem:[#allocation11 + $0x520] sm:$0xff] }
 0x851   :  { %v3308_v12 = vpop.f32.mrf.mxu1  ;;  %v3598_v40 = vld [vmem:[#allocation11 + $0x548] sm:$0xff]  ;;  %v3697_v29 = vunpack.c.h.s8.bf16 %v3593_v60 }
 0x852   :  { %v3309_v14 = vadd.f32 %v3308_v12, %v3255_v7  ;;  %3774 = vmatpush2.bf16.msra.mxu0 %v3665_v33  ;;  %v3324_v25 = vmul.f32 0.000656137, %v3307_v46  ;;  %v3319_v33 = vmul.f32 0.000656137, %v3299_v34  ;;  %v3651_v34 = vunpack.c.h.s8.bf16 %v3571_v11 }
 0x853   :  { %v3310_v31 = vpop.f32.mrf.mxu1  ;;  %3775 = vmatprep.subr.bf16.mxu0 %v3662_v4  ;;  %v3714_v4 = vunpack.c.h.s8.bf16 %v3602_v48  ;;  %v3706_v46 = vunpack.c.h.s8.bf16 %v3598_v40 }
 0x854   :  { %v3311_v19 = vadd.f32 %v3310_v31, %v3257_v61  ;;  %v3327_v24 = vmul.f32 0.000656137, %v3309_v14  ;;  %v3340_v12 = vpack.c.bf16 %v3319_v33, %v3315_v32  ;;  %v3644_v14 = vunpack.c.h.s8.bf16 %v3568_v42  ;;  %v3567_v61 = vld [vmem:[#allocation11 + $0x450] sm:$0xff] }
 0x855   :  { %v3643_v31 = vunpack.c.h.s8.bf16 %v3567_v61  ;;  %v3639_v58 = vunpack.c.l.s8.bf16 %v3567_v61 }
 0x856   :  { %v3328_v53 = vmul.f32 0.000656137, %v3311_v19  ;;  %3776 = vmatpush2.bf16.msra.mxu0 %v3661_v23  ;;  %v3344_v7 = vpack.c.bf16 %v3327_v24, %v3323_v9  ;;  %v3710_v24 = vunpack.c.l.s8.bf16 %v3602_v48  ;;  %v3597_v23 = vld [vmem:[#allocation11 + $0x540] sm:$0xff]  ;;  %v3594_v19 = vld [vmem:[#allocation11 + $0x528] sm:$0xff]  ;;  %v3560_v48 = vld [vmem:[#allocation11 + $0x418] sm:$0xff] }
 0x857   :  { %3777 = vmatprep.subr.bf16.mxu0 %v3658_v57  ;;  %v3705_v41 = vunpack.c.h.s8.bf16 %v3597_v23  ;;  %v3640_v57 = vunpack.c.l.s8.bf16 %v3568_v42  ;;  %v3698_v9 = vunpack.c.h.s8.bf16 %v3594_v19 }
 0x858   :  { %v3345_v59 = vpack.c.bf16 %v3328_v53, %v3324_v25  ;;  %v3564_v25 = vld [vmem:[#allocation11 + $0x438] sm:$0xff]  ;;  %v3701_v53 = vunpack.c.l.s8.bf16 %v3597_v23 }
 0x85a   :  { %3463 = vmatprep.subr.bf16.mxu1 %v3345_v59  ;;  %3778 = vmatpush2.bf16.msra.mxu0 %v3657_v44  ;;  %v3709_v44 = vunpack.c.l.s8.bf16 %v3601_v49  ;;  %v3563_v59 = vld [vmem:[#allocation11 + $0x430] sm:$0xff] }
 0x85b   :  { %3464 = vmatpush1.bf16.msra.mxu1 %v3344_v7  ;;  %3779 = vmatprep.subr.bf16.mxu0 %v3654_v18  ;;  %v3636_v18 = vunpack.c.h.s8.bf16 %v3564_v25  ;;  %v3635_v33 = vunpack.c.h.s8.bf16 %v3563_v59  ;;  %v3590_v7 = vld [vmem:[#allocation11 + $0x508] sm:$0xff]  ;;  %v3559_v49 = vld [vmem:[#allocation11 + $0x410] sm:$0xff] }
 0x85c   :  { %3465 = vmatprep.subr.bf16.mxu1 %v3341_v50  ;;  %v3693_v50 = vunpack.c.l.s8.bf16 %v3593_v60  ;;  %v3690_v32 = vunpack.c.h.s8.bf16 %v3590_v7 }
 0x85e   :  { %3780 = vmatpush2.bf16.msra.mxu0 %v3653_v16  ;;  %v3631_v16 = vunpack.c.l.s8.bf16 %v3563_v59 }
 0x85f   :  { %3466 = vmatpush1.bf16.msra.mxu1 %v3340_v12  ;;  %3855 = vmatprep.subr.bf16.mxu0 %v3652_v37  ;;  %v3628_v37 = vunpack.c.h.s8.bf16 %v3560_v48  ;;  %v3627_v12 = vunpack.c.h.s8.bf16 %v3559_v49 }
 0x860   :  { %3802 = vmatprep.subr.bf16.mxu1 %v3714_v4  ;;  %v3589_v4 = vld [vmem:[#allocation11 + $0x500] sm:$0xff] }
 0x861   :  { %3782 = vmatmul.mubr.bf16.vlgmr.msra.gmra.mxu0 %v6332_v52  ;;  %v3689_v11 = vunpack.c.h.s8.bf16 %v3589_v4 }
 0x862   :  { %5303 = vmatmul.mubr.msk.bf16.vlgmr.msra.gmra.mxu1 %vm2696_vm1, %v6524_v47  ;;  %3791 = vmatprep.mubr.bf16.mxu0 %v6347_v0  ;;  %v3702_v47 = vunpack.c.l.s8.bf16 %v3598_v40  ;;  %v3623_v40 = vunpack.c.l.s8.bf16 %v3559_v49 }
 0x863   :  { %3803 = vmatpush1.bf16.msra.mxu1 %v3713_v45  ;;  %3856 = vmatpush1.bf16.msra.mxu0 %v3651_v34  ;;  %v3686_v45 = vunpack.c.l.s8.bf16 %v3590_v7  ;;  %v3618_v34 = vld [vmem:[#allocation11 + $0x5e8] sm:$0xff] }
 0x864   :  { %3804 = vmatprep.subr.bf16.mxu1 %v3710_v24  ;;  %3857 = vmatprep.subr.bf16.mxu0 %v3648_v21  ;;  %v3588_v24 = vld [vmem:[#allocation11 + $0x4f8] sm:$0xff]  ;;  %v3685_v21 = vunpack.c.l.s8.bf16 %v3589_v4  ;;  %v3746_v42 = vunpack.c.h.s8.bf16 %v3618_v34  ;;  %v3742_v61 = vunpack.c.l.s8.bf16 %v3618_v34 }
 0x865   :  { %3493 = vmatprep.mubr.bf16.mxu1 %v7095_v36 }
 0x867   :  { %3805 = vmatpush1.bf16.msra.mxu1 %v3709_v44  ;;  %3858 = vmatpush1.bf16.msra.mxu0 %v3647_v43  ;;  %v3617_v44 = vld [vmem:[#allocation11 + $0x5e0] sm:$0xff]  ;;  %v3684_v43 = vunpack.c.h.s8.bf16 %v3588_v24 }
 0x868   :  { %3806 = vmatprep.subr.bf16.mxu1 %v3706_v46  ;;  %3859 = vmatprep.subr.bf16.mxu0 %v3644_v14  ;;  %v3587_v46 = vld [vmem:[#allocation11 + $0x4f0] sm:$0xff]  ;;  %v3745_v14 = vunpack.c.h.s8.bf16 %v3617_v44 }
 0x869   :  { %3792 = vmatmul.mubr.bf16.gmra.mxu0 %v6345_v51  ;;  %v3683_v23 = vunpack.c.h.s8.bf16 %v3587_v46 }
 0x86a   :  { %5304 = vmatmul.mubr.msk.bf16.gmra.mxu1 %vm2696_vm1, %v6529_v1  ;;  %3887 = vmatprep.mubr.bf16.mxu0 %v6336_v63  ;;  %v3694_v1 = vunpack.c.l.s8.bf16 %v3594_v19  ;;  %v3632_v63 = vunpack.c.l.s8.bf16 %v3564_v25  ;;  %v3613_v25 = vld [vmem:[#allocation11 + $0x5c0] sm:$0xff] }
 0x86b   :  { %3807 = vmatpush1.bf16.msra.mxu1 %v3705_v41  ;;  %3860 = vmatpush1.bf16.msra.mxu0 %v3643_v31  ;;  %v3614_v41 = vld [vmem:[#allocation11 + $0x5c8] sm:$0xff]  ;;  %v3584_v31 = vld [vmem:[#allocation11 + $0x4d8] sm:$0xff] }
 0x86c   :  { %3808 = vmatprep.subr.bf16.mxu1 %v3702_v47  ;;  %3861 = vmatprep.subr.bf16.mxu0 %v3640_v57  ;;  %v3741_v47 = vunpack.c.l.s8.bf16 %v3617_v44  ;;  %v3679_v57 = vunpack.c.l.s8.bf16 %v3587_v46  ;;  %v3738_v19 = vunpack.c.h.s8.bf16 %v3614_v41  ;;  %v3734_v60 = vunpack.c.l.s8.bf16 %v3614_v41  ;;  %v3603_v41 = vld [vmem:[#allocation11 + $0x570] sm:$0xff] }
 0x86d   :  { %3503 = vmatprep.mubr.bf16.mxu1 %v7095_v36  ;;  %v3672_v59 = vunpack.c.l.s8.bf16 %v3584_v31 }
 0x86f   :  { %3809 = vmatpush1.bf16.msra.mxu1 %v3701_v53  ;;  %3862 = vmatpush1.bf16.msra.mxu0 %v3639_v58  ;;  %v3676_v53 = vunpack.c.h.s8.bf16 %v3584_v31  ;;  %v3583_v58 = vld [vmem:[#allocation11 + $0x4d0] sm:$0xff]  ;;  %v3715_v31 = vunpack.c.h.s8.bf16 %v3603_v41 }
 0x870   :  { %3810 = vmatprep.subr.bf16.mxu1 %v3698_v9  ;;  %3863 = vmatprep.subr.bf16.mxu0 %v3636_v18  ;;  %v3737_v9 = vunpack.c.h.s8.bf16 %v3613_v25  ;;  %v3675_v18 = vunpack.c.h.s8.bf16 %v3583_v58 }
 0x872   :  { %5305 = vmatmul.mubr.msk.bf16.gmra.mxu1 %vm2696_vm1, %v6534_v13  ;;  %v3624_v13 = vunpack.c.l.s8.bf16 %v3560_v48  ;;  %v3609_v48 = vld [vmem:[#allocation11 + $0x5a0] sm:$0xff] }
 0x873   :  { %3811 = vmatpush1.bf16.msra.mxu1 %v3697_v29  ;;  %3864 = vmatpush1.bf16.msra.mxu0 %v3635_v33  ;;  %v3610_v29 = vld [vmem:[#allocation11 + $0x5a8] sm:$0xff]  ;;  %v3580_v33 = vld [vmem:[#allocation11 + $0x4b8] sm:$0xff] }
 0x874   :  { %3812 = vmatprep.subr.bf16.mxu1 %v3694_v1  ;;  %3865 = vmatprep.subr.bf16.mxu0 %v3632_v63  ;;  %v3733_v1 = vunpack.c.l.s8.bf16 %v3613_v25  ;;  %v3671_v63 = vunpack.c.l.s8.bf16 %v3583_v58  ;;  %v3730_v7 = vunpack.c.h.s8.bf16 %v3610_v29  ;;  %v3726_v4 = vunpack.c.l.s8.bf16 %v3610_v29 }
 0x875   :  { %3513 = vmatprep.mubr.bf16.mxu1 %v7095_v36  ;;  %v3664_v49 = vunpack.c.l.s8.bf16 %v3580_v33 }
 0x877   :  { %3813 = vmatpush1.bf16.msra.mxu1 %v3693_v50  ;;  %3866 = vmatpush1.bf16.msra.mxu0 %v3631_v16  ;;  %v3668_v50 = vunpack.c.h.s8.bf16 %v3580_v33  ;;  %v3579_v16 = vld [vmem:[#allocation11 + $0x4b0] sm:$0xff]  ;;  %v3592_v33 = vld [vmem:[#allocation11 + $0x518] sm:$0xff] }
 0x878   :  { %3814 = vmatprep.subr.bf16.mxu1 %v3690_v32  ;;  %3867 = vmatprep.subr.bf16.mxu0 %v3628_v37  ;;  %v3729_v32 = vunpack.c.h.s8.bf16 %v3609_v48  ;;  %v3667_v37 = vunpack.c.h.s8.bf16 %v3579_v16 }
 0x87a   :  { %5306 = vmatmul.mubr.msk.bf16.gmra.mxu1 %vm2696_vm1, %v6539_v62  ;;  %v3680_v62 = vunpack.c.l.s8.bf16 %v3588_v24  ;;  %v3605_v24 = vld [vmem:[#allocation11 + $0x580] sm:$0xff] }
 0x87b   :  { %3815 = vmatpush1.bf16.msra.mxu1 %v3689_v11  ;;  %3834 = vmatprep.mubr.bf16.mxu1 %v6362_v6  ;;  %v3606_v11 = vld [vmem:[#allocation11 + $0x588] sm:$0xff] }
 0x87c   :  { %3868 = vmatpush1.bf16.msra.mxu0 %v3627_v12  ;;  %3816 = vmatprep.subr.bf16.mxu1 %v3686_v45  ;;  %v3576_v12 = vld [vmem:[#allocation11 + $0x498] sm:$0xff]  ;;  %v3725_v45 = vunpack.c.l.s8.bf16 %v3609_v48  ;;  %v3722_v34 = vunpack.c.h.s8.bf16 %v3606_v11 }
 0x87d   :  { %3869 = vmatprep.subr.bf16.mxu0 %v3624_v13  ;;  %v3663_v13 = vunpack.c.l.s8.bf16 %v3579_v16  ;;  %v3656_v46 = vunpack.c.l.s8.bf16 %v3576_v12  ;;  %v3620_v48 = vld [vmem:[#allocation11 + $0x5f8] sm:$0xff] }
 0x87e   :  { %v3748_v16 = vunpack.c.h.s8.bf16 %v3620_v48 }
 0x87f   :  { %3817 = vmatpush1.bf16.msra.mxu1 %v3685_v21  ;;  %v3660_v21 = vunpack.c.h.s8.bf16 %v3576_v12 }
 0x880   :  { %3870 = vmatpush1.bf16.msra.mxu0 %v3623_v40  ;;  %3818 = vmatprep.subr.bf16.mxu1 %v3746_v42  ;;  %v3575_v40 = vld [vmem:[#allocation11 + $0x490] sm:$0xff]  ;;  %v3721_v42 = vunpack.c.h.s8.bf16 %v3605_v24 }
 0x881   :  { %3871 = vmatprep.subr.bf16.mxu0 %v3684_v43  ;;  %v3659_v44 = vunpack.c.h.s8.bf16 %v3575_v40  ;;  %v3718_v43 = vunpack.c.l.s8.bf16 %v3606_v11 }
 0x883   :  { %3819 = vmatpush2.bf16.msra.mxu1 %v3745_v14  ;;  %v3604_v14 = vld [vmem:[#allocation11 + $0x578] sm:$0xff] }
 0x884   :  { %3872 = vmatpush2.bf16.msra.mxu0 %v3683_v23  ;;  %3820 = vmatprep.subr.bf16.mxu1 %v3742_v61  ;;  %v3717_v23 = vunpack.c.l.s8.bf16 %v3605_v24  ;;  %v3655_v61 = vunpack.c.l.s8.bf16 %v3575_v40  ;;  %v3612_v24 = vld [vmem:[#allocation11 + $0x5b8] sm:$0xff] }
 0x885   :  { %3873 = vmatprep.subr.bf16.mxu0 %v3680_v62  ;;  %v3716_v62 = vunpack.c.h.s8.bf16 %v3604_v14  ;;  %v3732_v40 = vunpack.c.h.s8.bf16 %v3612_v24 }
 0x887   :  { %3821 = vmatpush2.bf16.msra.mxu1 %v3741_v47  ;;  %v3712_v47 = vunpack.c.l.s8.bf16 %v3604_v14 }
 0x888   :  { %3874 = vmatpush2.bf16.msra.mxu0 %v3679_v57  ;;  %3822 = vmatprep.subr.bf16.mxu1 %v3738_v19  ;;  %v3600_v57 = vld [vmem:[#allocation11 + $0x558] sm:$0xff]  ;;  %v3711_v19 = vunpack.c.l.s8.bf16 %v3603_v41 }
 0x889   :  { %3875 = vmatprep.subr.bf16.mxu0 %v3676_v53  ;;  %v3708_v25 = vunpack.c.h.s8.bf16 %v3600_v57  ;;  %v3599_v53 = vld [vmem:[#allocation11 + $0x550] sm:$0xff] }
 0x88a   :  { %v3707_v58 = vunpack.c.h.s8.bf16 %v3599_v53 }
 0x88b   :  { %3823 = vmatpush2.bf16.msra.mxu1 %v3737_v9  ;;  %v3704_v9 = vunpack.c.l.s8.bf16 %v3600_v57 }
 0x88c   :  { %3876 = vmatpush2.bf16.msra.mxu0 %v3675_v18  ;;  %3824 = vmatprep.subr.bf16.mxu1 %v3734_v60  ;;  %v3596_v18 = vld [vmem:[#allocation11 + $0x538] sm:$0xff]  ;;  %v3595_v60 = vld [vmem:[#allocation11 + $0x530] sm:$0xff] }
 0x88d   :  { %3877 = vmatprep.subr.bf16.mxu0 %v3672_v59  ;;  %v3699_v59 = vunpack.c.h.s8.bf16 %v3595_v60  ;;  %v3696_v29 = vunpack.c.l.s8.bf16 %v3596_v18 }
 0x88f   :  { %3825 = vmatpush2.bf16.msra.mxu1 %v3733_v1  ;;  %v3695_v1 = vunpack.c.l.s8.bf16 %v3595_v60 }
 0x890   :  { %3878 = vmatpush2.bf16.msra.mxu0 %v3671_v63  ;;  %3826 = vmatprep.subr.bf16.mxu1 %v3730_v7  ;;  %v3692_v63 = vunpack.c.h.s8.bf16 %v3592_v33  ;;  %v3591_v7 = vld [vmem:[#allocation11 + $0x510] sm:$0xff] }
 0x891   :  { %3879 = vmatprep.subr.bf16.mxu0 %v3668_v50  ;;  %v3687_v50 = vunpack.c.l.s8.bf16 %v3591_v7 }
 0x893   :  { %3827 = vmatpush2.bf16.msra.mxu1 %v3729_v32  ;;  %v3619_v32 = vld [vmem:[#allocation11 + $0x5f0] sm:$0xff] }
 0x894   :  { %3880 = vmatpush2.bf16.msra.mxu0 %v3667_v37  ;;  %3828 = vmatprep.subr.bf16.mxu1 %v3726_v4  ;;  %v3747_v37 = vunpack.c.h.s8.bf16 %v3619_v32  ;;  %v3744_v4 = vunpack.c.l.s8.bf16 %v3620_v48  ;;  %v3743_v11 = vunpack.c.l.s8.bf16 %v3619_v32 }
 0x895   :  { %3881 = vmatprep.subr.bf16.mxu0 %v3664_v49  ;;  %v3616_v49 = vld [vmem:[#allocation11 + $0x5d8] sm:$0xff] }
 0x896   :  { %v3740_v12 = vunpack.c.h.s8.bf16 %v3616_v49 }
 0x897   :  { %3829 = vmatpush2.bf16.msra.mxu1 %v3725_v45  ;;  %v3615_v45 = vld [vmem:[#allocation11 + $0x5d0] sm:$0xff] }
 0x898   :  { %3882 = vmatpush2.bf16.msra.mxu0 %v3663_v13  ;;  %3830 = vmatprep.subr.bf16.mxu1 %v3722_v34  ;;  %v3739_v13 = vunpack.c.h.s8.bf16 %v3615_v45  ;;  %v3736_v34 = vunpack.c.l.s8.bf16 %v3616_v49 }
 0x899   :  { %3883 = vmatprep.subr.bf16.mxu0 %v3660_v21  ;;  %v3735_v21 = vunpack.c.l.s8.bf16 %v3615_v45 }
 0x89b   :  { %3831 = vmatpush2.bf16.msra.mxu1 %v3721_v42  ;;  %v3611_v42 = vld [vmem:[#allocation11 + $0x5b0] sm:$0xff] }
 0x89c   :  { %3884 = vmatpush2.bf16.msra.mxu0 %v3659_v44  ;;  %3832 = vmatprep.subr.bf16.mxu1 %v3718_v43  ;;  %v3731_v44 = vunpack.c.h.s8.bf16 %v3611_v42  ;;  %v3728_v43 = vunpack.c.l.s8.bf16 %v3612_v24  ;;  %v3727_v14 = vunpack.c.l.s8.bf16 %v3611_v42 }
 0x89d   :  { %3885 = vmatprep.subr.bf16.mxu0 %v3656_v46  ;;  %v3608_v46 = vld [vmem:[#allocation11 + $0x598] sm:$0xff] }
 0x89e   :  { %v3720_v41 = vunpack.c.l.s8.bf16 %v3608_v46 }
 0x89f   :  { %3833 = vmatpush2.bf16.msra.mxu1 %v3717_v23  ;;  %v3724_v23 = vunpack.c.h.s8.bf16 %v3608_v46 }
 0x8a0   :  { %3886 = vmatpush2.bf16.msra.mxu0 %v3655_v61  ;;  %3908 = vmatprep.subr.bf16.mxu1 %v3716_v62  ;;  %v3607_v61 = vld [vmem:[#allocation11 + $0x590] sm:$0xff] }
 0x8a1   :  { %v3723_v62 = vunpack.c.h.s8.bf16 %v3607_v61  ;;  %v3719_v57 = vunpack.c.l.s8.bf16 %v3607_v61  ;;  %v7102_v61 = vld [vmem:[#allocation24_spill] sm:$0xff] }
 0x8a2   :  { %3835 = vmatmul.mubr.bf16.vlgmr.msra.gmra.mxu1 %v6358_v39 }
 0x8a3   :  { %3888 = vmatmul.mubr.bf16.vlgmr.msra.gmra.mxu0 %v6332_v52  ;;  %3844 = vmatprep.mubr.bf16.mxu1 %v6375_v5  ;;  %v3703_v52 = vunpack.c.l.s8.bf16 %v3599_v53 }
 0x8a4   :  { %3897 = vmatprep.mubr.bf16.mxu0 %v6347_v0  ;;  %3909 = vmatpush1.bf16.msra.mxu1 %v3715_v31  ;;  %v3700_v0 = vunpack.c.h.s8.bf16 %v3596_v18  ;;  %v7096_v31 = vsub.s32 0, %v6169_v56 }
 0x8a5   :  { %3910 = vmatprep.subr.bf16.mxu1 %v3712_v47 }
 0x8a6   :  { %v2859_v47 = vrot.slane %v6436_v10, %v7096_v31 }
 0x8a8   :  { %3911 = vmatpush1.bf16.msra.mxu1 %v3711_v19  ;;  %v2876_v19 = vadd.f32 %v2859_v47, %v6443_v28  ;;  %v2884_v60 = vadd.f32 %v2859_v47, %v6454_v27 }
 0x8a9   :  { %3912 = vmatprep.subr.bf16.mxu1 %v3708_v25 }
 0x8aa   :  { %3845 = vmatmul.mubr.bf16.gmra.mxu1 %v6373_v38 }
 0x8ab   :  { %3898 = vmatmul.mubr.bf16.gmra.mxu0 %v6345_v51  ;;  %3940 = vmatprep.mubr.bf16.mxu1 %v6362_v6  ;;  %v3691_v51 = vunpack.c.h.s8.bf16 %v3591_v7  ;;  %v3688_v6 = vunpack.c.l.s8.bf16 %v3592_v33  ;;  %v2889_v33 = vadd.f32 %v6441_v15, %v6463_v3  ;;  %v2897_v3 = vadd.f32 %v6441_v15, %v6472_v35 }
 0x8ac   :  { %3913 = vmatpush1.bf16.msra.mxu1 %v3707_v58  ;;  %4058 = vmatprep.mubr.bf16.mxu0 %v7095_v36 }
 0x8ad   :  { %3914 = vmatprep.subr.bf16.mxu1 %v3704_v9  ;;  %v2880_v9 = vadd.f32 %v2859_v47, %v6450_v17 }
 0x8b0   :  { %3915 = vmatpush1.bf16.msra.mxu1 %v3703_v52  ;;  %v2881_v52 = vadd.f32 %v6441_v15, %v6452_v22 }
 0x8b1   :  { %3916 = vmatprep.subr.bf16.mxu1 %v3700_v0 }
 0x8b4   :  { %3917 = vmatpush1.bf16.msra.mxu1 %v3699_v59 }
 0x8b5   :  { %3918 = vmatprep.subr.bf16.mxu1 %v3696_v29 }
 0x8b8   :  { %3919 = vmatpush1.bf16.msra.mxu1 %v3695_v1 }
 0x8b9   :  { %3920 = vmatprep.subr.bf16.mxu1 %v3692_v63  ;;  %v2892_v63 = vadd.f32 %v2859_v47, %v6465_v30  ;;  %v2900_v30 = vadd.f32 %v2859_v47, %v6474_v54  ;;  %v5839_v54 = vld [vmem:[%s7062_s8] sm:$0xf] }
 0x8bc   :  { %3921 = vmatpush1.bf16.msra.mxu1 %v3691_v51 }
 0x8bd   :  { %3922 = vmatprep.subr.bf16.mxu1 %v3688_v6 }
 0x8c0   :  { %3923 = vmatpush1.bf16.msra.mxu1 %v3687_v50 }
 0x8c1   :  { %3924 = vmatprep.subr.bf16.mxu1 %v3748_v16 }
 0x8c4   :  { %3925 = vmatpush2.bf16.msra.mxu1 %v3747_v37 }
 0x8c5   :  { %3926 = vmatprep.subr.bf16.mxu1 %v3744_v4 }
 0x8c8   :  { %3927 = vmatpush2.bf16.msra.mxu1 %v3743_v11  ;;  %v7097_v11 = vld [vmem:[#allocation36_spill] sm:$0xff] }
 0x8c9   :  { %3928 = vmatprep.subr.bf16.mxu1 %v3740_v12  ;;  %v7098_v12 = vld [vmem:[#allocation20_spill] sm:$0xff] }
 0x8cc   :  { %3929 = vmatpush2.bf16.msra.mxu1 %v3739_v13  ;;  %v7099_v13 = vld [vmem:[#allocation37_spill] sm:$0xff] }
 0x8cd   :  { %3930 = vmatprep.subr.bf16.mxu1 %v3736_v34  ;;  %v2905_v35 = vadd.f32 %v6441_v15, %v7099_v13  ;;  %v7116_v13 = vld [vmem:[#allocation33_spill] sm:$0xff] }
 0x8d0   :  { %3931 = vmatpush2.bf16.msra.mxu1 %v3735_v21 }
 0x8d1   :  { %3932 = vmatprep.subr.bf16.mxu1 %v3732_v40  ;;  %v7100_v40 = vsub.s32 2, %v6169_v56  ;;  %v7106_v56 = vld [vmem:[#allocation26_spill] sm:$0xff] }
 0x8d3   :  { %v2867_v42 = vrot.slane %v5839_v54, %v7100_v40  ;;  %v7118_v40 = vld [vmem:[#allocation34_spill] sm:$0xff] }
 0x8d4   :  { %3933 = vmatpush2.bf16.msra.mxu1 %v3731_v44  ;;  %v7101_v44 = vld [vmem:[#allocation22_spill] sm:$0xff] }
 0x8d5   :  { %3934 = vmatprep.subr.bf16.mxu1 %v3728_v43  ;;  %v2878_v43 = vadd.f32 %v2867_v42, %v7101_v44  ;;  %v2882_v15 = vadd.f32 %v2867_v42, %v7102_v61  ;;  %v2902_v44 = vadd.f32 %v2867_v42, %v7118_v40 }
 0x8d8   :  { %3935 = vmatpush2.bf16.msra.mxu1 %v3727_v14 }
 0x8d9   :  { %3936 = vmatprep.subr.bf16.mxu1 %v3724_v23 }
 0x8dc   :  { %3937 = vmatpush2.bf16.msra.mxu1 %v3723_v62  ;;  %v7103_v62 = vld [vmem:[#allocation23_spill] sm:$0xff] }
 0x8dd   :  { %3938 = vmatprep.subr.bf16.mxu1 %v3720_v41 }
 0x8e0   :  { %3939 = vmatpush2.bf16.msra.mxu1 %v3719_v57  ;;  %v7105_v57 = vld [vmem:[#allocation21_spill] sm:$0xff] }
 0x8e1   :  { %v3412_v25 = vpop.f32.mrf.mxu0 }
 0x8e2   :  { %v6575_v53 = vadd.f32 %v3412_v25, %v2876_v19 }
 0x8e3   :  { %3941 = vmatmul.mubr.bf16.vlgmr.msra.gmra.mxu1 %v6358_v39  ;;  %v3414_v58 = vpop.f32.mrf.mxu0 }
 0x8e4   :  { %3950 = vmatprep.mubr.bf16.mxu1 %v6375_v5  ;;  %v6581_v18 = vadd.f32 %v3414_v58, %v6448_v20  ;;  %v2888_v20 = vadd.f32 %v2859_v47, %v6461_v26 }
 0x8e5   :  { %v3416_v10 = vpop.f32.mrf.mxu0 }
 0x8e6   :  { %v6585_v0 = vadd.f32 %v3416_v10, %v2880_v9  ;;  %v2886_v9 = vadd.f32 %v2867_v42, %v7106_v56 }
 0x8e7   :  { %v3418_v28 = vpop.f32.mrf.mxu0 }
 0x8e8   :  { %v6588_v59 = vadd.f32 %v3418_v28, %v2881_v52 }
 0x8e9   :  { %v3422_v39 = vpop.f32.mrf.mxu0 }
 0x8ea   :  { %v6590_v29 = vadd.f32 %v3422_v39, %v2884_v60  ;;  %v7107_v39 = vld [vmem:[#allocation28_spill] sm:$0xff] }
 0x8eb   :  { %3951 = vmatmul.mubr.bf16.gmra.mxu1 %v6373_v38  ;;  %v3424_v5 = vpop.f32.mrf.mxu0 }
 0x8ec   :  { %v6595_v17 = vadd.f32 %v3424_v5, %v6459_v2  ;;  %4131 = vmatprep.mubr.bf16.mxu1 %v7095_v36  ;;  %v2896_v2 = vadd.f32 %v2859_v47, %v6470_v8  ;;  %v2904_v8 = vadd.f32 %v2859_v47, %v7097_v11  ;;  %v7104_v47 = vld [vmem:[#allocation25_spill] sm:$0xff]  ;;  %v2890_v5 = vadd.f32 %v2867_v42, %v7107_v39 }
 0x8ed   :  { %v3426_v22 = vpop.f32.mrf.mxu0  ;;  %v2883_v19 = vadd.f32 %v7105_v57, %v7104_v47 }
 0x8ee   :  { %v6600_v27 = vadd.f32 %v3426_v22, %v2888_v20  ;;  %v7108_v20 = vld [vmem:[#allocation27_spill] sm:$0xff] }
 0x8ef   :  { %v3428_v1 = vpop.f32.mrf.mxu0 }
 0x8f0   :  { %v6603_v7 = vadd.f32 %v3428_v1, %v2889_v33  ;;  %v7109_v1 = vld [vmem:[#allocation29_spill] sm:$0xff] }
 0x8f1   :  { %v3432_v38 = vpop.f32.mrf.mxu0 }
 0x8f2   :  { %v6605_v51 = vadd.f32 %v3432_v38, %v2892_v63  ;;  %v2891_v63 = vadd.f32 %v7105_v57, %v7109_v1 }
 0x8f3   :  { %v3434_v26 = vpop.f32.mrf.mxu0 }
 0x8f4   :  { %v6609_v6 = vadd.f32 %v3434_v26, %v6468_v55 }
 0x8f5   :  { %v3436_v48 = vpop.f32.mrf.mxu0 }
 0x8f6   :  { %v6613_v50 = vadd.f32 %v3436_v48, %v2896_v2  ;;  %v7110_v2 = vld [vmem:[#allocation30_spill] sm:$0xff] }
 0x8f7   :  { %v3438_v16 = vpop.f32.mrf.mxu0  ;;  %v2894_v48 = vadd.f32 %v2867_v42, %v7110_v2 }
 0x8f8   :  { %v6616_v32 = vadd.f32 %v3438_v16, %v2897_v3 }
 0x8f9   :  { %v3442_v37 = vpop.f32.mrf.mxu0 }
 0x8fa   :  { %v6618_v4 = vadd.f32 %v3442_v37, %v2900_v30 }
 0x8fb   :  { %v3444_v49 = vpop.f32.mrf.mxu0 }
 0x8fc   :  { %v6622_v55 = vadd.f32 %v3444_v49, %v7098_v12  ;;  %v7113_v49 = vld [vmem:[#allocation32_spill] sm:$0xff] }
 0x8fd   :  { %v3446_v45 = vpop.f32.mrf.mxu0  ;;  %v2898_v11 = vadd.f32 %v2867_v42, %v7113_v49 }
 0x8fe   :  { %v6626_v34 = vadd.f32 %v3446_v45, %v2904_v8  ;;  %v7114_v8 = vld [vmem:[#allocation31_spill] sm:$0xff] }
 0x8ff   :  { %v3448_v24 = vpop.f32.mrf.mxu0 }
 0x900   :  { %v6628_v21 = vadd.f32 %v3448_v24, %v2905_v35  ;;  %v2899_v35 = vadd.f32 %v7105_v57, %v7116_v13 }
 0x921   :  { %v3783_v39 = vpop.f32.mrf.mxu0 }
 0x922   :  { %v3485_v46 = vpop.f32.mrf.mxu1 }
 0x923   :  { %v6636_v14 = vadd.f32 %v3485_v46, %v2878_v43 }
 0x924   :  { %v3487_v23 = vpop.f32.mrf.mxu1 }
 0x925   :  { %v6640_v41 = vadd.f32 %v3487_v23, %v7103_v62 }
 0x926   :  { %v3489_v31 = vpop.f32.mrf.mxu1 }
 0x927   :  { %v6644_v25 = vadd.f32 %v3489_v31, %v2882_v15  ;;  %v7121_v15 = vld [vmem:[#allocation38_spill] sm:$0xff]  ;;  %v7122_v31 = vld [vmem:[#allocation35_spill] sm:$0xff] }
 0x928   :  { %v3491_v58 = vpop.f32.mrf.mxu1  ;;  %v2906_v62 = vadd.f32 %v2867_v42, %v7121_v15 }
 0x929   :  { %v6647_v10 = vadd.f32 %v3491_v58, %v2883_v19  ;;  %v7124_v58 = vld [vmem:[#allocation39_spill] sm:$0xff] }
 0x92a   :  { %v3495_v52 = vpop.f32.mrf.mxu1  ;;  %v2907_v56 = vadd.f32 %v7105_v57, %v7124_v58 }
 0x92b   :  { %v6649_v28 = vadd.f32 %v3495_v52, %v2886_v9 }
 0x92c   :  { %v3497_v60 = vpop.f32.mrf.mxu1 }
 0x92d   :  { %v6653_v22 = vadd.f32 %v3497_v60, %v7108_v20 }
 0x92e   :  { %v3499_v33 = vpop.f32.mrf.mxu1 }
 0x92f   :  { %v6657_v38 = vadd.f32 %v3499_v33, %v2890_v5  ;;  %v3785_v5 = vpop.f32.mrf.mxu0 }
 0x930   :  { %v3501_v26 = vpop.f32.mrf.mxu1 }
 0x931   :  { %v6660_v3 = vadd.f32 %v3501_v26, %v2891_v63  ;;  %v3787_v20 = vpop.f32.mrf.mxu0 }
 0x932   :  { %v3505_v16 = vpop.f32.mrf.mxu1 }
 0x933   :  { %7111 = vst [vmem:[#allocation36_spill] sm:$0xff] %v6660_v3  ;;  %v6662_v30 = vadd.f32 %v3505_v16, %v2894_v48  ;;  %v3789_v33 = vpop.f32.mrf.mxu0 }
 0x934   :  { %v3507_v37 = vpop.f32.mrf.mxu1 }
 0x935   :  { %7112 = vst [vmem:[#allocation20_spill] sm:$0xff] %v6662_v30  ;;  %v6666_v12 = vadd.f32 %v3507_v37, %v7114_v8  ;;  %v3793_v63 = vpop.f32.mrf.mxu0 }
 0x936   :  { %v3509_v45 = vpop.f32.mrf.mxu1 }
 0x937   :  { %7115 = vst [vmem:[#allocation37_spill] sm:$0xff] %v6666_v12  ;;  %v6670_v24 = vadd.f32 %v3509_v45, %v2898_v11  ;;  %v3795_v2 = vpop.f32.mrf.mxu0 }
 0x938   :  { %v3511_v54 = vpop.f32.mrf.mxu1 }
 0x939   :  { %7117 = vst [vmem:[#allocation22_spill] sm:$0xff] %v6670_v24  ;;  %v6673_v43 = vadd.f32 %v3511_v54, %v2899_v35  ;;  %v3797_v37 = vpop.f32.mrf.mxu0 }
 0x93a   :  { %v3515_v46 = vpop.f32.mrf.mxu1 }
 0x93b   :  { %7119 = vst [vmem:[#allocation24_spill] sm:$0xff] %v6673_v43  ;;  %v6675_v23 = vadd.f32 %v3515_v46, %v2902_v44  ;;  %v3799_v13 = vpop.f32.mrf.mxu0 }
 0x93c   :  { %v3517_v61 = vpop.f32.mrf.mxu1 }
 0x93d   :  { %7120 = vst [vmem:[#allocation23_spill] sm:$0xff] %v6675_v23  ;;  %v6679_v47 = vadd.f32 %v3517_v61, %v7122_v31 }
 0x93e   :  { %v3519_v19 = vpop.f32.mrf.mxu1 }
 0x93f   :  { %7123 = vst [vmem:[#allocation25_spill] sm:$0xff] %v6679_v47  ;;  %v6683_v9 = vadd.f32 %v3519_v19, %v2906_v62 }
 0x940   :  { %v3521_v52 = vpop.f32.mrf.mxu1 }
 0x941   :  { %7125 = vst [vmem:[#allocation21_spill] sm:$0xff] %v6683_v9  ;;  %v6685_v60 = vadd.f32 %v3521_v52, %v2907_v56 }
 0x943   :  { %7126 = vst [vmem:[#allocation26_spill] sm:$0xff] %v6685_v60 }
 0x962   :  { %v3836_v1 = vpop.f32.mrf.mxu1 }
 0x963   :  { %v3837_v19 = vadd.f32 %v3836_v1, %v3783_v39  ;;  %v6693_v1 = vld [vmem:[#allocation10 + $0x40] sm:$0xff]  }
 0x964   :  { %v3838_v26 = vpop.f32.mrf.mxu1 }
 0x965   :  { %v3839_v40 = vadd.f32 %v3838_v26, %v3785_v5 }
 0x966   :  { %v3840_v42 = vpop.f32.mrf.mxu1 }
 0x967   :  { %v3841_v46 = vadd.f32 %v3840_v42, %v3787_v20  ;;  %v3962_v56 = vmul.f32 0.000656137, %v3839_v40  ;;  %v4256_v20 = vld [vmem:[%s7064_s10 + $0x18] sm:$0xff]  ;;  %v5826_v40 = vld [vmem:[#allocation10 + $0x58] sm:$0xff]  }
 0x968   :  { %v3842_v48 = vpop.f32.mrf.mxu1  ;;  %v4276_v26 = vunpack.c.h.s8.bf16 %v4256_v20 }
 0x969   :  { %v3843_v57 = vadd.f32 %v3842_v48, %v3789_v33  ;;  %v3965_v60 = vmul.f32 0.000656137, %v3841_v46  ;;  %v4260_v33 = vld [vmem:[%s7064_s10 + $0x38] sm:$0xff]  ;;  %v4259_v48 = vld [vmem:[%s7064_s10 + $0x30] sm:$0xff] }
 0x96a   :  { %v3846_v16 = vpop.f32.mrf.mxu1  ;;  %v4284_v5 = vunpack.c.h.s8.bf16 %v4260_v33  ;;  %v4283_v42 = vunpack.c.l.s8.bf16 %v4260_v33 }
 0x96b   :  { %v3847_v35 = vadd.f32 %v3846_v16, %v3793_v63  ;;  %v3966_v15 = vmul.f32 0.000656137, %v3843_v57  ;;  %v3961_v63 = vmul.f32 0.000656137, %v3837_v19  ;;  %v4282_v16 = vunpack.c.h.s8.bf16 %v4259_v48  ;;  %v4258_v57 = vld [vmem:[%s7064_s10 + $0x28] sm:$0xff] }
 0x96c   :  { %v3848_v49 = vpop.f32.mrf.mxu1 }
 0x96d   :  { %v3849_v8 = vadd.f32 %v3848_v49, %v3795_v2  ;;  %v3969_v58 = vmul.f32 0.000656137, %v3847_v35  ;;  %v3987_v2 = vpack.c.bf16 %v3966_v15, %v3962_v56  ;;  %v3986_v39 = vpack.c.bf16 %v3965_v60, %v3961_v63  ;;  %v4255_v60 = vld [vmem:[%s7064_s10 + $0x10] sm:$0xff]  ;;  %v6715_v35 = vld [vmem:[#allocation10 + $0x50] sm:$0xff]  }
 0x96e   :  { %v3850_v11 = vpop.f32.mrf.mxu1  ;;  %v4274_v49 = vunpack.c.h.s8.bf16 %v4255_v60 }
 0x96f   :  { %v3851_v45 = vadd.f32 %v3850_v11, %v3797_v37  ;;  %v3970_v62 = vmul.f32 0.000656137, %v3849_v8  ;;  %v6704_v37 = vld [vmem:[#allocation10 + $0x48] sm:$0xff]   ;;  %v4281_v11 = vunpack.c.l.s8.bf16 %v4259_v48  ;;  %v4273_v8 = vunpack.c.l.s8.bf16 %v4255_v60 }
 0x970   :  { %v3852_v54 = vpop.f32.mrf.mxu1 }
 0x971   :  { %v3853_v44 = vadd.f32 %v3852_v54, %v3799_v13  ;;  %v3973_v61 = vmul.f32 0.000656137, %v3851_v45  ;;  %v4280_v45 = vunpack.c.h.s8.bf16 %v4258_v57  ;;  %v4254_v13 = vld [vmem:[%s7064_s10 + $0x8] sm:$0xff] }
 0x972   :  { %v4272_v54 = vunpack.c.h.s8.bf16 %v4254_v13 }
 0x973   :  { %v3974_v31 = vmul.f32 0.000656137, %v3853_v44  ;;  %v3990_v9 = vpack.c.bf16 %v3973_v61, %v3969_v58  ;;  %v3889_v44 = vpop.f32.mrf.mxu0 }
 0x975   :  { %v3991_v52 = vpack.c.bf16 %v3974_v31, %v3970_v62  ;;  %v3891_v46 = vpop.f32.mrf.mxu0 }
 0x977   :  { %4038 = vmatprep.subr.bf16.mxu0 %v3991_v52  ;;  %v3893_v61 = vpop.f32.mrf.mxu0 }
 0x978   :  { %4039 = vmatpush1.bf16.msra.mxu0 %v3990_v9  ;;  %v4275_v9 = vunpack.c.l.s8.bf16 %v4256_v20 }
 0x979   :  { %4040 = vmatprep.subr.bf16.mxu0 %v3987_v2  ;;  %v3895_v15 = vpop.f32.mrf.mxu0 }
 0x97b   :  { %v3899_v31 = vpop.f32.mrf.mxu0 }
 0x97c   :  { %4041 = vmatpush1.bf16.msra.mxu0 %v3986_v39 }
 0x97d   :  { %5376 = vmatprep.subr.bf16.mxu0 %v4284_v5  ;;  %v3901_v56 = vpop.f32.mrf.mxu0 }
 0x97f   :  { %5311 = vmatmul.mubr.msk.bf16.vlgmr.msra.gmra.mxu0 %vm2696_vm1, %v6693_v1  ;;  %v3903_v2 = vpop.f32.mrf.mxu0 }
 0x980   :  { %4068 = vmatprep.mubr.bf16.mxu0 %v7095_v36  ;;  %5377 = vmatpush3.bf16.msra.mxu0 %v4276_v26 }
 0x981   :  { %5378 = vmatprep.subr.bf16.mxu0 %v4283_v42  ;;  %v3905_v42 = vpop.f32.mrf.mxu0 }
 0x984   :  { %5379 = vmatpush3.bf16.msra.mxu0 %v4275_v9 }
 0x985   :  { %5380 = vmatprep.subr.bf16.mxu0 %v4282_v16 }
 0x987   :  { %5312 = vmatmul.mubr.msk.bf16.gmra.mxu0 %vm2696_vm1, %v6704_v37 }
 0x988   :  { %4078 = vmatprep.mubr.bf16.mxu0 %v7095_v36  ;;  %5381 = vmatpush3.bf16.msra.mxu0 %v4274_v49 }
 0x989   :  { %5382 = vmatprep.subr.bf16.mxu0 %v4281_v11 }
 0x98c   :  { %5383 = vmatpush3.bf16.msra.mxu0 %v4273_v8 }
 0x98d   :  { %5384 = vmatprep.subr.bf16.mxu0 %v4280_v45 }
 0x98f   :  { %5313 = vmatmul.mubr.msk.bf16.gmra.mxu0 %vm2696_vm1, %v6715_v35 }
 0x990   :  { %4088 = vmatprep.mubr.bf16.mxu0 %v7095_v36  ;;  %5385 = vmatpush3.bf16.msra.mxu0 %v4272_v54 }
 0x997   :  { %5314 = vmatmul.mubr.msk.bf16.gmra.mxu0 %vm2696_vm1, %v5826_v40 }
 0x9a3   :  { %v3942_v62 = vpop.f32.mrf.mxu1 }
 0x9a4   :  { %v3943_v47 = vadd.f32 %v3942_v62, %v3889_v44  ;;  %v4267_v44 = vld [vmem:[%s7064_s10 + $0x70] sm:$0xff] }
 0x9a5   :  { %v3944_v19 = vpop.f32.mrf.mxu1 }
 0x9a6   :  { %v3945_v16 = vadd.f32 %v3944_v19, %v3891_v46  ;;  %v4279_v46 = vunpack.c.l.s8.bf16 %v4258_v57  ;;  %v4297_v19 = vunpack.c.l.s8.bf16 %v4267_v44 }
 0x9a7   :  { %v3946_v58 = vpop.f32.mrf.mxu1 }
 0x9a8   :  { %v3947_v49 = vadd.f32 %v3946_v58, %v3893_v61  ;;  %v3964_v43 = vmul.f32 0.000656137, %v3945_v16  ;;  %v4271_v61 = vunpack.c.l.s8.bf16 %v4254_v13  ;;  %5386 = vmatprep.subr.bf16.mxu0 %v4279_v46  ;;  %v4266_v58 = vld [vmem:[%s7064_s10 + $0x68] sm:$0xff]  ;;  %v6764_v16 = vld [vmem:[%s7064_s10 + $0xb8] sm:$0xff] }
 0x9a9   :  { %v3948_v52 = vpop.f32.mrf.mxu1 }
 0x9aa   :  { %v3949_v20 = vadd.f32 %v3948_v52, %v3895_v15  ;;  %v3967_v12 = vmul.f32 0.000656137, %v3947_v49  ;;  %v3963_v15 = vmul.f32 0.000656137, %v3943_v47  ;;  %5387 = vmatpush3.bf16.msra.mxu0 %v4271_v61  ;;  %v4268_v47 = vld [vmem:[%s7064_s10 + $0x78] sm:$0xff]  ;;  %v4296_v52 = vunpack.c.h.s8.bf16 %v4266_v58 }
 0x9ab   :  { %v3952_v33 = vpop.f32.mrf.mxu1  ;;  %v4299_v13 = vunpack.c.l.s8.bf16 %v4268_v47 }
 0x9ac   :  { %v3953_v48 = vadd.f32 %v3952_v33, %v3899_v31  ;;  %v3968_v8 = vmul.f32 0.000656137, %v3949_v20  ;;  %v3988_v31 = vpack.c.bf16 %v3967_v12, %v3963_v15  ;;  %v4262_v33 = vld [vmem:[%s7064_s10 + $0x48] sm:$0xff]  ;;  %v4265_v20 = vld [vmem:[%s7064_s10 + $0x60] sm:$0xff] }
 0x9ad   :  { %v3954_v63 = vpop.f32.mrf.mxu1 }
 0x9ae   :  { %v3955_v39 = vadd.f32 %v3954_v63, %v3901_v56  ;;  %v3971_v23 = vmul.f32 0.000656137, %v3953_v48  ;;  %v3989_v3 = vpack.c.bf16 %v3968_v8, %v3964_v43  ;;  %v4295_v63 = vunpack.c.l.s8.bf16 %v4266_v58 }
 0x9af   :  { %v3956_v5 = vpop.f32.mrf.mxu1  ;;  %v4293_v48 = vunpack.c.l.s8.bf16 %v4265_v20 }
 0x9b0   :  { %v3957_v26 = vadd.f32 %v3956_v5, %v3903_v2  ;;  %v3972_v45 = vmul.f32 0.000656137, %v3955_v39  ;;  %v4288_v2 = vunpack.c.h.s8.bf16 %v4262_v33  ;;  %v4287_v5 = vunpack.c.l.s8.bf16 %v4262_v33 }
 0x9b1   :  { %v3958_v9 = vpop.f32.mrf.mxu1  ;;  %v4294_v39 = vunpack.c.h.s8.bf16 %v4265_v20 }
 0x9b2   :  { %v3959_v60 = vadd.f32 %v3958_v9, %v3905_v42  ;;  %v3975_v11 = vmul.f32 0.000656137, %v3957_v26  ;;  %v4261_v26 = vld [vmem:[%s7064_s10 + $0x40] sm:$0xff] }
 0x9b3   :  { %v4286_v42 = vunpack.c.h.s8.bf16 %v4261_v26  ;;  %v4285_v9 = vunpack.c.l.s8.bf16 %v4261_v26 }
 0x9b4   :  { %v3976_v54 = vmul.f32 0.000656137, %v3959_v60  ;;  %v3992_v30 = vpack.c.bf16 %v3975_v11, %v3971_v23  ;;  %v4257_v23 = vld [vmem:[%s7064_s10 + $0x20] sm:$0xff]  ;;  %v4595_v60 = vunpack.c.h.s8.bf16 %v6764_v16 }
 0x9b5   :  { %v4278_v43 = vunpack.c.h.s8.bf16 %v4257_v23  ;;  %v4277_v12 = vunpack.c.l.s8.bf16 %v4257_v23 }
 0x9b6   :  { %v3993_v24 = vpack.c.bf16 %v3976_v54, %v3972_v45 }
 0x9b7   :  { %5388 = vmatprep.subr.bf16.mxu0 %v4278_v43 }
 0x9b8   :  { %4111 = vmatprep.subr.bf16.mxu1 %v3993_v24 }
 0x9b9   :  { %4112 = vmatpush1.bf16.msra.mxu1 %v3992_v30 }
 0x9ba   :  { %4113 = vmatprep.subr.bf16.mxu1 %v3989_v3  ;;  %v4253_v3 = vld [vmem:[%s7064_s10] sm:$0xff] }
 0x9bb   :  { %v4270_v30 = vunpack.c.h.s8.bf16 %v4253_v3  ;;  %v4269_v24 = vunpack.c.l.s8.bf16 %v4253_v3 }
 0x9bd   :  { %4114 = vmatpush1.bf16.msra.mxu1 %v3988_v31  ;;  %5389 = vmatpush3.bf16.msra.mxu0 %v4270_v30 }
 0x9be   :  { %5390 = vmatprep.subr.bf16.mxu0 %v4277_v12 }
 0x9c0   :  { %5315 = vmatmul.mubr.msk.bf16.vlgmr.msra.gmra.mxu1 %vm2696_vm1, %v6693_v1  ;;  %v4264_v1 = vld [vmem:[%s7064_s10 + $0x58] sm:$0xff] }
 0x9c1   :  { %4141 = vmatprep.mubr.bf16.mxu1 %v7095_v36  ;;  %5391 = vmatpush3.bf16.msra.mxu0 %v4269_v24  ;;  %v4292_v57 = vunpack.c.h.s8.bf16 %v4264_v1 }
 0x9c8   :  { %5316 = vmatmul.mubr.msk.bf16.gmra.mxu1 %vm2696_vm1, %v6704_v37  ;;  %v4300_v37 = vunpack.c.h.s8.bf16 %v4268_v47 }
 0x9c9   :  { %4151 = vmatprep.mubr.bf16.mxu1 %v7095_v36 }
 0x9ca   :  { %5416 = vmatprep.subr.bf16.mxu1 %v4300_v37 }
 0x9cb   :  { %5417 = vmatpush3.bf16.msra.mxu1 %v4292_v57 }
 0x9cc   :  { %5418 = vmatprep.subr.bf16.mxu1 %v4299_v13 }
 0x9d0   :  { %5317 = vmatmul.mubr.msk.bf16.gmra.mxu1 %vm2696_vm1, %v6715_v35  ;;  %v4298_v35 = vunpack.c.h.s8.bf16 %v4267_v44 }
 0x9d1   :  { %4161 = vmatprep.mubr.bf16.mxu1 %v7095_v36  ;;  %v4291_v36 = vunpack.c.l.s8.bf16 %v4264_v1 }
 0x9d3   :  { %5419 = vmatpush3.bf16.msra.mxu1 %v4291_v36 }
 0x9d4   :  { %5420 = vmatprep.subr.bf16.mxu1 %v4298_v35 }
 0x9d8   :  { %5318 = vmatmul.mubr.msk.bf16.gmra.mxu1 %vm2696_vm1, %v5826_v40  ;;  %v4263_v40 = vld [vmem:[%s7064_s10 + $0x50] sm:$0xff] }
 0x9d9   :  { %v4290_v62 = vunpack.c.h.s8.bf16 %v4263_v40  ;;  %v4289_v56 = vunpack.c.l.s8.bf16 %v4263_v40 }
 0x9db   :  { %5421 = vmatpush3.bf16.msra.mxu1 %v4290_v62 }
 0x9dc   :  { %5422 = vmatprep.subr.bf16.mxu1 %v4297_v19 }
 0x9df   :  { %5423 = vmatpush3.bf16.msra.mxu1 %v4289_v56 }
 0x9e0   :  { %5424 = vmatprep.subr.bf16.mxu1 %v4296_v52 }
 0x9e3   :  { %5425 = vmatpush3.bf16.msra.mxu1 %v4288_v2 }
 0x9e4   :  { %5426 = vmatprep.subr.bf16.mxu1 %v4295_v63 }
 0x9e7   :  { %5427 = vmatpush3.bf16.msra.mxu1 %v4287_v5 }
 0x9e8   :  { %5428 = vmatprep.subr.bf16.mxu1 %v4294_v39 }
 0x9eb   :  { %5429 = vmatpush3.bf16.msra.mxu1 %v4286_v42 }
 0x9ec   :  { %5430 = vmatprep.subr.bf16.mxu1 %v4293_v48 }
 0x9ef   :  { %5431 = vmatpush3.bf16.msra.mxu1 %v4285_v9 }
 0x9f0   :  { %5464 = vmatprep.subr.bf16.mxu1 %v4595_v60 }
 0xa3f   :  { %v4060_v49 = vpop.f32.mrf.mxu0 }
 0xa40   :  { %v4172_v8 = vadd.f32 %v4060_v49, %v6575_v53 }
 0xa41   :  { %v4062_v11 = vpop.f32.mrf.mxu0 }
 0xa42   :  { %v4173_v54 = vadd.f32 %v4062_v11, %v6581_v18  ;;  %v4204_v46 = vmax.f32 %v4172_v8, 0.0 }
 0xa43   :  { %v4064_v45 = vpop.f32.mrf.mxu0 }
 0xa44   :  { %v4176_v15 = vadd.f32 %v4064_v45, %v6585_v0  ;;  %v4205_v3 = vmax.f32 %v4173_v54, 0.0 }
 0xa45   :  { %v4066_v31 = vpop.f32.mrf.mxu0 }
 0xa46   :  { %v4208_v61 = vmax.f32 %v4176_v15, 0.0  ;;  %v4177_v23 = vadd.f32 %v4066_v31, %v6588_v59 }
 0xa47   :  { %v4070_v43 = vpop.f32.mrf.mxu0 }
 0xa48   :  { %v6771_v30 = vpack.c.bf16 %v4208_v61, %v4204_v46  ;;  %v4209_v12 = vmax.f32 %v4177_v23, 0.0  ;;  %v4180_v53 = vadd.f32 %v4070_v43, %v6590_v29 }
 0xa49   :  { %v4072_v24 = vpop.f32.mrf.mxu0 }
 0xa4a   :  { %v6773_v47 = vpack.c.bf16 %v4209_v12, %v4205_v3  ;;  %v4181_v18 = vadd.f32 %v4072_v24, %v6595_v17  ;;  %v4212_v59 = vmax.f32 %v4180_v53, 0.0  ;;  %v5331_v3 = vld [vmem:[%s7064_s10 + $0x98] sm:$0xff] }
 0xa4b   :  { %v4074_v1 = vpop.f32.mrf.mxu0 }
 0xa4c   :  { %v4184_v0 = vadd.f32 %v4074_v1, %v6600_v27  ;;  %4333 = vmatprep.mubr.bf16.mxu0 %v6773_v47  ;;  %v4213_v36 = vmax.f32 %v4181_v18, 0.0 }
 0xa4d   :  { %v4076_v37 = vpop.f32.mrf.mxu0  ;;  %4334 = vmatmul.mubr.bf16.vlgmr.msra.gmra.mxu0 %v6771_v30 }
 0xa4e   :  { %v4216_v57 = vmax.f32 %v4184_v0, 0.0  ;;  %v4185_v13 = vadd.f32 %v4076_v37, %v6603_v7  ;;  %v4594_v0 = vunpack.c.l.s8.bf16 %v6764_v16 }
 0xa4f   :  { %v4080_v44 = vpop.f32.mrf.mxu0 }
 0xa50   :  { %v6781_v35 = vpack.c.bf16 %v4216_v57, %v4212_v59  ;;  %v4217_v40 = vmax.f32 %v4185_v13, 0.0  ;;  %v4188_v17 = vadd.f32 %v4080_v44, %v6605_v51  ;;  %v5334_v59 = vld [vmem:[%s7064_s10 + $0xb0] sm:$0xff] }
 0xa51   :  { %v4082_v29 = vpop.f32.mrf.mxu0 }
 0xa52   :  { %v6783_v62 = vpack.c.bf16 %v4217_v40, %v4213_v36  ;;  %v4189_v19 = vadd.f32 %v4082_v29, %v6609_v6  ;;  %v4220_v7 = vmax.f32 %v4188_v17, 0.0  ;;  %v4586_v40 = vunpack.c.l.s8.bf16 %v5331_v3 }
 0xa53   :  { %v4084_v27 = vpop.f32.mrf.mxu0 }
 0xa54   :  { %v4192_v58 = vadd.f32 %v4084_v27, %v6613_v50  ;;  %4341 = vmatprep.mubr.bf16.mxu0 %v6783_v62  ;;  %v4221_v63 = vmax.f32 %v4189_v19, 0.0 }
 0xa55   :  { %v4086_v56 = vpop.f32.mrf.mxu0  ;;  %4342 = vmatmul.mubr.bf16.gmra.mxu0 %v6781_v35 }
 0xa56   :  { %v4224_v52 = vmax.f32 %v4192_v58, 0.0  ;;  %v4193_v33 = vadd.f32 %v4086_v56, %v6616_v32  ;;  %v7130_v56 = vld [vmem:[#allocation20_spill] sm:$0xff] }
 0xa57   :  { %v4090_v2 = vpop.f32.mrf.mxu0 }
 0xa58   :  { %v6791_v5 = vpack.c.bf16 %v4224_v52, %v4220_v7  ;;  %v4225_v20 = vmax.f32 %v4193_v33, 0.0  ;;  %v4196_v6 = vadd.f32 %v4090_v2, %v6618_v4  ;;  %v4592_v2 = vunpack.c.l.s8.bf16 %v5334_v59 }
 0xa59   :  { %v4092_v51 = vpop.f32.mrf.mxu0 }
 0xa5a   :  { %v6793_v39 = vpack.c.bf16 %v4225_v20, %v4221_v63  ;;  %v4197_v26 = vadd.f32 %v4092_v51, %v6622_v55  ;;  %v4228_v32 = vmax.f32 %v4196_v6, 0.0  ;;  %v7131_v63 = vld [vmem:[#allocation37_spill] sm:$0xff]  ;;  %v7132_v51 = vld [vmem:[#allocation22_spill] sm:$0xff] }
 0xa5b   :  { %v4094_v50 = vpop.f32.mrf.mxu0 }
 0xa5c   :  { %v4200_v42 = vadd.f32 %v4094_v50, %v6626_v34  ;;  %4349 = vmatprep.mubr.bf16.mxu0 %v6793_v39  ;;  %v4229_v49 = vmax.f32 %v4197_v26, 0.0  ;;  %v5333_v50 = vld [vmem:[%s7064_s10 + $0xa8] sm:$0xff] }
 0xa5d   :  { %v4096_v48 = vpop.f32.mrf.mxu0  ;;  %4350 = vmatmul.mubr.bf16.gmra.mxu0 %v6791_v5 }
 0xa5e   :  { %v4232_v9 = vmax.f32 %v4200_v42, 0.0  ;;  %v4201_v60 = vadd.f32 %v4096_v48, %v6628_v21 }
 0xa60   :  { %v6801_v11 = vpack.c.bf16 %v4232_v9, %v4228_v32  ;;  %v4233_v8 = vmax.f32 %v4201_v60, 0.0  ;;  %v7133_v32 = vld [vmem:[#allocation24_spill] sm:$0xff] }
 0xa62   :  { %7127 = vst [vmem:[#allocation28_spill] sm:$0xff] %v6801_v11  ;;  %v6803_v45 = vpack.c.bf16 %v4233_v8, %v4229_v49  ;;  %v4591_v8 = vunpack.c.h.s8.bf16 %v5333_v50 }
 0xa64   :  { %7128 = vst [vmem:[#allocation27_spill] sm:$0xff] %v6803_v45  ;;  %4357 = vmatprep.mubr.bf16.mxu0 %v6803_v45 }
 0xa65   :  { %4358 = vmatmul.mubr.bf16.gmra.mxu0 %v6801_v11 }
 0xa80   :  { %v4133_v4 = vpop.f32.mrf.mxu1 }
 0xa81   :  { %v4174_v34 = vadd.f32 %v4133_v4, %v6636_v14  ;;  %v5329_v4 = vld [vmem:[%s7064_s10 + $0x88] sm:$0xff] }
 0xa82   :  { %v4135_v55 = vpop.f32.mrf.mxu1 }
 0xa83   :  { %v4175_v15 = vadd.f32 %v4135_v55, %v6640_v41  ;;  %v4206_v46 = vmax.f32 %v4174_v34, 0.0 }
 0xa84   :  { %v4137_v54 = vpop.f32.mrf.mxu1 }
 0xa85   :  { %v4178_v31 = vadd.f32 %v4137_v54, %v6644_v25  ;;  %v4207_v12 = vmax.f32 %v4175_v15, 0.0  ;;  %v4587_v25 = vunpack.c.h.s8.bf16 %v5331_v3  ;;  %v7135_v3 = vld [vmem:[#allocation25_spill] sm:$0xff] }
 0xa86   :  { %v4139_v21 = vpop.f32.mrf.mxu1 }
 0xa87   :  { %v4210_v61 = vmax.f32 %v4178_v31, 0.0  ;;  %v4179_v23 = vadd.f32 %v4139_v21, %v6647_v10  ;;  %v7134_v21 = vld [vmem:[#allocation23_spill] sm:$0xff] }
 0xa88   :  { %v4143_v43 = vpop.f32.mrf.mxu1 }
 0xa89   :  { %v6814_v24 = vpack.c.bf16 %v4210_v61, %v4206_v46  ;;  %v4211_v53 = vmax.f32 %v4179_v23, 0.0  ;;  %v4182_v41 = vadd.f32 %v4143_v43, %v6649_v28  ;;  %v7129_v28 = vld [vmem:[#allocation36_spill] sm:$0xff]  ;;  %v4583_v61 = vunpack.c.h.s8.bf16 %v5329_v4 }
 0xa8a   :  { %v4145_v14 = vpop.f32.mrf.mxu1  ;;  %v4590_v43 = vunpack.c.l.s8.bf16 %v5333_v50 }
 0xa8b   :  { %v6816_v1 = vpack.c.bf16 %v4211_v53, %v4207_v12  ;;  %v4183_v10 = vadd.f32 %v4145_v14, %v6653_v22  ;;  %v4214_v13 = vmax.f32 %v4182_v41, 0.0  ;;  %v4593_v22 = vunpack.c.h.s8.bf16 %v5334_v59  ;;  %v7136_v53 = vld [vmem:[#allocation21_spill] sm:$0xff]  ;;  %v5332_v41 = vld [vmem:[%s7064_s10 + $0xa0] sm:$0xff] }
 0xa8c   :  { %v4147_v18 = vpop.f32.mrf.mxu1  ;;  %v4582_v59 = vunpack.c.l.s8.bf16 %v5329_v4 }
 0xa8d   :  { %v4186_v37 = vadd.f32 %v4147_v18, %v6657_v38  ;;  %4398 = vmatprep.mubr.bf16.mxu1 %v6816_v1  ;;  %v5330_v38 = vld [vmem:[%s7064_s10 + $0x90] sm:$0xff]  ;;  %v4215_v29 = vmax.f32 %v4183_v10, 0.0  ;;  %v7137_v10 = vld [vmem:[#allocation26_spill] sm:$0xff] }
 0xa8e   :  { %v4149_v57 = vpop.f32.mrf.mxu1  ;;  %4399 = vmatmul.mubr.bf16.vlgmr.msra.gmra.mxu1 %v6814_v24  ;;  %v4585_v52 = vunpack.c.h.s8.bf16 %v5330_v38  ;;  %v4584_v60 = vunpack.c.l.s8.bf16 %v5330_v38 }
 0xa8f   :  { %v4218_v44 = vmax.f32 %v4186_v37, 0.0  ;;  %v4187_v36 = vadd.f32 %v4149_v57, %v7129_v28  ;;  %5465 = vmatpush3.bf16.msra.mxu1 %v4587_v25  ;;  %v4589_v57 = vunpack.c.h.s8.bf16 %v5332_v41 }
 0xa90   :  { %v4153_v16 = vpop.f32.mrf.mxu1  ;;  %5466 = vmatprep.subr.bf16.mxu1 %v4594_v0 }
 0xa91   :  { %v6831_v17 = vpack.c.bf16 %v4218_v44, %v4214_v13  ;;  %v4219_v27 = vmax.f32 %v4187_v36, 0.0  ;;  %v4190_v7 = vadd.f32 %v4153_v16, %v7130_v56  ;;  %v5328_v13 = vld [vmem:[%s7064_s10 + $0x80] sm:$0xff] }
 0xa92   :  { %v4155_v19 = vpop.f32.mrf.mxu1  ;;  %v4581_v16 = vunpack.c.h.s8.bf16 %v5328_v13  ;;  %v4580_v38 = vunpack.c.l.s8.bf16 %v5328_v13 }
 0xa93   :  { %v6833_v58 = vpack.c.bf16 %v4219_v27, %v4215_v29  ;;  %5467 = vmatpush3.bf16.msra.mxu1 %v4586_v40  ;;  %v4191_v20 = vadd.f32 %v4155_v19, %v7131_v63  ;;  %v4222_v42 = vmax.f32 %v4190_v7, 0.0  ;;  %v5827_v29 = vld [vmem:[#allocation13] sm:$0xff]  }
 0xa94   :  { %v4157_v33 = vpop.f32.mrf.mxu1  ;;  %5468 = vmatprep.subr.bf16.mxu1 %v4593_v22  ;;  %v4588_v22 = vunpack.c.l.s8.bf16 %v5332_v41  ;;  %5648 = vmatprep.mubr.msk.bf16.mxu0 %vm4471_vm2, %v5827_v29 }
 0xa95   :  { %v4194_v6 = vadd.f32 %v4157_v33, %v7132_v51  ;;  %4406 = vmatprep.mubr.bf16.mxu1 %v6833_v58  ;;  %v4223_v55 = vmax.f32 %v4191_v20, 0.0 }
 0xa96   :  { %v4159_v26 = vpop.f32.mrf.mxu1  ;;  %4407 = vmatmul.mubr.bf16.gmra.mxu1 %v6831_v17 }
 0xa97   :  { %v4226_v48 = vmax.f32 %v4194_v6, 0.0  ;;  %v4195_v9 = vadd.f32 %v4159_v26, %v7133_v32  ;;  %5469 = vmatpush3.bf16.msra.mxu1 %v4585_v52 }
 0xa98   :  { %v4163_v49 = vpop.f32.mrf.mxu1  ;;  %5470 = vmatprep.subr.bf16.mxu1 %v4592_v2 }
 0xa99   :  { %v6847_v34 = vpack.c.bf16 %v4226_v48, %v4222_v42  ;;  %v4227_v54 = vmax.f32 %v4195_v9, 0.0  ;;  %v4198_v46 = vadd.f32 %v4163_v49, %v7134_v21 }
 0xa9a   :  { %v4165_v15 = vpop.f32.mrf.mxu1 }
 0xa9b   :  { %v6849_v31 = vpack.c.bf16 %v4227_v54, %v4223_v55  ;;  %5471 = vmatpush3.bf16.msra.mxu1 %v4584_v60  ;;  %v4199_v12 = vadd.f32 %v4165_v15, %v7135_v3  ;;  %v4230_v18 = vmax.f32 %v4198_v46, 0.0 }
 0xa9c   :  { %v4167_v23 = vpop.f32.mrf.mxu1  ;;  %5472 = vmatprep.subr.bf16.mxu1 %v4591_v8 }
 0xa9d   :  { %v4202_v14 = vadd.f32 %v4167_v23, %v7136_v53  ;;  %4414 = vmatprep.mubr.bf16.mxu1 %v6849_v31  ;;  %v4231_v44 = vmax.f32 %v4199_v12, 0.0 }
 0xa9e   :  { %v4169_v25 = vpop.f32.mrf.mxu1  ;;  %4415 = vmatmul.mubr.bf16.gmra.mxu1 %v6847_v34 }
 0xa9f   :  { %v4234_v0 = vmax.f32 %v4202_v14, 0.0  ;;  %v4203_v37 = vadd.f32 %v4169_v25, %v7137_v10  ;;  %5473 = vmatpush3.bf16.msra.mxu1 %v4583_v61 }
 0xaa0   :  { %5474 = vmatprep.subr.bf16.mxu1 %v4590_v43 }
 0xaa1   :  { %v6863_v28 = vpack.c.bf16 %v4234_v0, %v4230_v18  ;;  %v4235_v36 = vmax.f32 %v4203_v37, 0.0 }
 0xaa3   :  { %v6865_v40 = vpack.c.bf16 %v4235_v36, %v4231_v44  ;;  %5475 = vmatpush3.bf16.msra.mxu1 %v4582_v59 }
 0xaa4   :  { %5476 = vmatprep.subr.bf16.mxu1 %v4589_v57 }
 0xaa5   :  { %4422 = vmatprep.mubr.bf16.mxu1 %v6865_v40 }
 0xaa6   :  { %4423 = vmatmul.mubr.bf16.gmra.mxu1 %v6863_v28 }
 0xaa7   :  { %5477 = vmatpush3.bf16.msra.mxu1 %v4581_v16  ;;  %4644 = vmatprep.mubr.bf16.mxu1 %v6773_v47 }
 0xaa8   :  { %5478 = vmatprep.subr.bf16.mxu1 %v4588_v22 }
 0xaab   :  { %5479 = vmatpush3.bf16.msra.mxu1 %v4580_v38 }
 0xaae   :  { %4645 = vmatmul.mubr.bf16.vlgmr.msra.gmra.mxu1 %v6771_v30 }
 0xaaf   :  { %4652 = vmatprep.mubr.bf16.mxu1 %v6783_v62 }
 0xab6   :  { %4653 = vmatmul.mubr.bf16.gmra.mxu1 %v6781_v35 }
 0xab7   :  { %4660 = vmatprep.mubr.bf16.mxu1 %v6793_v39 }
 0xabe   :  { %4661 = vmatmul.mubr.bf16.gmra.mxu1 %v6791_v5 }
 0xabf   :  { %4668 = vmatprep.mubr.bf16.mxu1 %v6803_v45 }
 0xac6   :  { %4669 = vmatmul.mubr.bf16.gmra.mxu1 %v6801_v11 }
 0xb0d   :  { %v5392_v27 = vpop.f32.mrf.mxu0 }
 0xb0f   :  { %v5393_v19 = vpop.f32.mrf.mxu0 }
 0xb11   :  { %v5395_v56 = vpop.f32.mrf.mxu0 }
 0xb13   :  { %v5396_v7 = vpop.f32.mrf.mxu0 }
 0xb15   :  { %v5398_v52 = vpop.f32.mrf.mxu0 }
 0xb17   :  { %v5399_v33 = vpop.f32.mrf.mxu0 }
 0xb18   :  { %v5400_v29 = vadd.f32 %v5399_v33, %v5398_v52 }
 0xb19   :  { %v5401_v2 = vpop.f32.mrf.mxu0 }
 0xb1b   :  { %v5402_v63 = vpop.f32.mrf.mxu0 }
 0xb1c   :  { %v5403_v36 = vadd.f32 %v5402_v63, %v5401_v2 }
 0xb1d   :  { %v5404_v20 = vpop.f32.mrf.mxu0 }
 0xb1f   :  { %v5405_v50 = vpop.f32.mrf.mxu0 }
 0xb20   :  { %v5406_v0 = vadd.f32 %v5405_v50, %v5404_v20 }
 0xb21   :  { %v5407_v48 = vpop.f32.mrf.mxu0 }
 0xb23   :  { %v5408_v60 = vpop.f32.mrf.mxu0 }
 0xb24   :  { %v5409_v41 = vadd.f32 %v5408_v60, %v5407_v48  ;;  %v5397_v48 = vadd.f32 %v5396_v7, %v5395_v56  ;;  %v5343_v56 = vld [vmem:[%s7064_s10 + $0xf8] sm:$0xff] }
 0xb25   :  { %v5410_v4 = vpop.f32.mrf.mxu0 }
 0xb27   :  { %v5411_v15 = vpop.f32.mrf.mxu0 }
 0xb28   :  { %v5412_v25 = vadd.f32 %v5411_v15, %v5410_v4  ;;  %v5338_v15 = vld [vmem:[%s7064_s10 + $0xd0] sm:$0xff] }
 0xb29   :  { %v5413_v61 = vpop.f32.mrf.mxu0 }
 0xb2b   :  { %v5414_v3 = vpop.f32.mrf.mxu0 }
 0xb2c   :  { %v5415_v10 = vadd.f32 %v5414_v3, %v5413_v61  ;;  %v5830_v61 = vld [vmem:[#allocation13 + $0x18] sm:$0xff]  }
 0xb4e   :  { %v5432_v51 = vpop.f32.mrf.mxu1 }
 0xb50   :  { %v5433_v6 = vpop.f32.mrf.mxu1 }
 0xb51   :  { %v5434_v60 = vadd.f32 %v5433_v6, %v5432_v51  ;;  %v5829_v51 = vld [vmem:[#allocation13 + $0x10] sm:$0xff]   ;;  %v4610_v6 = vunpack.c.l.s8.bf16 %v5343_v56 }
 0xb52   :  { %v5435_v26 = vpop.f32.mrf.mxu1 }
 0xb54   :  { %v5436_v42 = vpop.f32.mrf.mxu1 }
 0xb55   :  { %v5437_v11 = vadd.f32 %v5436_v42, %v5435_v26  ;;  %v5342_v42 = vld [vmem:[%s7064_s10 + $0xf0] sm:$0xff] }
 0xb56   :  { %v5438_v32 = vpop.f32.mrf.mxu1  ;;  %v4608_v3 = vunpack.c.l.s8.bf16 %v5342_v42 }
 0xb58   :  { %v5439_v9 = vpop.f32.mrf.mxu1 }
 0xb59   :  { %v5440_v16 = vadd.f32 %v5439_v9, %v5438_v32  ;;  %v4609_v9 = vunpack.c.h.s8.bf16 %v5342_v42 }
 0xb5a   :  { %v5441_v49 = vpop.f32.mrf.mxu1 }
 0xb5b   :  { %v4409_v4 = vadd.f32 %v5440_v16, %v5400_v29 }
 0xb5c   :  { %v5442_v8 = vpop.f32.mrf.mxu1 }
 0xb5d   :  { %v5443_v59 = vadd.f32 %v5442_v8, %v5441_v49  ;;  %v4404_v49 = vadd.f32 %v5437_v11, %v5397_v48  ;;  %v4433_v63 = vmul.f32 0.002603962, %v4409_v4  ;;  %v4611_v11 = vunpack.c.h.s8.bf16 %v5343_v56  ;;  %v5354_v48 = vld [vmem:[%s7064_s10 + $0x110] sm:$0xff] }
 0xb5e   :  { %v5444_v55 = vpop.f32.mrf.mxu1 }
 0xb5f   :  { %v4412_v45 = vadd.f32 %v5443_v59, %v5403_v36  ;;  %v4432_v52 = vmul.f32 0.002603962, %v4404_v49  ;;  %v5336_v59 = vld [vmem:[%s7064_s10 + $0xc0] sm:$0xff]  ;;  %v5353_v49 = vld [vmem:[%s7064_s10 + $0x108] sm:$0xff] }
 0xb60   :  { %v5445_v54 = vpop.f32.mrf.mxu1  ;;  %v4596_v36 = vunpack.c.l.s8.bf16 %v5336_v59 }
 0xb61   :  { %v5446_v18 = vadd.f32 %v5445_v54, %v5444_v55  ;;  %v5394_v55 = vadd.f32 %v5393_v19, %v5392_v27  ;;  %v4434_v8 = vmul.f32 0.002603962, %v4412_v45  ;;  %v5339_v45 = vld [vmem:[%s7064_s10 + $0xd8] sm:$0xff] }
 0xb62   :  { %v5447_v21 = vpop.f32.mrf.mxu1  ;;  %v5828_v27 = vld [vmem:[#allocation13 + $0x8] sm:$0xff]   ;;  %v4603_v19 = vunpack.c.h.s8.bf16 %v5339_v45  ;;  %v4602_v32 = vunpack.c.l.s8.bf16 %v5339_v45  ;;  %v7139_v45 = vld [vmem:[#allocation28_spill] sm:$0xff] }
 0xb63   :  { %v4417_v22 = vadd.f32 %v5446_v18, %v5406_v0  ;;  %v4401_v2 = vadd.f32 %v5434_v60, %v5394_v55  ;;  %v4448_v33 = vpack.c.bf16 %v4434_v8, %v4433_v63  ;;  %v5340_v0 = vld [vmem:[%s7064_s10 + $0xe0] sm:$0xff]  ;;  %v4890_v60 = vunpack.c.h.s8.bf16 %v5354_v48 }
 0xb64   :  { %v5448_v46 = vpop.f32.mrf.mxu1  ;;  %v4888_v8 = vunpack.c.h.s8.bf16 %v5353_v49  ;;  %v4887_v63 = vunpack.c.l.s8.bf16 %v5353_v49 }
 0xb65   :  { %v5449_v12 = vadd.f32 %v5448_v46, %v5447_v21  ;;  %v4435_v20 = vmul.f32 0.002603962, %v4417_v22  ;;  %v4431_v26 = vmul.f32 0.002603962, %v4401_v2  ;;  %v5355_v22 = vld [vmem:[%s7064_s10 + $0x118] sm:$0xff]  ;;  %v5356_v2 = vld [vmem:[%s7064_s10 + $0x120] sm:$0xff] }
 0xb66   :  { %v5450_v23 = vpop.f32.mrf.mxu1  ;;  %v4893_v56 = vunpack.c.l.s8.bf16 %v5356_v2 }
 0xb67   :  { %v4420_v57 = vadd.f32 %v5449_v12, %v5409_v41  ;;  %v4447_v7 = vpack.c.bf16 %v4432_v52, %v4431_v26  ;;  %v5341_v12 = vld [vmem:[%s7064_s10 + $0xe8] sm:$0xff]  ;;  %v4894_v52 = vunpack.c.h.s8.bf16 %v5356_v2 }
 0xb68   :  { %v5451_v43 = vpop.f32.mrf.mxu1  ;;  %v5337_v41 = vld [vmem:[%s7064_s10 + $0xc8] sm:$0xff]  ;;  %v4606_v18 = vunpack.c.l.s8.bf16 %v5341_v12 }
 0xb69   :  { %v5452_v53 = vadd.f32 %v5451_v43, %v5450_v23  ;;  %v4436_v21 = vmul.f32 0.002603962, %v4420_v57  ;;  %v4601_v43 = vunpack.c.h.s8.bf16 %v5338_v15  ;;  %v4597_v57 = vunpack.c.h.s8.bf16 %v5336_v59 }
 0xb6a   :  { %v5453_v14 = vpop.f32.mrf.mxu1 }
 0xb6b   :  { %v4425_v13 = vadd.f32 %v5452_v53, %v5412_v25  ;;  %v4449_v54 = vpack.c.bf16 %v4436_v21, %v4435_v20  ;;  %v4600_v53 = vunpack.c.l.s8.bf16 %v5338_v15  ;;  %v4599_v25 = vunpack.c.h.s8.bf16 %v5337_v41  ;;  %v5358_v21 = vld [vmem:[%s7064_s10 + $0x130] sm:$0xff]  ;;  %v5357_v20 = vld [vmem:[%s7064_s10 + $0x128] sm:$0xff] }
 0xb6c   :  { %v5454_v37 = vpop.f32.mrf.mxu1  ;;  %v4897_v4 = vunpack.c.l.s8.bf16 %v5358_v21  ;;  %v4896_v55 = vunpack.c.h.s8.bf16 %v5357_v20 }
 0xb6d   :  { %v5455_v44 = vadd.f32 %v5454_v37, %v5453_v14  ;;  %v4437_v46 = vmul.f32 0.002603962, %v4425_v13  ;;  %v4607_v14 = vunpack.c.h.s8.bf16 %v5341_v12  ;;  %v4605_v37 = vunpack.c.h.s8.bf16 %v5340_v0 }
 0xb6e   :  { %v4604_v13 = vunpack.c.l.s8.bf16 %v5340_v0 }
 0xb6f   :  { %v4428_v38 = vadd.f32 %v5455_v44, %v5415_v10  ;;  %v4598_v10 = vunpack.c.l.s8.bf16 %v5337_v41  ;;  %v5359_v44 = vld [vmem:[%s7064_s10 + $0x138] sm:$0xff] }
 0xb70   :  { %v4900_v16 = vunpack.c.h.s8.bf16 %v5359_v44  ;;  %v4899_v29 = vunpack.c.l.s8.bf16 %v5359_v44 }
 0xb71   :  { %v4438_v23 = vmul.f32 0.002603962, %v4428_v38  ;;  %v4892_v38 = vunpack.c.h.s8.bf16 %v5355_v22 }
 0xb73   :  { %v4450_v50 = vpack.c.bf16 %v4438_v23, %v4437_v46  ;;  %v4891_v46 = vunpack.c.l.s8.bf16 %v5355_v22  ;;  %v4898_v23 = vunpack.c.h.s8.bf16 %v5358_v21 }
 0xb75   :  { %5640 = vmatprep.subr.bf16.mxu0 %v4450_v50 }
 0xb76   :  { %5641 = vmatpush3.bf16.msra.mxu0 %v4450_v50  ;;  %v4889_v50 = vunpack.c.l.s8.bf16 %v5354_v48 }
 0xb77   :  { %5642 = vmatprep.subr.bf16.mxu0 %v4449_v54 }
 0xb7a   :  { %5643 = vmatpush3.bf16.msra.mxu0 %v4449_v54  ;;  %v4895_v54 = vunpack.c.l.s8.bf16 %v5357_v20 }
 0xb7b   :  { %5644 = vmatprep.subr.bf16.mxu0 %v4448_v33 }
 0xb7e   :  { %5645 = vmatpush3.bf16.msra.mxu0 %v4448_v33  ;;  %v5352_v33 = vld [vmem:[%s7064_s10 + $0x100] sm:$0xff] }
 0xb7f   :  { %5646 = vmatprep.subr.bf16.mxu0 %v4447_v7  ;;  %v4886_v26 = vunpack.c.h.s8.bf16 %v5352_v33 }
 0xb82   :  { %5647 = vmatpush3.bf16.msra.mxu0 %v4447_v7  ;;  %v4885_v7 = vunpack.c.l.s8.bf16 %v5352_v33 }
 0xb83   :  { %5504 = vmatprep.subr.bf16.mxu0 %v4611_v11  ;;  %v7138_v11 = vld [vmem:[#allocation27_spill] sm:$0xff] }
 0xb85   :  { %5649 = vmatmul.mubr.msk.bf16.vlgmr.msra.gmra.mxu0 %vm4471_vm2, %v5828_v27  ;;  %v5831_v27 = vld [vmem:[#allocation13 + $0x20] sm:$0xff]  }
 0xb86   :  { %5505 = vmatpush3.bf16.msra.mxu0 %v4603_v19  ;;  %5652 = vmatprep.mubr.msk.bf16.mxu0 %vm4471_vm2, %v5829_v51 }
 0xb87   :  { %5506 = vmatprep.subr.bf16.mxu0 %v4610_v6  ;;  %5664 = vmatprep.mubr.msk.bf16.mxu1 %vm4471_vm2, %v5831_v27 }
 0xb8a   :  { %5507 = vmatpush3.bf16.msra.mxu0 %v4602_v32 }
 0xb8b   :  { %5508 = vmatprep.subr.bf16.mxu0 %v4609_v9 }
 0xb8d   :  { %5653 = vmatmul.mubr.msk.bf16.gmra.mxu0 %vm4471_vm2, %v5830_v61 }
 0xb8e   :  { %5509 = vmatpush3.bf16.msra.mxu0 %v4601_v43  ;;  %4709 = vmatprep.mubr.bf16.mxu0 %v6816_v1 }
 0xb8f   :  { %5510 = vmatprep.subr.bf16.mxu0 %v4608_v3 }
 0xb92   :  { %5511 = vmatpush3.bf16.msra.mxu0 %v4600_v53 }
 0xb93   :  { %5512 = vmatprep.subr.bf16.mxu0 %v4607_v14 }
 0xb96   :  { %5513 = vmatpush3.bf16.msra.mxu0 %v4599_v25 }
 0xb97   :  { %5514 = vmatprep.subr.bf16.mxu0 %v4606_v18 }
 0xb9a   :  { %5515 = vmatpush3.bf16.msra.mxu0 %v4598_v10 }
 0xb9b   :  { %5516 = vmatprep.subr.bf16.mxu0 %v4605_v37 }
 0xb9e   :  { %5517 = vmatpush3.bf16.msra.mxu0 %v4597_v57 }
 0xb9f   :  { %5518 = vmatprep.subr.bf16.mxu0 %v4604_v13 }
 0xba2   :  { %5519 = vmatpush3.bf16.msra.mxu0 %v4596_v36 }
 0xba3   :  { %5552 = vmatprep.subr.bf16.mxu0 %v4900_v16 }
 0xba5   :  { %4710 = vmatmul.mubr.bf16.vlgmr.msra.gmra.mxu0 %v6814_v24 }
 0xba6   :  { %4717 = vmatprep.mubr.bf16.mxu0 %v6833_v58  ;;  %5553 = vmatpush3.bf16.msra.mxu0 %v4892_v38 }
 0xba7   :  { %5554 = vmatprep.subr.bf16.mxu0 %v4899_v29 }
 0xbaa   :  { %5555 = vmatpush3.bf16.msra.mxu0 %v4891_v46 }
 0xbab   :  { %5556 = vmatprep.subr.bf16.mxu0 %v4898_v23 }
 0xbad   :  { %4718 = vmatmul.mubr.bf16.gmra.mxu0 %v6831_v17 }
 0xbae   :  { %4725 = vmatprep.mubr.bf16.mxu0 %v6849_v31  ;;  %5557 = vmatpush3.bf16.msra.mxu0 %v4890_v60 }
 0xbaf   :  { %5558 = vmatprep.subr.bf16.mxu0 %v4897_v4 }
 0xbb2   :  { %5559 = vmatpush3.bf16.msra.mxu0 %v4889_v50 }
 0xbb3   :  { %5560 = vmatprep.subr.bf16.mxu0 %v4896_v55 }
 0xbb5   :  { %4726 = vmatmul.mubr.bf16.gmra.mxu0 %v6847_v34 }
 0xbb6   :  { %4733 = vmatprep.mubr.bf16.mxu0 %v6865_v40  ;;  %5561 = vmatpush3.bf16.msra.mxu0 %v4888_v8 }
 0xbb7   :  { %5562 = vmatprep.subr.bf16.mxu0 %v4895_v54 }
 0xbba   :  { %5563 = vmatpush3.bf16.msra.mxu0 %v4887_v63 }
 0xbbb   :  { %5564 = vmatprep.subr.bf16.mxu0 %v4894_v52 }
 0xbbd   :  { %4734 = vmatmul.mubr.bf16.gmra.mxu0 %v6863_v28 }
 0xbbe   :  { %5565 = vmatpush3.bf16.msra.mxu0 %v4886_v26  ;;  %4949 = vmatprep.mubr.bf16.mxu0 %v6773_v47  ;;  %v6946_v47 = vpop.f32.mrf.mxu1 }
 0xbbf   :  { %5566 = vmatprep.subr.bf16.mxu0 %v4893_v56 }
 0xbc0   :  { %v6948_v19 = vpop.f32.mrf.mxu1 }
 0xbc2   :  { %5567 = vmatpush3.bf16.msra.mxu0 %v4885_v7 }
 0xbc5   :  { %4950 = vmatmul.mubr.bf16.vlgmr.msra.gmra.mxu0 %v6771_v30 }
 0xbc6   :  { %4957 = vmatprep.mubr.bf16.mxu0 %v6783_v62  ;;  %v5483_v62 = vpop.f32.mrf.mxu1 }
 0xbcd   :  { %4958 = vmatmul.mubr.bf16.gmra.mxu0 %v6781_v35  ;;  %v5484_v35 = vpop.f32.mrf.mxu1 }
 0xbce   :  { %4965 = vmatprep.mubr.bf16.mxu0 %v6793_v39 }
 0xbd5   :  { %4966 = vmatmul.mubr.bf16.gmra.mxu0 %v6791_v5  ;;  %v5486_v5 = vpop.f32.mrf.mxu1 }
 0xbd6   :  { %4973 = vmatprep.mubr.bf16.mxu0 %v7138_v11 }
 0xbd7   :  { %v5487_v32 = vpop.f32.mrf.mxu1 }
 0xbd8   :  { %v5488_v27 = vadd.f32 %v5487_v32, %v5486_v5 }
 0xbd9   :  { %v5489_v15 = vpop.f32.mrf.mxu1 }
 0xbdb   :  { %v5490_v43 = vpop.f32.mrf.mxu1 }
 0xbdc   :  { %v5491_v56 = vadd.f32 %v5490_v43, %v5489_v15 }
 0xbdd   :  { %4974 = vmatmul.mubr.bf16.gmra.mxu0 %v7139_v45  ;;  %v5492_v12 = vpop.f32.mrf.mxu1 }
 0xbdf   :  { %v5493_v41 = vpop.f32.mrf.mxu1 }
 0xbe0   :  { %v5494_v8 = vadd.f32 %v5493_v41, %v5492_v12 }
 0xbe1   :  { %v5495_v0 = vpop.f32.mrf.mxu1 }
 0xbe3   :  { %v5496_v59 = vpop.f32.mrf.mxu1 }
 0xbe4   :  { %v5497_v50 = vadd.f32 %v5496_v59, %v5495_v0  ;;  %v5485_v0 = vadd.f32 %v5484_v35, %v5483_v62  ;;  %v5367_v62 = vld [vmem:[%s7064_s10 + $0x178] sm:$0xff] }
 0xbe5   :  { %v5498_v44 = vpop.f32.mrf.mxu1 }
 0xbe7   :  { %v5499_v22 = vpop.f32.mrf.mxu1 }
 0xbe8   :  { %v5500_v55 = vadd.f32 %v5499_v22, %v5498_v44  ;;  %v5362_v22 = vld [vmem:[%s7064_s10 + $0x150] sm:$0xff] }
 0xbe9   :  { %v5501_v21 = vpop.f32.mrf.mxu1 }
 0xbeb   :  { %v5502_v48 = vpop.f32.mrf.mxu1 }
 0xbec   :  { %v5503_v54 = vadd.f32 %v5502_v48, %v5501_v21  ;;  %v5834_v21 = vld [vmem:[#allocation13 + $0x38] sm:$0xff]  }
 0xc45   :  { %v6950_v30 = vpop.f32.mrf.mxu0 }
 0xc47   :  { %v6952_v51 = vpop.f32.mrf.mxu0 }
 0xc49   :  { %v6954_v39 = vpop.f32.mrf.mxu0 }
 0xc4b   :  { %v6956_v6 = vpop.f32.mrf.mxu0 }
 0xc4d   :  { %v6958_v42 = vpop.f32.mrf.mxu0 }
 0xc4f   :  { %v6960_v9 = vpop.f32.mrf.mxu0 }
 0xc51   :  { %v6962_v61 = vpop.f32.mrf.mxu0 }
 0xc52   :  { %7140 = vst [vmem:[#allocation29_spill] sm:$0xff] %v6962_v61 }
 0xc53   :  { %v6964_v3 = vpop.f32.mrf.mxu0 }
 0xc54   :  { %7141 = vst [vmem:[#allocation30_spill] sm:$0xff] %v6964_v3 }
 0xc65   :  { %v5520_v53 = vpop.f32.mrf.mxu0 }
 0xc67   :  { %v5521_v14 = vpop.f32.mrf.mxu0 }
 0xc68   :  { %v5522_v59 = vadd.f32 %v5521_v14, %v5520_v53  ;;  %v5833_v53 = vld [vmem:[#allocation13 + $0x30] sm:$0xff]   ;;  %v4915_v14 = vunpack.c.l.s8.bf16 %v5367_v62 }
 0xc69   :  { %v5523_v25 = vpop.f32.mrf.mxu0 }
 0xc6b   :  { %v5524_v18 = vpop.f32.mrf.mxu0 }
 0xc6c   :  { %v5525_v3 = vadd.f32 %v5524_v18, %v5523_v25 }
 0xc6d   :  { %v5526_v10 = vpop.f32.mrf.mxu0 }
 0xc6f   :  { %v5527_v37 = vpop.f32.mrf.mxu0 }
 0xc70   :  { %v5528_v7 = vadd.f32 %v5527_v37, %v5526_v10  ;;  %v5366_v10 = vld [vmem:[%s7064_s10 + $0x170] sm:$0xff] }
 0xc71   :  { %v5529_v57 = vpop.f32.mrf.mxu0  ;;  %v4913_v48 = vunpack.c.l.s8.bf16 %v5366_v10 }
 0xc72   :  { %v4720_v44 = vadd.f32 %v5528_v7, %v5488_v27 }
 0xc73   :  { %v5530_v13 = vpop.f32.mrf.mxu0 }
 0xc74   :  { %v5531_v63 = vadd.f32 %v5530_v13, %v5529_v57  ;;  %v5482_v57 = vadd.f32 %v6948_v19, %v6946_v47  ;;  %v4715_v13 = vadd.f32 %v5525_v3, %v5485_v0  ;;  %v4744_v5 = vmul.f32 0.002603962, %v4720_v44  ;;  %v5363_v19 = vld [vmem:[%s7064_s10 + $0x158] sm:$0xff] }
 0xc75   :  { %v5532_v36 = vpop.f32.mrf.mxu0  ;;  %v4916_v47 = vunpack.c.h.s8.bf16 %v5367_v62  ;;  %v4908_v3 = vunpack.c.h.s8.bf16 %v5363_v19  ;;  %v4907_v37 = vunpack.c.l.s8.bf16 %v5363_v19 }
 0xc76   :  { %v4723_v61 = vadd.f32 %v5531_v63, %v5491_v56  ;;  %v4712_v43 = vadd.f32 %v5522_v59, %v5482_v57  ;;  %v4743_v32 = vmul.f32 0.002603962, %v4715_v13  ;;  %v5836_v56 = vld [vmem:[#allocation13 + $0x50] sm:$0xff]  }
 0xc77   :  { %v5533_v16 = vpop.f32.mrf.mxu0 }
 0xc78   :  { %v5534_v49 = vadd.f32 %v5533_v16, %v5532_v36  ;;  %v4745_v36 = vmul.f32 0.002603962, %v4723_v61  ;;  %v4742_v18 = vmul.f32 0.002603962, %v4712_v43  ;;  %v5832_v61 = vld [vmem:[#allocation13 + $0x28] sm:$0xff]   ;;  %v4914_v16 = vunpack.c.h.s8.bf16 %v5366_v10 }
 0xc79   :  { %v5535_v38 = vpop.f32.mrf.mxu0 }
 0xc7a   :  { %v4728_v11 = vadd.f32 %v5534_v49, %v5494_v8  ;;  %v4760_v25 = vpack.c.bf16 %v4745_v36, %v4744_v5  ;;  %v4759_v35 = vpack.c.bf16 %v4743_v32, %v4742_v18  ;;  %v5364_v8 = vld [vmem:[%s7064_s10 + $0x160] sm:$0xff] }
 0xc7b   :  { %v5536_v29 = vpop.f32.mrf.mxu0 }
 0xc7c   :  { %v5537_v60 = vadd.f32 %v5536_v29, %v5535_v38  ;;  %v4746_v12 = vmul.f32 0.002603962, %v4728_v11 }
 0xc7d   :  { %v5538_v46 = vpop.f32.mrf.mxu0 }
 0xc7e   :  { %v4731_v52 = vadd.f32 %v5537_v60, %v5497_v50  ;;  %v5365_v60 = vld [vmem:[%s7064_s10 + $0x168] sm:$0xff] }
 0xc7f   :  { %v5539_v23 = vpop.f32.mrf.mxu0  ;;  %v5361_v50 = vld [vmem:[%s7064_s10 + $0x148] sm:$0xff]  ;;  %v4911_v49 = vunpack.c.l.s8.bf16 %v5365_v60 }
 0xc80   :  { %v5540_v4 = vadd.f32 %v5539_v23, %v5538_v46  ;;  %v4747_v38 = vmul.f32 0.002603962, %v4731_v52  ;;  %v4906_v23 = vunpack.c.h.s8.bf16 %v5362_v22  ;;  %v4909_v52 = vunpack.c.l.s8.bf16 %v5364_v8 }
 0xc81   :  { %v5541_v20 = vpop.f32.mrf.mxu0 }
 0xc82   :  { %v4736_v33 = vadd.f32 %v5540_v4, %v5500_v55  ;;  %v4761_v15 = vpack.c.bf16 %v4747_v38, %v4746_v12  ;;  %v4905_v4 = vunpack.c.l.s8.bf16 %v5362_v22  ;;  %v4904_v55 = vunpack.c.h.s8.bf16 %v5361_v50 }
 0xc83   :  { %v5542_v2 = vpop.f32.mrf.mxu0 }
 0xc84   :  { %v5543_v26 = vadd.f32 %v5542_v2, %v5541_v20  ;;  %v4748_v29 = vmul.f32 0.002603962, %v4736_v33  ;;  %v4912_v20 = vunpack.c.h.s8.bf16 %v5365_v60  ;;  %v4910_v2 = vunpack.c.h.s8.bf16 %v5364_v8 }
 0xc86   :  { %v4739_v45 = vadd.f32 %v5543_v26, %v5503_v54  ;;  %v4903_v54 = vunpack.c.l.s8.bf16 %v5361_v50  ;;  %v5835_v26 = vld [vmem:[#allocation13 + $0x40] sm:$0xff]  }
 0xc87   :  { %5680 = vmatprep.mubr.msk.bf16.mxu0 %vm4471_vm2, %v5835_v26 }
 0xc88   :  { %v4749_v46 = vmul.f32 0.002603962, %v4739_v45 }
 0xc8a   :  { %v4762_v41 = vpack.c.bf16 %v4749_v46, %v4748_v29 }
 0xc8c   :  { %5656 = vmatprep.subr.bf16.mxu1 %v4762_v41 }
 0xc8d   :  { %5657 = vmatpush3.bf16.msra.mxu1 %v4762_v41  ;;  %v7142_v41 = vld [vmem:[#allocation29_spill] sm:$0xff] }
 0xc8e   :  { %5658 = vmatprep.subr.bf16.mxu1 %v4761_v15 }
 0xc91   :  { %5659 = vmatpush3.bf16.msra.mxu1 %v4761_v15  ;;  %v7143_v15 = vld [vmem:[#allocation30_spill] sm:$0xff] }
 0xc92   :  { %5660 = vmatprep.subr.bf16.mxu1 %v4760_v25 }
 0xc95   :  { %5661 = vmatpush3.bf16.msra.mxu1 %v4760_v25 }
 0xc96   :  { %5662 = vmatprep.subr.bf16.mxu1 %v4759_v35 }
 0xc99   :  { %5663 = vmatpush3.bf16.msra.mxu1 %v4759_v35 }
 0xc9a   :  { %5592 = vmatprep.subr.bf16.mxu1 %v4916_v47 }
 0xc9c   :  { %5665 = vmatmul.mubr.msk.bf16.vlgmr.msra.gmra.mxu1 %vm4471_vm2, %v5832_v61 }
 0xc9d   :  { %5593 = vmatpush3.bf16.msra.mxu1 %v4908_v3  ;;  %5668 = vmatprep.mubr.msk.bf16.mxu1 %vm4471_vm2, %v5833_v53 }
 0xc9e   :  { %5594 = vmatprep.subr.bf16.mxu1 %v4915_v14 }
 0xca1   :  { %5595 = vmatpush3.bf16.msra.mxu1 %v4907_v37 }
 0xca2   :  { %5596 = vmatprep.subr.bf16.mxu1 %v4914_v16 }
 0xca4   :  { %5669 = vmatmul.mubr.msk.bf16.gmra.mxu1 %vm4471_vm2, %v5834_v21 }
 0xca5   :  { %5597 = vmatpush3.bf16.msra.mxu1 %v4906_v23  ;;  %5014 = vmatprep.mubr.bf16.mxu1 %v6816_v1  ;;  %v5360_v1 = vld [vmem:[%s7064_s10 + $0x140] sm:$0xff] }
 0xca6   :  { %5598 = vmatprep.subr.bf16.mxu1 %v4913_v48  ;;  %v4902_v63 = vunpack.c.h.s8.bf16 %v5360_v1  ;;  %v4901_v33 = vunpack.c.l.s8.bf16 %v5360_v1 }
 0xca9   :  { %5599 = vmatpush3.bf16.msra.mxu1 %v4905_v4 }
 0xcaa   :  { %5600 = vmatprep.subr.bf16.mxu1 %v4912_v20 }
 0xcad   :  { %5601 = vmatpush3.bf16.msra.mxu1 %v4904_v55 }
 0xcae   :  { %5602 = vmatprep.subr.bf16.mxu1 %v4911_v49 }
 0xcb1   :  { %5603 = vmatpush3.bf16.msra.mxu1 %v4903_v54 }
 0xcb2   :  { %5604 = vmatprep.subr.bf16.mxu1 %v4910_v2 }
 0xcb5   :  { %5605 = vmatpush3.bf16.msra.mxu1 %v4902_v63 }
 0xcb6   :  { %5606 = vmatprep.subr.bf16.mxu1 %v4909_v52 }
 0xcb9   :  { %5607 = vmatpush3.bf16.msra.mxu1 %v4901_v33 }
 0xcbc   :  { %5015 = vmatmul.mubr.bf16.vlgmr.msra.gmra.mxu1 %v6814_v24  ;;  %v5327_v24 = vld [vmem:[%s7065_s11] ss:$0 sm:$0xff]  ;;  %s6024_s11 = smov [#allocation14]  }
 0xcbd   :  { %5022 = vmatprep.mubr.bf16.mxu1 %v6833_v58  ;;  %v7009_v58 = vpop.f32.mrf.mxu0  ;;  %v4558_v7 = vadd.f32 %v6954_v39, %v5327_v24  ;;  %v4556_v38 = vadd.f32 %v5327_v24, %v6956_v6  ;;  %v4561_v46 = vadd.f32 %v6958_v42, %v5327_v24  ;;  %v4559_v44 = vadd.f32 %v5327_v24, %v6960_v9  ;;  %s5186_s19 = sshll.u32 %s6024_s11, 4  ;;  %s5187_s19 = int_to_ptr.vmem [resolvable:$true] %s5186_s19 }
 0xcbe   :  { %v4562_v57 = vadd.f32 %v7142_v41, %v5327_v24  ;;  %v4560_v43 = vadd.f32 %v5327_v24, %v7143_v15  ;;  %s5980_s6 = scalar_lea.vmem %s5187_s19, 1024  ;;  %p5985_p8 = scmp.lt.s32.totalorder %s5187_s19, %s5187_s19 }
 0xcbf   :  { %v7015_v11 = vpop.f32.mrf.mxu0  ;;  %p5981_p7 = scmp.ne.s32.totalorder %s5187_s19, %s5980_s6  ;;  %p5986_p9 = scmp.lt.s32.totalorder %s5980_s6, %s5980_s6 }
 0xcc1   :  { %v7023_v0 = vpop.f32.mrf.mxu0  ;;  %p5987_p10 = por %p5986_p9, %p5985_p8 }
 0xcc3   :  { %v5572_v13 = vpop.f32.mrf.mxu0  ;;  %p5988_p11 = pnand %p5987_p10, %p5981_p7 }
 0xcc4   :  { %5023 = vmatmul.mubr.bf16.gmra.mxu1 %v6831_v17  ;;  %v4557_v17 = vadd.f32 %v6950_v30, %v5327_v24  ;;  %v5573_v15 = vadd.f32 %v5572_v13, %v7023_v0 }
 0xcc5   :  { %5030 = vmatprep.mubr.bf16.mxu1 %v6849_v31  ;;  %v5574_v32 = vpop.f32.mrf.mxu0 }
 0xcc7   :  { %v5575_v18 = vpop.f32.mrf.mxu0 }
 0xcc9   :  { %v5577_v62 = vpop.f32.mrf.mxu0 }
 0xccb   :  { %v5578_v9 = vpop.f32.mrf.mxu0 }
 0xccc   :  { %5031 = vmatmul.mubr.bf16.gmra.mxu1 %v6847_v34  ;;  %v4555_v34 = vadd.f32 %v5327_v24, %v6952_v51 }
 0xccd   :  { %5038 = vmatprep.mubr.bf16.mxu1 %v6865_v40  ;;  %v5580_v35 = vpop.f32.mrf.mxu0 }
 0xccf   :  { %v5581_v61 = vpop.f32.mrf.mxu0 }
 0xcd1   :  { %v5583_v14 = vpop.f32.mrf.mxu0 }
 0xcd3   :  { %v5584_v16 = vpop.f32.mrf.mxu0 }
 0xcd4   :  { %5039 = vmatmul.mubr.bf16.gmra.mxu1 %v6863_v28  ;;  %v5585_v52 = vadd.f32 %v5584_v16, %v5583_v14  ;;  %v5570_v14 = vadd.f32 %v7015_v11, %v7009_v58  ;;  %v5837_v58 = vld [vmem:[#allocation13 + $0x48] sm:$0xff]   ;;  %v5838_v11 = vld [vmem:[#allocation13 + $0x58] sm:$0xff]  }
 0xcd5   :  { %5684 = vmatprep.mubr.msk.bf16.mxu1 %vm4471_vm2, %v5836_v56  ;;  %v5586_v23 = vpop.f32.mrf.mxu0  ;;  %v5582_v56 = vadd.f32 %v5581_v61, %v5580_v35 }
 0xcd7   :  { %v5587_v4 = vpop.f32.mrf.mxu0 }
 0xcd8   :  { %v5588_v33 = vadd.f32 %v5587_v4, %v5586_v23 }
 0xcd9   :  { %v5589_v55 = vpop.f32.mrf.mxu0 }
 0xcdb   :  { %v5590_v54 = vpop.f32.mrf.mxu0 }
 0xcdc   :  { %v5591_v24 = vadd.f32 %v5590_v54, %v5589_v55 }
 0xd5c   :  { %v5666_v31 = vpop.f32.mrf.mxu1 }
 0xd5d   :  { %v7012_v40 = vadd.f32 %v5666_v31, %v4557_v17 }
 0xd5e   :  { %v4829_v28 = vpop.f32.mrf.mxu1 }
 0xd5f   :  { %v7017_v45 = vadd.f32 %v4829_v28, %v4555_v34 }
 0xd60   :  { %v5667_v27 = vpop.f32.mrf.mxu1 }
 0xd61   :  { %v7020_v29 = vadd.f32 %v5667_v27, %v4558_v7  ;;  %v5579_v27 = vadd.f32 %v5578_v9, %v5577_v62 }
 0xd62   :  { %v4832_v30 = vpop.f32.mrf.mxu1 }
 0xd63   :  { %v7025_v51 = vadd.f32 %v4832_v30, %v4556_v38 }
 0xd64   :  { %v5670_v59 = vpop.f32.mrf.mxu1 }
 0xd65   :  { %v7028_v39 = vadd.f32 %v5670_v59, %v4561_v46  ;;  %v5576_v59 = vadd.f32 %v5575_v18, %v5574_v32 }
 0xd66   :  { %v4845_v12 = vpop.f32.mrf.mxu1 }
 0xd67   :  { %v7031_v36 = vadd.f32 %v4845_v12, %v4559_v44 }
 0xd68   :  { %v5671_v6 = vpop.f32.mrf.mxu1 }
 0xd69   :  { %v7034_v5 = vadd.f32 %v5671_v6, %v4562_v57 }
 0xd6a   :  { %v4848_v42 = vpop.f32.mrf.mxu1 }
 0xd6b   :  { %v7036_v25 = vadd.f32 %v4848_v42, %v4560_v43 }
 0xd7c   :  { %v5608_v47 = vpop.f32.mrf.mxu1 }
 0xd7e   :  { %v5609_v19 = vpop.f32.mrf.mxu1 }
 0xd7f   :  { %v5610_v43 = vadd.f32 %v5609_v19, %v5608_v47 }
 0xd80   :  { %v5611_v3 = vpop.f32.mrf.mxu1 }
 0xd81   :  { %v5017_v32 = vadd.f32 %v5610_v43, %v5570_v14 }
 0xd82   :  { %v5612_v53 = vpop.f32.mrf.mxu1 }
 0xd83   :  { %v5613_v44 = vadd.f32 %v5612_v53, %v5611_v3  ;;  %v5047_v13 = vmul.f32 0.002603962, %v5017_v32 }
 0xd84   :  { %v5614_v10 = vpop.f32.mrf.mxu1 }
 0xd85   :  { %v5020_v16 = vadd.f32 %v5613_v44, %v5573_v15 }
 0xd86   :  { %v5615_v37 = vpop.f32.mrf.mxu1 }
 0xd87   :  { %v5616_v38 = vadd.f32 %v5615_v37, %v5614_v10  ;;  %v5048_v3 = vmul.f32 0.002603962, %v5020_v16 }
 0xd88   :  { %v5617_v22 = vpop.f32.mrf.mxu1 }
 0xd89   :  { %v5025_v42 = vadd.f32 %v5616_v38, %v5576_v59  ;;  %v5064_v47 = vpack.c.bf16 %v5048_v3, %v5047_v13 }
 0xd8a   :  { %v5618_v21 = vpop.f32.mrf.mxu1 }
 0xd8b   :  { %v5619_v31 = vadd.f32 %v5618_v21, %v5617_v22  ;;  %v5049_v18 = vmul.f32 0.002603962, %v5025_v42 }
 0xd8c   :  { %v5620_v48 = vpop.f32.mrf.mxu1 }
 0xd8d   :  { %v5028_v12 = vadd.f32 %v5619_v31, %v5579_v27 }
 0xd8e   :  { %v5621_v60 = vpop.f32.mrf.mxu1 }
 0xd8f   :  { %v5622_v26 = vadd.f32 %v5621_v60, %v5620_v48  ;;  %v5050_v62 = vmul.f32 0.002603962, %v5028_v12 }
 0xd90   :  { %v5623_v20 = vpop.f32.mrf.mxu1 }
 0xd91   :  { %v5033_v30 = vadd.f32 %v5622_v26, %v5582_v56  ;;  %v5065_v0 = vpack.c.bf16 %v5050_v62, %v5049_v18 }
 0xd92   :  { %v5624_v50 = vpop.f32.mrf.mxu1 }
 0xd93   :  { %v5625_v2 = vadd.f32 %v5624_v50, %v5623_v20  ;;  %v5051_v35 = vmul.f32 0.002603962, %v5033_v30 }
 0xd94   :  { %v5626_v49 = vpop.f32.mrf.mxu1 }
 0xd95   :  { %v5036_v34 = vadd.f32 %v5625_v2, %v5585_v52 }
 0xd96   :  { %v5627_v8 = vpop.f32.mrf.mxu1 }
 0xd97   :  { %v5628_v1 = vadd.f32 %v5627_v8, %v5626_v49  ;;  %v5052_v41 = vmul.f32 0.002603962, %v5036_v34 }
 0xd98   :  { %v5629_v63 = vpop.f32.mrf.mxu1 }
 0xd99   :  { %v5041_v28 = vadd.f32 %v5628_v1, %v5588_v33  ;;  %v5066_v9 = vpack.c.bf16 %v5052_v41, %v5051_v35 }
 0xd9a   :  { %v5630_v17 = vpop.f32.mrf.mxu1 }
 0xd9b   :  { %v5631_v7 = vadd.f32 %v5630_v17, %v5629_v63  ;;  %v5053_v57 = vmul.f32 0.002603962, %v5041_v28 }
 0xd9d   :  { %v5044_v46 = vadd.f32 %v5631_v7, %v5591_v24 }
 0xd9f   :  { %v5054_v6 = vmul.f32 0.002603962, %v5044_v46 }
 0xda1   :  { %v5067_v61 = vpack.c.bf16 %v5054_v6, %v5053_v57 }
 0xda3   :  { %5672 = vmatprep.subr.bf16.mxu0 %v5067_v61  ;;  %5688 = vmatprep.subr.bf16.mxu1 %v5067_v61 }
 0xda4   :  { %5673 = vmatpush3.bf16.msra.mxu0 %v5067_v61  ;;  %5692 = vmatpush3.bf16.msra.mxu1 %v5067_v61 }
 0xda5   :  { %5674 = vmatprep.subr.bf16.mxu0 %v5066_v9  ;;  %5689 = vmatprep.subr.bf16.mxu1 %v5066_v9 }
 0xda8   :  { %5675 = vmatpush3.bf16.msra.mxu0 %v5066_v9  ;;  %5693 = vmatpush3.bf16.msra.mxu1 %v5066_v9 }
 0xda9   :  { %5676 = vmatprep.subr.bf16.mxu0 %v5065_v0  ;;  %5690 = vmatprep.subr.bf16.mxu1 %v5065_v0 }
 0xdac   :  { %5677 = vmatpush3.bf16.msra.mxu0 %v5065_v0  ;;  %5694 = vmatpush3.bf16.msra.mxu1 %v5065_v0 }
 0xdad   :  { %5678 = vmatprep.subr.bf16.mxu0 %v5064_v47  ;;  %5691 = vmatprep.subr.bf16.mxu1 %v5064_v47 }
 0xdb0   :  { %5679 = vmatpush3.bf16.msra.mxu0 %v5064_v47  ;;  %5695 = vmatpush3.bf16.msra.mxu1 %v5064_v47 }
 0xdb3   :  { %5681 = vmatmul.mubr.msk.bf16.vlgmr.msra.gmra.mxu0 %vm4471_vm2, %v5837_v58  ;;  %5685 = vmatmul.mubr.msk.bf16.vlgmr.msra.gmra.mxu1 %vm4471_vm2, %v5838_v11 }
 0xe73   :  { %v5682_v19 = vpop.f32.mrf.mxu0  ;;  %v5686_v53 = vpop.f32.mrf.mxu1 }
 0xe74   :  { %v5167_v10 = vadd.f32 %v5682_v19, %v7012_v40  ;;  %v5171_v37 = vadd.f32 %v5686_v53, %v7028_v39 }
 0xe75   :  { %v5134_v22 = vpop.f32.mrf.mxu0  ;;  %v5150_v21 = vpop.f32.mrf.mxu1 }
 0xe76   :  { %5175 = vst [vmem:[#allocation14 + $0x10] sm:$0xff] %v5167_v10  ;;  %5179 = vst [vmem:[#allocation14 + $0x30] sm:$0xff] %v5171_v37  ;;  %v5165_v23 = vadd.f32 %v5134_v22, %v7017_v45  ;;  %v5169_v48 = vadd.f32 %v5150_v21, %v7031_v36 }
 0xe77   :  { %v5683_v60 = vpop.f32.mrf.mxu0  ;;  %v5687_v4 = vpop.f32.mrf.mxu1 }
 0xe78   :  { %5173 = vst [vmem:[#allocation14] sm:$0xff] %v5165_v23  ;;  %5177 = vst [vmem:[#allocation14 + $0x20] sm:$0xff] %v5169_v48  ;;  %v5168_v20 = vadd.f32 %v5683_v60, %v7020_v29  ;;  %v5172_v40 = vadd.f32 %v5687_v4, %v7034_v5 }
 0xe79   :  { %v5137_v50 = vpop.f32.mrf.mxu0  ;;  %v5153_v39 = vpop.f32.mrf.mxu1 }
 0xe7a   :  { %5176 = vst [vmem:[#allocation14 + $0x18] sm:$0xff] %v5168_v20  ;;  %5180 = vst [vmem:[#allocation14 + $0x38] sm:$0xff] %v5172_v40  ;;  %v5166_v55 = vadd.f32 %v5137_v50, %v7025_v51  ;;  %v5170_v45 = vadd.f32 %v5153_v39, %v7036_v25 }
 0xe7c   :  { %5174 = vst [vmem:[#allocation14 + $0x8] sm:$0xff] %v5166_v55  ;;  %5178 = vst [vmem:[#allocation14 + $0x28] sm:$0xff] %v5170_v45 }
 0xe7d   :  { %5991 = shalt.err (!%p5988_p11)
}
 0xe7e   :  { %s6025_s9 = smov 128   ;;  %s6026_s20 = smov 8  }
 0xe7f   :  { %5192 = dma.vmem_to_hbm [thread:$0]  %s5187_s19, 1024, %s7066_s12, [#allocation4], %s6025_s9, %s6025_s9, %s6026_s20  }
 0xe80   :  { %6008 = dma.done.wait [#allocation4], 1024  }
 0xe81   :  { %6009 = vsyncadd [#allocation4], 4294966272 }
 0xe82   :  { %5196 = vsyncpa [#allocation3], 1 }
 0xe83   :  { %5197 = vsyncpa [#allocation6], 1 }
 0xe84   :  { %5198 = vsyncpa [#allocation9], 1 }
 0xe85   :  { %5199 = vsyncpa [#allocation12], 1 }
 0xe86   :  { %5200 = vsyncpa [#allocation4], 1 }

</bundles_post_ra>
